<compile_context>
chip_gen: v7x
topology: tpu7x:2x2x1
jax: 0.10.0
libtpu: 0.0.40
codegen_flags: <defaults>
</compile_context>

<pallas_src>
import jax
import jax.numpy as jnp
from jax import lax
from jax.experimental import pallas as pl
from jax.experimental.pallas import tpu as pltpu


def _cdiv(a, b):
    return (a + b - 1) // b


def _round_up(a, b):
    return _cdiv(a, b) * b


# ----------------------------------------------------------------------------
# Pallas kernel: fused  relu(x @ w + b)   (bf16 MXU operands, f32 accumulate)
# ----------------------------------------------------------------------------
def _matmul_bias_relu_kernel(x_ref, w_ref, b_ref, o_ref):
    acc = jnp.dot(x_ref[...], w_ref[...], preferred_element_type=jnp.float32)
    o_ref[...] = jnp.maximum(acc + b_ref[...], 0.0).astype(o_ref.dtype)


def fused_matmul_bias_relu(x, w, b, *, out_dtype, tm_max=128):
    """relu(x @ w + b) fused in one Pallas TPU kernel.

    x: (M, K) bf16,  w: (K, N) bf16,  b: (1, N) f32,  N % 128 == 0.
    Only M is tiled; K and N stay whole (K <= 3136, N <= 512 for this network,
    so a weight block is <= 3.2 MB bf16 and fits VMEM comfortably even when
    double-buffered, well under the 32 MiB default scoped limit on all chips).
    """
    M, K = x.shape
    K2, N = w.shape
    assert K == K2 and b.shape == (1, N) and N % 128 == 0
    # Adapt the row tile to M (multiple of 16 for bf16 sublane packing) so
    # small-M calls (FC: M=batch, conv3: M=B*49) don't pad all the way to 128.
    nblocks = _cdiv(M, tm_max)
    tm = _round_up(_cdiv(M, nblocks), 16)
    m_pad = nblocks * tm
    if m_pad != M:
        x = jnp.pad(x, ((0, m_pad - M), (0, 0)))
    out = pl.pallas_call(
        _matmul_bias_relu_kernel,
        out_shape=jax.ShapeDtypeStruct((m_pad, N), out_dtype),
        grid=(nblocks,),
        in_specs=[
            pl.BlockSpec((tm, K), lambda i: (i, 0)),
            pl.BlockSpec((K, N), lambda i: (0, 0)),   # weight: constant block
            pl.BlockSpec((1, N), lambda i: (0, 0)),   # bias:   constant block
        ],
        out_specs=pl.BlockSpec((tm, N), lambda i: (i, 0)),
        compiler_params=pltpu.CompilerParams(
            dimension_semantics=("parallel",)),
    )(x, w, b)
    return out[:M]


# ----------------------------------------------------------------------------
# Conv layer = im2col (glue) + fused Pallas matmul kernel
# ----------------------------------------------------------------------------
def conv2d_relu(x_nhwc, wmat, bias, *, cout, ksize, stride):
    B, H, W, Cin = x_nhwc.shape
    OH = (H - ksize) // stride + 1
    OW = (W - ksize) // stride + 1
    # TODO(synk): patch extraction (im2col) still runs as XLA glue in bf16;
    # the strided (kh, kw) windows aren't expressible with rectangular
    # BlockSpecs, so a fully in-kernel version would need manual strided DMA.
    cols = []
    for i in range(ksize):
        for j in range(ksize):
            cols.append(
                x_nhwc[:, i:i + stride * OH:stride, j:j + stride * OW:stride, :])
    patches = jnp.concatenate(cols, axis=-1)            # (B, OH, OW, K*K*Cin), (kh,kw,cin) order
    patches = patches.reshape(B * OH * OW, ksize * ksize * Cin)
    out = fused_matmul_bias_relu(patches, wmat, bias, out_dtype=jnp.bfloat16)
    return out[:, :cout].reshape(B, OH, OW, cout)       # drop zero-padded lanes


def atari_cnn_forward(p, x_nchw):
    x = jnp.transpose(x_nchw, (0, 2, 3, 1)).astype(jnp.bfloat16)              # NCHW -> NHWC
    x = conv2d_relu(x, p["conv1_w"], p["conv1_b"], cout=32, ksize=8, stride=4)  # 84 -> 20
    x = conv2d_relu(x, p["conv2_w"], p["conv2_b"], cout=64, ksize=4, stride=2)  # 20 -> 9
    x = conv2d_relu(x, p["conv3_w"], p["conv3_b"], cout=64, ksize=3, stride=1)  # 9  -> 7
    B = x.shape[0]
    flat = x.reshape(B, -1)   # NHWC flatten; fc weight rows were pre-permuted to match
    return fused_matmul_bias_relu(flat, p["fc_w"], p["fc_b"], out_dtype=jnp.float32)


# ----------------------------------------------------------------------------
# One-time parameter prep (hoisted out of the forward pass)
# ----------------------------------------------------------------------------
def prepare_params(params):
    """Torch-layout f32 params -> kernel-ready form: (kh,kw,cin)xCout matmul
    layout, Cout zero-padded to 128 lanes, bf16 weights, f32 bias rows, and
    the fc weight pre-permuted to NHWC-flatten order and pre-transposed to
    (K, N). Numerics identical to the torch module (up to bf16 rounding)."""
    def conv_prep(w_oihw, b):
        cout, cin, kh, kw = w_oihw.shape
        npad = _round_up(cout, 128)
        wmat = jnp.transpose(w_oihw, (2, 3, 1, 0)).reshape(kh * kw * cin, cout)
        wmat = jnp.pad(wmat, ((0, 0), (0, npad - cout))).astype(jnp.bfloat16)
        brow = jnp.pad(b, (0, npad - cout)).astype(jnp.float32).reshape(1, npad)
        return wmat, brow

    c1w, c1b = conv_prep(params["conv1_w"], params["conv1_b"])
    c2w, c2b = conv_prep(params["conv2_w"], params["conv2_b"])
    c3w, c3b = conv_prep(params["conv3_w"], params["conv3_b"])

    fdim, flat_in = params["fc_w"].shape           # torch (out, in), in = NCHW flatten order
    c = params["conv3_w"].shape[0]                 # 64 channels out of conv3
    h = w = int(round((flat_in // c) ** 0.5))      # 7 x 7
    fw = params["fc_w"].reshape(fdim, c, h, w)
    fw = jnp.transpose(fw, (2, 3, 1, 0)).reshape(flat_in, fdim)  # NHWC-flatten rows, (K, N)
    fw = fw.astype(jnp.bfloat16)
    fb = params["fc_b"].astype(jnp.float32).reshape(1, fdim)
    assert fdim % 128 == 0
    return {"conv1_w": c1w, "conv1_b": c1b,
            "conv2_w": c2w, "conv2_b": c2b,
            "conv3_w": c3w, "conv3_b": c3b,
            "fc_w": fw, "fc_b": fb}


# ----------------------------------------------------------------------------
# Deterministic parameter init (PyTorch shapes; uniform(-1/sqrt(fan_in), ...))
# ----------------------------------------------------------------------------
def init_params(key, input_channels=4, feature_dim=512):
    conv_out = 64 * 7 * 7  # 3136, as in AtariCNN._get_conv_output_size for 84x84

    def u(k, shape, fan_in):
        bound = 1.0 / (fan_in ** 0.5)
        return jax.random.uniform(k, shape, jnp.float32, -bound, bound)

    ks = jax.random.split(key, 8)
    return {
        "conv1_w": u(ks[0], (32, input_channels, 8, 8), input_channels * 8 * 8),
        "conv1_b": u(ks[1], (32,), input_channels * 8 * 8),
        "conv2_w": u(ks[2], (64, 32, 4, 4), 32 * 4 * 4),
        "conv2_b": u(ks[3], (64,), 32 * 4 * 4),
        "conv3_w": u(ks[4], (64, 64, 3, 3), 64 * 3 * 3),
        "conv3_b": u(ks[5], (64,), 64 * 3 * 3),
        "fc_w":    u(ks[6], (feature_dim, conv_out), conv_out),   # torch (out, in)
        "fc_b":    u(ks[7], (feature_dim,), conv_out),
    }


# ----------------------------------------------------------------------------
# Pure-JAX f32 reference (same math via lax.conv) for the correctness check
# ----------------------------------------------------------------------------
def atari_cnn_reference(params, x_nchw):
    def conv(x, w, b, s):
        y = lax.conv_general_dilated(
            x, w, window_strides=(s, s), padding="VALID",
            dimension_numbers=("NCHW", "OIHW", "NCHW"))
        return jax.nn.relu(y + b[None, :, None, None])

    x = x_nchw.astype(jnp.float32)
    x = conv(x, params["conv1_w"], params["conv1_b"], 4)
    x = conv(x, params["conv2_w"], params["conv2_b"], 2)
    x = conv(x, params["conv3_w"], params["conv3_b"], 1)
    flat = x.reshape(x.shape[0], -1)
    return jax.nn.relu(flat @ params["fc_w"].T + params["fc_b"])


if __name__ == "__main__":
    key = jax.random.PRNGKey(0)
    pkey, xkey = jax.random.split(key)
    params = init_params(pkey)
    prepped = prepare_params(params)

    # batch=2, channels=4, spatial=84x84 (84 is required: the fc layer expects
    # the 64*7*7 = 3136 features produced by the conv stack on 84x84 inputs).
    x = jax.random.normal(xkey, (2, 4, 84, 84), dtype=jnp.float32)

    fwd = jax.jit(atari_cnn_forward)
    out = jax.block_until_ready(fwd(prepped, x))
    assert out.shape == (2, 512), out.shape

    ref = jax.block_until_ready(atari_cnn_reference(params, x))
    max_err = float(jnp.max(jnp.abs(out - ref)))
    assert jnp.allclose(out, ref, atol=2e-2, rtol=2e-2), max_err

    print("KERNEL_OK")
</pallas_src>

<mosaic_0001>
module attributes {stable_mosaic.version = 11 : i64} {
  func.func @_matmul_bias_relu_kernel(%arg0: i32, %arg1: memref<128x256xbf16, #tpu.memory_space<vmem>>, %arg2: memref<256x128xbf16, #tpu.memory_space<vmem>>, %arg3: memref<1x128xf32, #tpu.memory_space<vmem>>, %arg4: memref<128x128xbf16, #tpu.memory_space<vmem>>) attributes {dimension_semantics = [#tpu.dimension_semantics<parallel>], iteration_bounds = array<i64: 7>, scalar_prefetch = 0 : i64, scratch_operands = 0 : i64, tpu.core_type = #tpu.core_type<tc>, window_params = [{transform_indices = @transform_0, window_bounds = array<i64: 128, 256>}, {pipeline_mode = #tpu.pipeline_mode<synchronous>, transform_indices = @transform_1, window_bounds = array<i64: 256, 128>}, {pipeline_mode = #tpu.pipeline_mode<synchronous>, transform_indices = @transform_2, window_bounds = array<i64: 1, 128>}, {transform_indices = @transform_3, window_bounds = array<i64: 128, 128>}]} {
    %c0 = arith.constant 0 : index
    %c0_0 = arith.constant 0 : index
    %0 = vector.load %arg1[%c0, %c0_0] : memref<128x256xbf16, #tpu.memory_space<vmem>>, vector<128x256xbf16>
    %c0_1 = arith.constant 0 : index
    %c0_2 = arith.constant 0 : index
    %1 = vector.load %arg2[%c0_1, %c0_2] : memref<256x128xbf16, #tpu.memory_space<vmem>>, vector<256x128xbf16>
    %cst = arith.constant dense<0.000000e+00> : vector<128x128xf32>
    %2 = tpu.matmul %0, %1, %cst {dimension_numbers = #tpu.dot_dimension_numbers<[1], [0], [0], [1], [0, 0, 1, 1], [], []>} : vector<128x256xbf16>, vector<256x128xbf16>, vector<128x128xf32> -> vector<128x128xf32>
    %c0_3 = arith.constant 0 : index
    %c0_4 = arith.constant 0 : index
    %3 = vector.load %arg3[%c0_3, %c0_4] : memref<1x128xf32, #tpu.memory_space<vmem>>, vector<1x128xf32>
    %4 = vector.broadcast %3 : vector<1x128xf32> to vector<128x128xf32>
    %5 = arith.addf %2, %4 : vector<128x128xf32>
    %cst_5 = arith.constant 0.000000e+00 : f32
    %6 = vector.broadcast %cst_5 : f32 to vector<128x128xf32>
    %7 = arith.maximumf %5, %6 : vector<128x128xf32>
    %8 = arith.truncf %7 : vector<128x128xf32> to vector<128x128xbf16>
    %c0_6 = arith.constant 0 : index
    %c0_7 = arith.constant 0 : index
    %9 = vector.load %arg4[%c0_6, %c0_7] : memref<128x128xbf16, #tpu.memory_space<vmem>>, vector<128x128xbf16>
    tpu.vector_store %arg4[%c0_6, %c0_7], %8 {strides = array<i32>} : memref<128x128xbf16, #tpu.memory_space<vmem>>, vector<128x128xbf16>,
    return
  }
  func.func @transform_0(%arg0: i32) -> (i32, i32) {
    %c0_i32 = arith.constant 0 : i32
    %c0_i32_0 = arith.constant 0 : i32
    return %arg0, %c0_i32 : i32, i32
  }
  func.func @transform_1(%arg0: i32) -> (i32, i32) {
    %c0_i32 = arith.constant 0 : i32
    %c0_i32_0 = arith.constant 0 : i32
    %c0_i32_1 = arith.constant 0 : i32
    return %c0_i32, %c0_i32_0 : i32, i32
  }
  func.func @transform_2(%arg0: i32) -> (i32, i32) {
    %c0_i32 = arith.constant 0 : i32
    %c0_i32_0 = arith.constant 0 : i32
    %c0_i32_1 = arith.constant 0 : i32
    return %c0_i32, %c0_i32_0 : i32, i32
  }
  func.func @transform_3(%arg0: i32) -> (i32, i32) {
    %c0_i32 = arith.constant 0 : i32
    %c0_i32_0 = arith.constant 0 : i32
    return %arg0, %c0_i32 : i32, i32
  }
}

module attributes {stable_mosaic.version = 11 : i64} {
  func.func @_matmul_bias_relu_kernel(%arg0: i32, %arg1: memref<96x512xbf16, #tpu.memory_space<vmem>>, %arg2: memref<512x128xbf16, #tpu.memory_space<vmem>>, %arg3: memref<1x128xf32, #tpu.memory_space<vmem>>, %arg4: memref<96x128xbf16, #tpu.memory_space<vmem>>) attributes {dimension_semantics = [#tpu.dimension_semantics<parallel>], iteration_bounds = array<i64: 2>, scalar_prefetch = 0 : i64, scratch_operands = 0 : i64, tpu.core_type = #tpu.core_type<tc>, window_params = [{transform_indices = @transform_0, window_bounds = array<i64: 96, 512>}, {pipeline_mode = #tpu.pipeline_mode<synchronous>, transform_indices = @transform_1, window_bounds = array<i64: 512, 128>}, {pipeline_mode = #tpu.pipeline_mode<synchronous>, transform_indices = @transform_2, window_bounds = array<i64: 1, 128>}, {transform_indices = @transform_3, window_bounds = array<i64: 96, 128>}]} {
    %c0 = arith.constant 0 : index
    %c0_0 = arith.constant 0 : index
    %0 = vector.load %arg1[%c0, %c0_0] : memref<96x512xbf16, #tpu.memory_space<vmem>>, vector<96x512xbf16>
    %c0_1 = arith.constant 0 : index
    %c0_2 = arith.constant 0 : index
    %1 = vector.load %arg2[%c0_1, %c0_2] : memref<512x128xbf16, #tpu.memory_space<vmem>>, vector<512x128xbf16>
    %cst = arith.constant dense<0.000000e+00> : vector<96x128xf32>
    %2 = tpu.matmul %0, %1, %cst {dimension_numbers = #tpu.dot_dimension_numbers<[1], [0], [0], [1], [0, 0, 1, 1], [], []>} : vector<96x512xbf16>, vector<512x128xbf16>, vector<96x128xf32> -> vector<96x128xf32>
    %c0_3 = arith.constant 0 : index
    %c0_4 = arith.constant 0 : index
    %3 = vector.load %arg3[%c0_3, %c0_4] : memref<1x128xf32, #tpu.memory_space<vmem>>, vector<1x128xf32>
    %4 = vector.broadcast %3 : vector<1x128xf32> to vector<96x128xf32>
    %5 = arith.addf %2, %4 : vector<96x128xf32>
    %cst_5 = arith.constant 0.000000e+00 : f32
    %6 = vector.broadcast %cst_5 : f32 to vector<96x128xf32>
    %7 = arith.maximumf %5, %6 : vector<96x128xf32>
    %8 = arith.truncf %7 : vector<96x128xf32> to vector<96x128xbf16>
    %c0_6 = arith.constant 0 : index
    %c0_7 = arith.constant 0 : index
    %9 = vector.load %arg4[%c0_6, %c0_7] : memref<96x128xbf16, #tpu.memory_space<vmem>>, vector<96x128xbf16>
    tpu.vector_store %arg4[%c0_6, %c0_7], %8 {strides = array<i32>} : memref<96x128xbf16, #tpu.memory_space<vmem>>, vector<96x128xbf16>,
    return
  }
  func.func @transform_0(%arg0: i32) -> (i32, i32) {
    %c0_i32 = arith.constant 0 : i32
    %c0_i32_0 = arith.constant 0 : i32
    return %arg0, %c0_i32 : i32, i32
  }
  func.func @transform_1(%arg0: i32) -> (i32, i32) {
    %c0_i32 = arith.constant 0 : i32
    %c0_i32_0 = arith.constant 0 : i32
    %c0_i32_1 = arith.constant 0 : i32
    return %c0_i32, %c0_i32_0 : i32, i32
  }
  func.func @transform_2(%arg0: i32) -> (i32, i32) {
    %c0_i32 = arith.constant 0 : i32
    %c0_i32_0 = arith.constant 0 : i32
    %c0_i32_1 = arith.constant 0 : i32
    return %c0_i32, %c0_i32_0 : i32, i32
  }
  func.func @transform_3(%arg0: i32) -> (i32, i32) {
    %c0_i32 = arith.constant 0 : i32
    %c0_i32_0 = arith.constant 0 : i32
    return %arg0, %c0_i32 : i32, i32
  }
}

module attributes {stable_mosaic.version = 11 : i64} {
  func.func @_matmul_bias_relu_kernel(%arg0: i32, %arg1: memref<112x576xbf16, #tpu.memory_space<vmem>>, %arg2: memref<576x128xbf16, #tpu.memory_space<vmem>>, %arg3: memref<1x128xf32, #tpu.memory_space<vmem>>, %arg4: memref<112x128xbf16, #tpu.memory_space<vmem>>) attributes {dimension_semantics = [#tpu.dimension_semantics<parallel>], iteration_bounds = array<i64: 1>, scalar_prefetch = 0 : i64, scratch_operands = 0 : i64, tpu.core_type = #tpu.core_type<tc>, window_params = [{transform_indices = @transform_0, window_bounds = array<i64: 112, 576>}, {pipeline_mode = #tpu.pipeline_mode<synchronous>, transform_indices = @transform_1, window_bounds = array<i64: 576, 128>}, {pipeline_mode = #tpu.pipeline_mode<synchronous>, transform_indices = @transform_2, window_bounds = array<i64: 1, 128>}, {transform_indices = @transform_3, window_bounds = array<i64: 112, 128>}]} {
    %c0 = arith.constant 0 : index
    %c0_0 = arith.constant 0 : index
    %0 = vector.load %arg1[%c0, %c0_0] : memref<112x576xbf16, #tpu.memory_space<vmem>>, vector<112x576xbf16>
    %c0_1 = arith.constant 0 : index
    %c0_2 = arith.constant 0 : index
    %1 = vector.load %arg2[%c0_1, %c0_2] : memref<576x128xbf16, #tpu.memory_space<vmem>>, vector<576x128xbf16>
    %cst = arith.constant dense<0.000000e+00> : vector<112x128xf32>
    %2 = tpu.matmul %0, %1, %cst {dimension_numbers = #tpu.dot_dimension_numbers<[1], [0], [0], [1], [0, 0, 1, 1], [], []>} : vector<112x576xbf16>, vector<576x128xbf16>, vector<112x128xf32> -> vector<112x128xf32>
    %c0_3 = arith.constant 0 : index
    %c0_4 = arith.constant 0 : index
    %3 = vector.load %arg3[%c0_3, %c0_4] : memref<1x128xf32, #tpu.memory_space<vmem>>, vector<1x128xf32>
    %4 = vector.broadcast %3 : vector<1x128xf32> to vector<112x128xf32>
    %5 = arith.addf %2, %4 : vector<112x128xf32>
    %cst_5 = arith.constant 0.000000e+00 : f32
    %6 = vector.broadcast %cst_5 : f32 to vector<112x128xf32>
    %7 = arith.maximumf %5, %6 : vector<112x128xf32>
    %8 = arith.truncf %7 : vector<112x128xf32> to vector<112x128xbf16>
    %c0_6 = arith.constant 0 : index
    %c0_7 = arith.constant 0 : index
    %9 = vector.load %arg4[%c0_6, %c0_7] : memref<112x128xbf16, #tpu.memory_space<vmem>>, vector<112x128xbf16>
    tpu.vector_store %arg4[%c0_6, %c0_7], %8 {strides = array<i32>} : memref<112x128xbf16, #tpu.memory_space<vmem>>, vector<112x128xbf16>,
    return
  }
  func.func @transform_0(%arg0: i32) -> (i32, i32) {
    %c0_i32 = arith.constant 0 : i32
    %c0_i32_0 = arith.constant 0 : i32
    return %arg0, %c0_i32 : i32, i32
  }
  func.func @transform_1(%arg0: i32) -> (i32, i32) {
    %c0_i32 = arith.constant 0 : i32
    %c0_i32_0 = arith.constant 0 : i32
    %c0_i32_1 = arith.constant 0 : i32
    return %c0_i32, %c0_i32_0 : i32, i32
  }
  func.func @transform_2(%arg0: i32) -> (i32, i32) {
    %c0_i32 = arith.constant 0 : i32
    %c0_i32_0 = arith.constant 0 : i32
    %c0_i32_1 = arith.constant 0 : i32
    return %c0_i32, %c0_i32_0 : i32, i32
  }
  func.func @transform_3(%arg0: i32) -> (i32, i32) {
    %c0_i32 = arith.constant 0 : i32
    %c0_i32_0 = arith.constant 0 : i32
    return %arg0, %c0_i32 : i32, i32
  }
}

module attributes {stable_mosaic.version = 11 : i64} {
  func.func @_matmul_bias_relu_kernel(%arg0: i32, %arg1: memref<16x3136xbf16, #tpu.memory_space<vmem>>, %arg2: memref<3136x512xbf16, #tpu.memory_space<vmem>>, %arg3: memref<1x512xf32, #tpu.memory_space<vmem>>, %arg4: memref<16x512xf32, #tpu.memory_space<vmem>>) attributes {dimension_semantics = [#tpu.dimension_semantics<parallel>], iteration_bounds = array<i64: 1>, scalar_prefetch = 0 : i64, scratch_operands = 0 : i64, tpu.core_type = #tpu.core_type<tc>, window_params = [{transform_indices = @transform_0, window_bounds = array<i64: 16, 3136>}, {pipeline_mode = #tpu.pipeline_mode<synchronous>, transform_indices = @transform_1, window_bounds = array<i64: 3136, 512>}, {pipeline_mode = #tpu.pipeline_mode<synchronous>, transform_indices = @transform_2, window_bounds = array<i64: 1, 512>}, {transform_indices = @transform_3, window_bounds = array<i64: 16, 512>}]} {
    %c0 = arith.constant 0 : index
    %c0_0 = arith.constant 0 : index
    %0 = vector.load %arg1[%c0, %c0_0] : memref<16x3136xbf16, #tpu.memory_space<vmem>>, vector<16x3136xbf16>
    %c0_1 = arith.constant 0 : index
    %c0_2 = arith.constant 0 : index
    %1 = vector.load %arg2[%c0_1, %c0_2] : memref<3136x512xbf16, #tpu.memory_space<vmem>>, vector<3136x512xbf16>
    %cst = arith.constant dense<0.000000e+00> : vector<16x512xf32>
    %2 = tpu.matmul %0, %1, %cst {dimension_numbers = #tpu.dot_dimension_numbers<[1], [0], [0], [1], [0, 0, 1, 1], [], []>} : vector<16x3136xbf16>, vector<3136x512xbf16>, vector<16x512xf32> -> vector<16x512xf32>
    %c0_3 = arith.constant 0 : index
    %c0_4 = arith.constant 0 : index
    %3 = vector.load %arg3[%c0_3, %c0_4] : memref<1x512xf32, #tpu.memory_space<vmem>>, vector<1x512xf32>
    %4 = vector.broadcast %3 : vector<1x512xf32> to vector<16x512xf32>
    %5 = arith.addf %2, %4 : vector<16x512xf32>
    %cst_5 = arith.constant 0.000000e+00 : f32
    %6 = vector.broadcast %cst_5 : f32 to vector<16x512xf32>
    %7 = arith.maximumf %5, %6 : vector<16x512xf32>
    %c0_6 = arith.constant 0 : index
    %c0_7 = arith.constant 0 : index
    %8 = vector.load %arg4[%c0_6, %c0_7] : memref<16x512xf32, #tpu.memory_space<vmem>>, vector<16x512xf32>
    tpu.vector_store %arg4[%c0_6, %c0_7], %7 {strides = array<i32>} : memref<16x512xf32, #tpu.memory_space<vmem>>, vector<16x512xf32>,
    return
  }
  func.func @transform_0(%arg0: i32) -> (i32, i32) {
    %c0_i32 = arith.constant 0 : i32
    %c0_i32_0 = arith.constant 0 : i32
    return %arg0, %c0_i32 : i32, i32
  }
  func.func @transform_1(%arg0: i32) -> (i32, i32) {
    %c0_i32 = arith.constant 0 : i32
    %c0_i32_0 = arith.constant 0 : i32
    %c0_i32_1 = arith.constant 0 : i32
    return %c0_i32, %c0_i32_0 : i32, i32
  }
  func.func @transform_2(%arg0: i32) -> (i32, i32) {
    %c0_i32 = arith.constant 0 : i32
    %c0_i32_0 = arith.constant 0 : i32
    %c0_i32_1 = arith.constant 0 : i32
    return %c0_i32, %c0_i32_0 : i32, i32
  }
  func.func @transform_3(%arg0: i32) -> (i32, i32) {
    %c0_i32 = arith.constant 0 : i32
    %c0_i32_0 = arith.constant 0 : i32
    return %arg0, %c0_i32 : i32, i32
  }
}

</mosaic_0001>

<bundles_post_ra>
// kernel: atari_cnn_forward.4
= control target key start
LH: loop header
LB: loop body
LE: loop exit
PB: predicated region body
PF: predicated region fallthrough
CT: control target
= control target key end

     0   :  { %s939_s12 = smov 0   ;;  %s1057_s0 = inlined_call_operand.vmem [shape: bf16[896,256], index: 0, kind: input, shape index: {}]   ;;  %s1058_s1 = inlined_call_operand.vmem [shape: bf16[256,128], index: 1, kind: input, shape index: {}]   ;;  %s1059_s2 = inlined_call_operand.vmem [shape: f32[1,128], index: 2, kind: input, shape index: {}]   ;;  %s1060_s3 = inlined_call_operand.vmem [shape: bf16[896,128], index: 3, kind: output, shape index: {}]  }
   0x1 LB: > { %s658_s13 = sadd.s32 4294967295, %s917_s12   ;;  %p662_p0 = scmp.ge.s32.totalorder %s917_s12, 1  ;;  %s917_s12 = sphi %s939_s12, %s13_s12  }
   0x2   : > { %p139_p1 = scmp.lt.s32.totalorder %s917_s12, 8 }
   0x4   : > { %p140_p2 = pnand %p662_p0, %p139_p1 }
   0x5   : > { %v871_v0 = vld [vmem:[%s1058_s1 + $0x40] sm:$0xff] (!%p140_p2)   ;;  %s663_s16 = sshll.u32 (!%p140_p2), %s658_s13, 4  ;;  %v873_v2 = vld [vmem:[%s1058_s1 + $0x48] sm:$0xff] (!%p140_p2)   ;;  %v875_v4 = vld [vmem:[%s1058_s1 + $0x50] sm:$0xff] (!%p140_p2)  }
   0x6   : > { %143 = sbr.rel (%p140_p2) target bundleno = 287 (0x11f), region = 32  ;;  %v872_v1 = vld [vmem:[%s1058_s1] sm:$0xff] (!%p140_p2)   ;;  %783 = vmatprep.subr.bf16.mxu0 (!%p140_p2), %v871_v0  ;;  %847 = vmatprep.subr.bf16.mxu1 (!%p140_p2), %v871_v0  ;;  %v874_v3 = vld [vmem:[%s1058_s1 + $0x8] sm:$0xff] (!%p140_p2)   ;;  %p165_p3 = scmp.lt.s32.totalorder (!%p140_p2), %s663_s16, 111  ;;  %v876_v5 = vld [vmem:[%s1058_s1 + $0x10] sm:$0xff] (!%p140_p2)  }
   0x7   : > { %784 = vmatpush3.bf16.msra.mxu0 (!%p140_p2), %v872_v1  ;;  %855 = vmatpush3.bf16.msra.mxu1 (!%p140_p2), %v872_v1  ;;  %v877_v6 = vld [vmem:[%s1058_s1 + $0x58] sm:$0xff] (!%p140_p2)   ;;  %v879_v8 = vld [vmem:[%s1058_s1 + $0x60] sm:$0xff] (!%p140_p2)   ;;  %v881_v10 = vld [vmem:[%s1058_s1 + $0x68] sm:$0xff] (!%p140_p2)  }
   0x8   : > { %785 = vmatprep.subr.bf16.mxu0 (!%p140_p2), %v873_v2  ;;  %848 = vmatprep.subr.bf16.mxu1 (!%p140_p2), %v873_v2  ;;  %v878_v7 = vld [vmem:[%s1058_s1 + $0x18] sm:$0xff] (!%p140_p2)   ;;  %v880_v9 = vld [vmem:[%s1058_s1 + $0x20] sm:$0xff] (!%p140_p2)   ;;  %v882_v13 = vld [vmem:[%s1058_s1 + $0x28] sm:$0xff] (!%p140_p2)  }
   0x9   : > { %v883_v14 = vld [vmem:[%s1058_s1 + $0x70] sm:$0xff] (!%p140_p2)   ;;  %v885_v16 = vld [vmem:[%s1058_s1 + $0x78] sm:$0xff] (!%p140_p2)   ;;  %v1022_v34 = vld [vmem:[%s1059_s2] ss:$0 sm:$0xff] (!%p140_p2) }
   0xa   : > { %v884_v15 = vld [vmem:[%s1058_s1 + $0x30] sm:$0xff] (!%p140_p2)   ;;  %v886_v17 = vld [vmem:[%s1058_s1 + $0x38] sm:$0xff] (!%p140_p2)  }
   0xb   : > { %786 = vmatpush3.bf16.msra.mxu0 (!%p140_p2), %v874_v3  ;;  %856 = vmatpush3.bf16.msra.mxu1 (!%p140_p2), %v874_v3 }
   0xc   : > { %787 = vmatprep.subr.bf16.mxu0 (!%p140_p2), %v875_v4  ;;  %849 = vmatprep.subr.bf16.mxu1 (!%p140_p2), %v875_v4 }
   0xd   : > { %s1062_s16 = smov (!%p165_p3, %s663_s16), 111 }
   0xe   : > { %s719_s4 = sshll.u32 %s1062_s16, 3  ;;  %s667_s28 = sshll.u32 %s1062_s16, 2 }
   0xf   : > { %788 = vmatpush3.bf16.msra.mxu0 %v876_v5  ;;  %857 = vmatpush3.bf16.msra.mxu1 %v876_v5  ;;  %s980_s9 = scalar_lea.vmem %s1057_s0, %s719_s4  ;;  %s1032_s4 = scalar_lea.vmem %s1060_s3, %s667_s28 }
  0x10   : > { %789 = vmatprep.subr.bf16.mxu0 %v877_v6  ;;  %850 = vmatprep.subr.bf16.mxu1 %v877_v6  ;;  %v889_v11 = vld [vmem:[%s980_s9 + $0x4] ss:$8 sps:$4 sm:$0xff]   ;;  %v887_v18 = vld [vmem:[%s980_s9] ss:$8 sps:$4 sm:$0xff]   ;;  %v893_v20 = vld [vmem:[%s980_s9 + $0x14] ss:$8 sps:$4 sm:$0xff]  }
  0x11   : > { %v892_v12 = vld [vmem:[%s980_s9 + $0x44] ss:$8 sps:$4 sm:$0xff]   ;;  %441 = vmatprep.mubr.bf16.mxu0 %v889_v11  ;;  %v890_v19 = vld [vmem:[%s980_s9 + $0x40] ss:$8 sps:$4 sm:$0xff]   ;;  %v895_v21 = vld [vmem:[%s980_s9 + $0x54] ss:$8 sps:$4 sm:$0xff]  }
  0x12   : > { %473 = vmatprep.mubr.bf16.mxu1 %v892_v12  ;;  %v897_v22 = vld [vmem:[%s980_s9 + $0x10] ss:$8 sps:$4 sm:$0xff]   ;;  %v899_v24 = vld [vmem:[%s980_s9 + $0x24] ss:$8 sps:$4 sm:$0xff]   ;;  %v903_v26 = vld [vmem:[%s980_s9 + $0x20] ss:$8 sps:$4 sm:$0xff]  }
  0x13   : > { %790 = vmatpush3.bf16.msra.mxu0 %v878_v7  ;;  %858 = vmatpush3.bf16.msra.mxu1 %v878_v7  ;;  %v898_v23 = vld [vmem:[%s980_s9 + $0x50] ss:$8 sps:$4 sm:$0xff]   ;;  %v901_v25 = vld [vmem:[%s980_s9 + $0x64] ss:$8 sps:$4 sm:$0xff]   ;;  %v904_v27 = vld [vmem:[%s980_s9 + $0x60] ss:$8 sps:$4 sm:$0xff]  }
  0x14   : > { %791 = vmatprep.subr.bf16.mxu0 %v879_v8  ;;  %851 = vmatprep.subr.bf16.mxu1 %v879_v8  ;;  %v905_v28 = vld [vmem:[%s980_s9 + $0x34] ss:$8 sps:$4 sm:$0xff]   ;;  %v909_v30 = vld [vmem:[%s980_s9 + $0x30] ss:$8 sps:$4 sm:$0xff]  }
  0x15   : > { %v907_v29 = vld [vmem:[%s980_s9 + $0x74] ss:$8 sps:$4 sm:$0xff]   ;;  %v910_v31 = vld [vmem:[%s980_s9 + $0x70] ss:$8 sps:$4 sm:$0xff]  }
  0x17   : > { %792 = vmatpush3.bf16.msra.mxu0 %v880_v9  ;;  %859 = vmatpush3.bf16.msra.mxu1 %v880_v9 }
  0x18   : > { %793 = vmatprep.subr.bf16.mxu0 %v881_v10  ;;  %852 = vmatprep.subr.bf16.mxu1 %v881_v10 }
  0x1b   : > { %794 = vmatpush3.bf16.msra.mxu0 %v882_v13  ;;  %860 = vmatpush3.bf16.msra.mxu1 %v882_v13 }
  0x1c   : > { %795 = vmatprep.subr.bf16.mxu0 %v883_v14  ;;  %853 = vmatprep.subr.bf16.mxu1 %v883_v14 }
  0x1f   : > { %796 = vmatpush3.bf16.msra.mxu0 %v884_v15  ;;  %861 = vmatpush3.bf16.msra.mxu1 %v884_v15 }
  0x20   : > { %797 = vmatprep.subr.bf16.mxu0 %v885_v16  ;;  %854 = vmatprep.subr.bf16.mxu1 %v885_v16 }
  0x23   : > { %798 = vmatpush3.bf16.msra.mxu0 %v886_v17  ;;  %862 = vmatpush3.bf16.msra.mxu1 %v886_v17 }
  0x26   : > { %442 = vmatmul.mubr.bf16.vlgmr.msra.gmra.mrb[0].mxu0 %v887_v18  ;;  %474 = vmatmul.mubr.bf16.vlgmr.msra.gmra.mrb[0].mxu1 %v890_v19 }
  0x27   : > { %449 = vmatprep.mubr.bf16.mxu0 %v893_v20  ;;  %481 = vmatprep.mubr.bf16.mxu1 %v895_v21 }
  0x2e   : > { %450 = vmatmul.mubr.bf16.gmra.mrb[4].mxu0 %v897_v22  ;;  %482 = vmatmul.mubr.bf16.gmra.mrb[4].mxu1 %v898_v23 }
  0x2f   : > { %457 = vmatprep.mubr.bf16.mxu0 %v899_v24  ;;  %489 = vmatprep.mubr.bf16.mxu1 %v901_v25 }
  0x36   : > { %458 = vmatmul.mubr.bf16.gmra.mrb[8].mxu0 %v903_v26  ;;  %490 = vmatmul.mubr.bf16.gmra.mrb[8].mxu1 %v904_v27 }
  0x37   : > { %465 = vmatprep.mubr.bf16.mxu0 %v905_v28  ;;  %497 = vmatprep.mubr.bf16.mxu1 %v907_v29 }
  0x3e   : > { %466 = vmatmul.mubr.bf16.gmra.mrb[12].mxu0 %v909_v30  ;;  %498 = vmatmul.mubr.bf16.gmra.mrb[12].mxu1 %v910_v31 }
  0xf9   : > { %v799_v32 = vpop.f32.mrb[0].mxu0  ;;  %v823_v33 = vpop.f32.mrb[0].mxu1 }
  0xfa   : > { %v800_v35 = vpop.f32.mrb[1].mxu0  ;;  %v824_v36 = vpop.f32.mrb[1].mxu1 }
  0xfb   : > { %v801_v37 = vadd.f32 %v800_v35, %v799_v32  ;;  %v825_v38 = vadd.f32 %v824_v36, %v823_v33  ;;  %v802_v39 = vpop.f32.mrb[2].mxu0  ;;  %v826_v40 = vpop.f32.mrb[2].mxu1 }
  0xfc   : > { %v803_v41 = vpop.f32.mrb[3].mxu0  ;;  %v827_v42 = vpop.f32.mrb[3].mxu1 }
  0xfd   : > { %v444_v43 = vadd.f32 %v801_v37, %v1022_v34  ;;  %v476_v44 = vadd.f32 %v825_v38, %v1022_v34  ;;  %v804_v45 = vadd.f32 %v803_v41, %v802_v39  ;;  %v828_v46 = vadd.f32 %v827_v42, %v826_v40 }
  0xff   : > { %v447_v47 = vadd.f32 %v804_v45, %v1022_v34  ;;  %v479_v48 = vadd.f32 %v828_v46, %v1022_v34  ;;  %v506_v49 = vmax.f32 %v444_v43, 0.0  ;;  %v514_v50 = vmax.f32 %v476_v44, 0.0 }
 0x101   : > { %v507_v51 = vmax.f32 %v447_v47, 0.0  ;;  %v515_v52 = vmax.f32 %v479_v48, 0.0  ;;  %v805_v53 = vpop.f32.mrb[4].mxu0  ;;  %v829_v54 = vpop.f32.mrb[4].mxu1 }
 0x102   : > { %v806_v55 = vpop.f32.mrb[5].mxu0  ;;  %v830_v56 = vpop.f32.mrb[5].mxu1 }
 0x103   : > { %v739_v57 = vpack.c.bf16 %v507_v51, %v506_v49  ;;  %v759_v58 = vpack.c.bf16 %v515_v52, %v514_v50  ;;  %v807_v59 = vadd.f32 %v806_v55, %v805_v53  ;;  %v831_v60 = vadd.f32 %v830_v56, %v829_v54  ;;  %v808_v61 = vpop.f32.mrb[6].mxu0  ;;  %v832_v62 = vpop.f32.mrb[6].mxu1 }
 0x104   : > { %v809_v63 = vpop.f32.mrb[7].mxu0  ;;  %v833_v0 = vpop.f32.mrb[7].mxu1 }
 0x105   : > { %740 = vst [vmem:[%s1032_s4] sm:$0xff] %v739_v57   ;;  %779 = vst [vmem:[%s1032_s4 + $0x20] sm:$0xff] %v759_v58   ;;  %v452_v1 = vadd.f32 %v807_v59, %v1022_v34  ;;  %v484_v2 = vadd.f32 %v831_v60, %v1022_v34  ;;  %v810_v3 = vadd.f32 %v809_v63, %v808_v61 }
 0x106   : > { %v834_v4 = vadd.f32 %v833_v0, %v832_v62 }
 0x107   : > { %v455_v5 = vadd.f32 %v810_v3, %v1022_v34  ;;  %v508_v7 = vmax.f32 %v452_v1, 0.0  ;;  %v516_v8 = vmax.f32 %v484_v2, 0.0 }
 0x108   : > { %v487_v6 = vadd.f32 %v834_v4, %v1022_v34 }
 0x109   : > { %v509_v9 = vmax.f32 %v455_v5, 0.0  ;;  %v811_v11 = vpop.f32.mrb[8].mxu0  ;;  %v835_v12 = vpop.f32.mrb[8].mxu1 }
 0x10a   : > { %v517_v10 = vmax.f32 %v487_v6, 0.0  ;;  %v812_v13 = vpop.f32.mrb[9].mxu0  ;;  %v836_v14 = vpop.f32.mrb[9].mxu1 }
 0x10b   : > { %v744_v15 = vpack.c.bf16 %v509_v9, %v508_v7  ;;  %v813_v17 = vadd.f32 %v812_v13, %v811_v11  ;;  %v837_v18 = vadd.f32 %v836_v14, %v835_v12  ;;  %v814_v19 = vpop.f32.mrb[10].mxu0  ;;  %v838_v20 = vpop.f32.mrb[10].mxu1 }
 0x10c   : > { %v764_v16 = vpack.c.bf16 %v517_v10, %v516_v8  ;;  %v815_v21 = vpop.f32.mrb[11].mxu0  ;;  %v839_v22 = vpop.f32.mrb[11].mxu1 }
 0x10d   : > { %776 = vst [vmem:[%s1032_s4 + $0x8] sm:$0xff] %v744_v15   ;;  %v460_v23 = vadd.f32 %v813_v17, %v1022_v34  ;;  %v492_v24 = vadd.f32 %v837_v18, %v1022_v34  ;;  %v816_v25 = vadd.f32 %v815_v21, %v814_v19  ;;  %v840_v26 = vadd.f32 %v839_v22, %v838_v20 }
 0x10e   : > { %780 = vst [vmem:[%s1032_s4 + $0x28] sm:$0xff] %v764_v16  }
 0x10f   : > { %v463_v27 = vadd.f32 %v816_v25, %v1022_v34  ;;  %v495_v28 = vadd.f32 %v840_v26, %v1022_v34  ;;  %v510_v29 = vmax.f32 %v460_v23, 0.0  ;;  %v518_v30 = vmax.f32 %v492_v24, 0.0 }
 0x111   : > { %v511_v31 = vmax.f32 %v463_v27, 0.0  ;;  %v519_v32 = vmax.f32 %v495_v28, 0.0  ;;  %v817_v33 = vpop.f32.mrb[12].mxu0  ;;  %v841_v35 = vpop.f32.mrb[12].mxu1 }
 0x112   : > { %v818_v36 = vpop.f32.mrb[13].mxu0  ;;  %v842_v37 = vpop.f32.mrb[13].mxu1 }
 0x113   : > { %v749_v38 = vpack.c.bf16 %v511_v31, %v510_v29  ;;  %v769_v39 = vpack.c.bf16 %v519_v32, %v518_v30  ;;  %v819_v40 = vadd.f32 %v818_v36, %v817_v33  ;;  %v843_v41 = vadd.f32 %v842_v37, %v841_v35  ;;  %v820_v42 = vpop.f32.mrb[14].mxu0  ;;  %v844_v43 = vpop.f32.mrb[14].mxu1 }
 0x114   : > { %v821_v44 = vpop.f32.mrb[15].mxu0  ;;  %v845_v45 = vpop.f32.mrb[15].mxu1 }
 0x115   : > { %777 = vst [vmem:[%s1032_s4 + $0x10] sm:$0xff] %v749_v38   ;;  %781 = vst [vmem:[%s1032_s4 + $0x30] sm:$0xff] %v769_v39   ;;  %v468_v46 = vadd.f32 %v819_v40, %v1022_v34  ;;  %v500_v47 = vadd.f32 %v843_v41, %v1022_v34  ;;  %v822_v48 = vadd.f32 %v821_v44, %v820_v42 }
 0x116   : > { %v846_v49 = vadd.f32 %v845_v45, %v844_v43 }
 0x117   : > { %v471_v50 = vadd.f32 %v822_v48, %v1022_v34  ;;  %v512_v52 = vmax.f32 %v468_v46, 0.0  ;;  %v520_v53 = vmax.f32 %v500_v47, 0.0 }
 0x118   : > { %v503_v51 = vadd.f32 %v846_v49, %v1022_v34 }
 0x119   : > { %v513_v54 = vmax.f32 %v471_v50, 0.0 }
 0x11a   : > { %v521_v55 = vmax.f32 %v503_v51, 0.0 }
 0x11b   : > { %v754_v56 = vpack.c.bf16 %v513_v54, %v512_v52 }
 0x11c   : > { %v774_v57 = vpack.c.bf16 %v521_v55, %v520_v53 }
 0x11d   : > { %778 = vst [vmem:[%s1032_s4 + $0x18] sm:$0xff] %v754_v56  }
 0x11e   : > { %782 = vst [vmem:[%s1032_s4 + $0x38] sm:$0xff] %v774_v57  }
 0x11f PF: > { %s13_s12 = sadd.s32 1, %s917_s12  }
 0x120   : > { %p10_p4 = scmp.ge.s32.totalorder %s13_s12, 9  }
 0x122   :  { %12 = sbr.rel (!%p10_p4) target bundleno = 1 (0x1), region = 62 }

// kernel: atari_cnn_forward.5
= control target key start
LH: loop header
LB: loop body
LE: loop exit
PB: predicated region body
PF: predicated region fallthrough
CT: control target
= control target key end

     0   :  { %s1210_s12 = smov 0   ;;  %s1380_s0 = inlined_call_operand.vmem [shape: bf16[192,512], index: 0, kind: input, shape index: {}]   ;;  %s1381_s1 = inlined_call_operand.vmem [shape: bf16[512,128], index: 1, kind: input, shape index: {}]   ;;  %s1382_s2 = inlined_call_operand.vmem [shape: f32[1,128], index: 2, kind: input, shape index: {}]   ;;  %s1383_s3 = inlined_call_operand.vmem [shape: bf16[192,128], index: 3, kind: output, shape index: {}]  }
   0x1 LB: > { %s875_s13 = sadd.s32 4294967295, %s1188_s12   ;;  %p879_p0 = scmp.ge.s32.totalorder %s1188_s12, 1  ;;  %s1188_s12 = sphi %s1210_s12, %s13_s12  }
   0x2   : > { %p139_p1 = scmp.lt.s32.totalorder %s1188_s12, 3 }
   0x4   : > { %p140_p2 = pnand %p879_p0, %p139_p1 }
   0x5   : > { %v1114_v0 = vld [vmem:[%s1381_s1 + $0x40] sm:$0xff] (!%p140_p2)   ;;  %v1118_v4 = vld [vmem:[%s1381_s1 + $0x48] sm:$0xff] (!%p140_p2)   ;;  %v1122_v8 = vld [vmem:[%s1381_s1 + $0x50] sm:$0xff] (!%p140_p2)   ;;  %s164_s19 = smul.u32 (!%p140_p2), 12, %s875_s13 }
   0x6   : > { %143 = sbr.rel (%p140_p2) target bundleno = 305 (0x131), region = 32  ;;  %v1115_v1 = vld [vmem:[%s1381_s1 + $0xc0] sm:$0xff] (!%p140_p2)   ;;  %1002 = vmatprep.subr.bf16.mxu0 (!%p140_p2), %v1114_v0  ;;  %v1119_v5 = vld [vmem:[%s1381_s1 + $0xc8] sm:$0xff] (!%p140_p2)   ;;  %v1123_v9 = vld [vmem:[%s1381_s1 + $0xd0] sm:$0xff] (!%p140_p2)  }
   0x7   : > { %v1116_v2 = vld [vmem:[%s1381_s1] sm:$0xff] (!%p140_p2)   ;;  %1054 = vmatprep.subr.bf16.mxu1 (!%p140_p2), %v1115_v1  ;;  %v1120_v6 = vld [vmem:[%s1381_s1 + $0x8] sm:$0xff] (!%p140_p2)   ;;  %v1124_v10 = vld [vmem:[%s1381_s1 + $0x10] sm:$0xff] (!%p140_p2)   ;;  %p165_p3 = scmp.lt.s32.totalorder (!%p140_p2), %s164_s19, 23 }
   0x8   : > { %v1117_v3 = vld [vmem:[%s1381_s1 + $0x80] sm:$0xff] (!%p140_p2)   ;;  %1003 = vmatpush3.bf16.msra.mxu0 (!%p140_p2), %v1116_v2  ;;  %v1121_v7 = vld [vmem:[%s1381_s1 + $0x88] sm:$0xff] (!%p140_p2)   ;;  %v1125_v11 = vld [vmem:[%s1381_s1 + $0x90] sm:$0xff] (!%p140_p2)  }
   0x9   : > { %1055 = vmatpush3.bf16.msra.mxu1 (!%p140_p2), %v1117_v3  ;;  %1004 = vmatprep.subr.bf16.mxu0 (!%p140_p2), %v1118_v4  ;;  %v1126_v12 = vld [vmem:[%s1381_s1 + $0x58] sm:$0xff] (!%p140_p2)   ;;  %v1130_v16 = vld [vmem:[%s1381_s1 + $0x60] sm:$0xff] (!%p140_p2)   ;;  %v1134_v20 = vld [vmem:[%s1381_s1 + $0x68] sm:$0xff] (!%p140_p2)  }
   0xa   : > { %1056 = vmatprep.subr.bf16.mxu1 (!%p140_p2), %v1119_v5  ;;  %v1127_v13 = vld [vmem:[%s1381_s1 + $0xd8] sm:$0xff] (!%p140_p2)   ;;  %v1131_v17 = vld [vmem:[%s1381_s1 + $0xe0] sm:$0xff] (!%p140_p2)   ;;  %v1135_v21 = vld [vmem:[%s1381_s1 + $0xe8] sm:$0xff] (!%p140_p2)  }
   0xb   : > { %v1128_v14 = vld [vmem:[%s1381_s1 + $0x18] sm:$0xff] (!%p140_p2)   ;;  %v1132_v18 = vld [vmem:[%s1381_s1 + $0x20] sm:$0xff] (!%p140_p2)   ;;  %v1136_v22 = vld [vmem:[%s1381_s1 + $0x28] sm:$0xff] (!%p140_p2)  }
   0xc   : > { %1005 = vmatpush3.bf16.msra.mxu0 (!%p140_p2), %v1120_v6  ;;  %v1129_v15 = vld [vmem:[%s1381_s1 + $0x98] sm:$0xff] (!%p140_p2)   ;;  %v1133_v19 = vld [vmem:[%s1381_s1 + $0xa0] sm:$0xff] (!%p140_p2)   ;;  %v1137_v23 = vld [vmem:[%s1381_s1 + $0xa8] sm:$0xff] (!%p140_p2)  }
   0xd   : > { %1057 = vmatpush3.bf16.msra.mxu1 %v1121_v7  ;;  %1006 = vmatprep.subr.bf16.mxu0 %v1122_v8  ;;  %s1385_s19 = smov (!%p165_p3, %s164_s19), 23  ;;  %v1138_v24 = vld [vmem:[%s1381_s1 + $0x70] sm:$0xff]   ;;  %v1142_v28 = vld [vmem:[%s1381_s1 + $0x78] sm:$0xff]   ;;  %v1351_v58 = vld [vmem:[%s1382_s2] ss:$0 sm:$0xff] }
   0xe   : > { %1058 = vmatprep.subr.bf16.mxu1 %v1123_v9  ;;  %v1139_v25 = vld [vmem:[%s1381_s1 + $0xf0] sm:$0xff]   ;;  %s954_s18 = sshll.u32 %s1385_s19, 4  ;;  %v1143_v29 = vld [vmem:[%s1381_s1 + $0xf8] sm:$0xff]   ;;  %s882_s7 = sshll.u32 %s1385_s19, 2 }
   0xf   : > { %v1140_v26 = vld [vmem:[%s1381_s1 + $0x30] sm:$0xff]   ;;  %s1316_s13 = scalar_lea.vmem %s1380_s0, %s954_s18  ;;  %v1144_v30 = vld [vmem:[%s1381_s1 + $0x38] sm:$0xff]   ;;  %s1359_s10 = scalar_lea.vmem %s1383_s3, %s882_s7 }
  0x10   : > { %1007 = vmatpush3.bf16.msra.mxu0 %v1124_v10  ;;  %v1141_v27 = vld [vmem:[%s1381_s1 + $0xb0] sm:$0xff]   ;;  %v1145_v31 = vld [vmem:[%s1381_s1 + $0xb8] sm:$0xff]  }
  0x11   : > { %1059 = vmatpush3.bf16.msra.mxu1 %v1125_v11  ;;  %1008 = vmatprep.subr.bf16.mxu0 %v1126_v12  ;;  %v1146_v32 = vld [vmem:[%s1316_s13] ss:$16 sps:$4 sm:$0xff]   ;;  %v1148_v33 = vld [vmem:[%s1316_s13 + $0x4] ss:$16 sps:$4 sm:$0xff]   ;;  %v1149_v34 = vld [vmem:[%s1316_s13 + $0x8] ss:$16 sps:$4 sm:$0xff]  }
  0x12   : > { %1060 = vmatprep.subr.bf16.mxu1 %v1127_v13  ;;  %v1151_v35 = vld [vmem:[%s1316_s13 + $0xc] ss:$16 sps:$4 sm:$0xff]   ;;  %617 = vmatprep.mubr.bf16.mxu0 %v1148_v33  ;;  %v1152_v36 = vld [vmem:[%s1316_s13 + $0x24] ss:$16 sps:$4 sm:$0xff]   ;;  %v1156_v38 = vld [vmem:[%s1316_s13 + $0x20] ss:$16 sps:$4 sm:$0xff]  }
  0x13   : > { %698 = vmatprep.mubr.bf16.mxu1 %v1151_v35  ;;  %v1154_v37 = vld [vmem:[%s1316_s13 + $0x2c] ss:$16 sps:$4 sm:$0xff]   ;;  %v1157_v39 = vld [vmem:[%s1316_s13 + $0x28] ss:$16 sps:$4 sm:$0xff]   ;;  %v1158_v40 = vld [vmem:[%s1316_s13 + $0x44] ss:$16 sps:$4 sm:$0xff]  }
  0x14   : > { %1009 = vmatpush3.bf16.msra.mxu0 %v1128_v14  ;;  %v1160_v41 = vld [vmem:[%s1316_s13 + $0x4c] ss:$16 sps:$4 sm:$0xff]   ;;  %v1162_v42 = vld [vmem:[%s1316_s13 + $0x40] ss:$16 sps:$4 sm:$0xff]   ;;  %v1163_v43 = vld [vmem:[%s1316_s13 + $0x48] ss:$16 sps:$4 sm:$0xff]  }
  0x15   : > { %1061 = vmatpush3.bf16.msra.mxu1 %v1129_v15  ;;  %1010 = vmatprep.subr.bf16.mxu0 %v1130_v16  ;;  %v1164_v44 = vld [vmem:[%s1316_s13 + $0x64] ss:$16 sps:$4 sm:$0xff]   ;;  %v1166_v45 = vld [vmem:[%s1316_s13 + $0x6c] ss:$16 sps:$4 sm:$0xff]   ;;  %v1168_v46 = vld [vmem:[%s1316_s13 + $0x60] ss:$16 sps:$4 sm:$0xff]  }
  0x16   : > { %1062 = vmatprep.subr.bf16.mxu1 %v1131_v17  ;;  %v1169_v47 = vld [vmem:[%s1316_s13 + $0x68] ss:$16 sps:$4 sm:$0xff]   ;;  %v1170_v48 = vld [vmem:[%s1316_s13 + $0x84] ss:$16 sps:$4 sm:$0xff]   ;;  %v1172_v49 = vld [vmem:[%s1316_s13 + $0x8c] ss:$16 sps:$4 sm:$0xff]  }
  0x17   : > { %v1174_v50 = vld [vmem:[%s1316_s13 + $0x80] ss:$16 sps:$4 sm:$0xff]   ;;  %v1175_v51 = vld [vmem:[%s1316_s13 + $0x88] ss:$16 sps:$4 sm:$0xff]   ;;  %v1176_v52 = vld [vmem:[%s1316_s13 + $0xa4] ss:$16 sps:$4 sm:$0xff]  }
  0x18   : > { %1011 = vmatpush3.bf16.msra.mxu0 %v1132_v18  ;;  %v1178_v53 = vld [vmem:[%s1316_s13 + $0xac] ss:$16 sps:$4 sm:$0xff]   ;;  %v1180_v54 = vld [vmem:[%s1316_s13 + $0xa0] ss:$16 sps:$4 sm:$0xff]   ;;  %v1181_v55 = vld [vmem:[%s1316_s13 + $0xa8] ss:$16 sps:$4 sm:$0xff]  }
  0x19   : > { %1063 = vmatpush3.bf16.msra.mxu1 %v1133_v19  ;;  %1012 = vmatprep.subr.bf16.mxu0 %v1134_v20 }
  0x1a   : > { %1064 = vmatprep.subr.bf16.mxu1 %v1135_v21 }
  0x1c   : > { %1013 = vmatpush3.bf16.msra.mxu0 %v1136_v22 }
  0x1d   : > { %1065 = vmatpush3.bf16.msra.mxu1 %v1137_v23  ;;  %1014 = vmatprep.subr.bf16.mxu0 %v1138_v24 }
  0x1e   : > { %1066 = vmatprep.subr.bf16.mxu1 %v1139_v25 }
  0x20   : > { %1015 = vmatpush3.bf16.msra.mxu0 %v1140_v26 }
  0x21   : > { %1067 = vmatpush3.bf16.msra.mxu1 %v1141_v27  ;;  %1016 = vmatprep.subr.bf16.mxu0 %v1142_v28 }
  0x22   : > { %1068 = vmatprep.subr.bf16.mxu1 %v1143_v29 }
  0x24   : > { %1017 = vmatpush3.bf16.msra.mxu0 %v1144_v30 }
  0x25   : > { %1069 = vmatpush3.bf16.msra.mxu1 %v1145_v31 }
  0x27   : > { %618 = vmatmul.mubr.bf16.vlgmr.msra.gmra.mrb[0].mxu0 %v1146_v32 }
  0x28   : > { %699 = vmatmul.mubr.bf16.vlgmr.msra.gmra.mrb[0].mxu1 %v1149_v34  ;;  %625 = vmatprep.mubr.bf16.mxu0 %v1152_v36 }
  0x29   : > { %706 = vmatprep.mubr.bf16.mxu1 %v1154_v37 }
  0x2f   : > { %626 = vmatmul.mubr.bf16.gmra.mrb[4].mxu0 %v1156_v38 }
  0x30   : > { %707 = vmatmul.mubr.bf16.gmra.mrb[4].mxu1 %v1157_v39  ;;  %633 = vmatprep.mubr.bf16.mxu0 %v1158_v40 }
  0x31   : > { %714 = vmatprep.mubr.bf16.mxu1 %v1160_v41 }
  0x37   : > { %634 = vmatmul.mubr.bf16.gmra.mrb[8].mxu0 %v1162_v42 }
  0x38   : > { %715 = vmatmul.mubr.bf16.gmra.mrb[8].mxu1 %v1163_v43  ;;  %641 = vmatprep.mubr.bf16.mxu0 %v1164_v44 }
  0x39   : > { %722 = vmatprep.mubr.bf16.mxu1 %v1166_v45 }
  0x3f   : > { %642 = vmatmul.mubr.bf16.gmra.mrb[12].mxu0 %v1168_v46 }
  0x40   : > { %723 = vmatmul.mubr.bf16.gmra.mrb[12].mxu1 %v1169_v47  ;;  %649 = vmatprep.mubr.bf16.mxu0 %v1170_v48 }
  0x41   : > { %730 = vmatprep.mubr.bf16.mxu1 %v1172_v49 }
  0x47   : > { %650 = vmatmul.mubr.bf16.gmra.mrb[16].mxu0 %v1174_v50 }
  0x48   : > { %731 = vmatmul.mubr.bf16.gmra.mrb[16].mxu1 %v1175_v51  ;;  %657 = vmatprep.mubr.bf16.mxu0 %v1176_v52 }
  0x49   : > { %738 = vmatprep.mubr.bf16.mxu1 %v1178_v53 }
  0x4f   : > { %658 = vmatmul.mubr.bf16.gmra.mrb[20].mxu0 %v1180_v54 }
  0x50   : > { %739 = vmatmul.mubr.bf16.gmra.mrb[20].mxu1 %v1181_v55 }
  0xfa   : > { %v1018_v56 = vpop.f32.mrb[0].mxu0 }
  0xfb   : > { %v1070_v57 = vpop.f32.mrb[0].mxu1  ;;  %v1019_v59 = vpop.f32.mrb[1].mxu0 }
  0xfc   : > { %v1020_v60 = vadd.f32 %v1019_v59, %v1018_v56  ;;  %v1071_v61 = vpop.f32.mrb[1].mxu1  ;;  %v1021_v62 = vpop.f32.mrb[2].mxu0 }
  0xfd   : > { %v1072_v63 = vadd.f32 %v1071_v61, %v1070_v57  ;;  %v1073_v0 = vpop.f32.mrb[2].mxu1  ;;  %v1022_v1 = vpop.f32.mrb[3].mxu0 }
  0xfe   : > { %v620_v2 = vadd.f32 %v1020_v60, %v1351_v58  ;;  %v1023_v3 = vadd.f32 %v1022_v1, %v1021_v62  ;;  %v1074_v4 = vpop.f32.mrb[3].mxu1 }
  0xff   : > { %v1075_v5 = vadd.f32 %v1074_v4, %v1073_v0 }
 0x100   : > { %v701_v6 = vadd.f32 %v1072_v63, %v620_v2  ;;  %v623_v7 = vadd.f32 %v1023_v3, %v1351_v58 }
 0x102   : > { %v704_v8 = vadd.f32 %v1075_v5, %v623_v7  ;;  %v1024_v9 = vpop.f32.mrb[4].mxu0  ;;  %v747_v12 = vmax.f32 %v701_v6, 0.0 }
 0x103   : > { %v1076_v10 = vpop.f32.mrb[4].mxu1  ;;  %v1025_v11 = vpop.f32.mrb[5].mxu0 }
 0x104   : > { %v748_v13 = vmax.f32 %v704_v8, 0.0  ;;  %v1026_v14 = vadd.f32 %v1025_v11, %v1024_v9  ;;  %v1077_v15 = vpop.f32.mrb[5].mxu1  ;;  %v1027_v16 = vpop.f32.mrb[6].mxu0 }
 0x105   : > { %v1078_v17 = vadd.f32 %v1077_v15, %v1076_v10  ;;  %v1079_v18 = vpop.f32.mrb[6].mxu1  ;;  %v1028_v19 = vpop.f32.mrb[7].mxu0 }
 0x106   : > { %v970_v20 = vpack.c.bf16 %v748_v13, %v747_v12  ;;  %v628_v21 = vadd.f32 %v1026_v14, %v1351_v58  ;;  %v1029_v22 = vadd.f32 %v1028_v19, %v1027_v16  ;;  %v1080_v23 = vpop.f32.mrb[7].mxu1 }
 0x107   : > { %v1081_v24 = vadd.f32 %v1080_v23, %v1079_v18 }
 0x108   : > { %971 = vst [vmem:[%s1359_s10] sm:$0xff] %v970_v20   ;;  %v709_v25 = vadd.f32 %v1078_v17, %v628_v21  ;;  %v631_v26 = vadd.f32 %v1029_v22, %v1351_v58 }
 0x10a   : > { %v712_v27 = vadd.f32 %v1081_v24, %v631_v26  ;;  %v1030_v28 = vpop.f32.mrb[8].mxu0  ;;  %v749_v31 = vmax.f32 %v709_v25, 0.0 }
 0x10b   : > { %v1082_v29 = vpop.f32.mrb[8].mxu1  ;;  %v1031_v30 = vpop.f32.mrb[9].mxu0 }
 0x10c   : > { %v750_v32 = vmax.f32 %v712_v27, 0.0  ;;  %v1032_v33 = vadd.f32 %v1031_v30, %v1030_v28  ;;  %v1083_v34 = vpop.f32.mrb[9].mxu1  ;;  %v1033_v35 = vpop.f32.mrb[10].mxu0 }
 0x10d   : > { %v1084_v36 = vadd.f32 %v1083_v34, %v1082_v29  ;;  %v1085_v37 = vpop.f32.mrb[10].mxu1  ;;  %v1034_v38 = vpop.f32.mrb[11].mxu0 }
 0x10e   : > { %v975_v39 = vpack.c.bf16 %v750_v32, %v749_v31  ;;  %v636_v40 = vadd.f32 %v1032_v33, %v1351_v58  ;;  %v1035_v41 = vadd.f32 %v1034_v38, %v1033_v35  ;;  %v1086_v42 = vpop.f32.mrb[11].mxu1 }
 0x10f   : > { %v1087_v43 = vadd.f32 %v1086_v42, %v1085_v37 }
 0x110   : > { %997 = vst [vmem:[%s1359_s10 + $0x8] sm:$0xff] %v975_v39   ;;  %v717_v44 = vadd.f32 %v1084_v36, %v636_v40  ;;  %v639_v45 = vadd.f32 %v1035_v41, %v1351_v58 }
 0x112   : > { %v720_v46 = vadd.f32 %v1087_v43, %v639_v45  ;;  %v1036_v47 = vpop.f32.mrb[12].mxu0  ;;  %v751_v50 = vmax.f32 %v717_v44, 0.0 }
 0x113   : > { %v1088_v48 = vpop.f32.mrb[12].mxu1  ;;  %v1037_v49 = vpop.f32.mrb[13].mxu0 }
 0x114   : > { %v752_v51 = vmax.f32 %v720_v46, 0.0  ;;  %v1038_v52 = vadd.f32 %v1037_v49, %v1036_v47  ;;  %v1089_v53 = vpop.f32.mrb[13].mxu1  ;;  %v1039_v54 = vpop.f32.mrb[14].mxu0 }
 0x115   : > { %v1090_v55 = vadd.f32 %v1089_v53, %v1088_v48  ;;  %v1091_v56 = vpop.f32.mrb[14].mxu1  ;;  %v1040_v57 = vpop.f32.mrb[15].mxu0 }
 0x116   : > { %v980_v59 = vpack.c.bf16 %v752_v51, %v751_v50  ;;  %v644_v60 = vadd.f32 %v1038_v52, %v1351_v58  ;;  %v1041_v61 = vadd.f32 %v1040_v57, %v1039_v54  ;;  %v1092_v62 = vpop.f32.mrb[15].mxu1 }
 0x117   : > { %v1093_v63 = vadd.f32 %v1092_v62, %v1091_v56 }
 0x118   : > { %998 = vst [vmem:[%s1359_s10 + $0x10] sm:$0xff] %v980_v59   ;;  %v725_v0 = vadd.f32 %v1090_v55, %v644_v60  ;;  %v647_v1 = vadd.f32 %v1041_v61, %v1351_v58 }
 0x11a   : > { %v728_v2 = vadd.f32 %v1093_v63, %v647_v1  ;;  %v1042_v3 = vpop.f32.mrb[16].mxu0  ;;  %v753_v6 = vmax.f32 %v725_v0, 0.0 }
 0x11b   : > { %v1094_v4 = vpop.f32.mrb[16].mxu1  ;;  %v1043_v5 = vpop.f32.mrb[17].mxu0 }
 0x11c   : > { %v754_v7 = vmax.f32 %v728_v2, 0.0  ;;  %v1044_v8 = vadd.f32 %v1043_v5, %v1042_v3  ;;  %v1095_v9 = vpop.f32.mrb[17].mxu1  ;;  %v1045_v10 = vpop.f32.mrb[18].mxu0 }
 0x11d   : > { %v1096_v11 = vadd.f32 %v1095_v9, %v1094_v4  ;;  %v1097_v12 = vpop.f32.mrb[18].mxu1  ;;  %v1046_v13 = vpop.f32.mrb[19].mxu0 }
 0x11e   : > { %v985_v14 = vpack.c.bf16 %v754_v7, %v753_v6  ;;  %v652_v15 = vadd.f32 %v1044_v8, %v1351_v58  ;;  %v1047_v16 = vadd.f32 %v1046_v13, %v1045_v10  ;;  %v1098_v17 = vpop.f32.mrb[19].mxu1 }
 0x11f   : > { %v1099_v18 = vadd.f32 %v1098_v17, %v1097_v12 }
 0x120   : > { %999 = vst [vmem:[%s1359_s10 + $0x18] sm:$0xff] %v985_v14   ;;  %v733_v19 = vadd.f32 %v1096_v11, %v652_v15  ;;  %v655_v20 = vadd.f32 %v1047_v16, %v1351_v58 }
 0x122   : > { %v736_v21 = vadd.f32 %v1099_v18, %v655_v20  ;;  %v1048_v22 = vpop.f32.mrb[20].mxu0  ;;  %v755_v25 = vmax.f32 %v733_v19, 0.0 }
 0x123   : > { %v1100_v23 = vpop.f32.mrb[20].mxu1  ;;  %v1049_v24 = vpop.f32.mrb[21].mxu0 }
 0x124   : > { %v756_v26 = vmax.f32 %v736_v21, 0.0  ;;  %v1050_v27 = vadd.f32 %v1049_v24, %v1048_v22  ;;  %v1101_v28 = vpop.f32.mrb[21].mxu1  ;;  %v1051_v29 = vpop.f32.mrb[22].mxu0 }
 0x125   : > { %v1102_v30 = vadd.f32 %v1101_v28, %v1100_v23  ;;  %v1103_v31 = vpop.f32.mrb[22].mxu1  ;;  %v1052_v32 = vpop.f32.mrb[23].mxu0 }
 0x126   : > { %v990_v33 = vpack.c.bf16 %v756_v26, %v755_v25  ;;  %v660_v34 = vadd.f32 %v1050_v27, %v1351_v58  ;;  %v1053_v35 = vadd.f32 %v1052_v32, %v1051_v29  ;;  %v1104_v36 = vpop.f32.mrb[23].mxu1 }
 0x127   : > { %v1105_v37 = vadd.f32 %v1104_v36, %v1103_v31 }
 0x128   : > { %1000 = vst [vmem:[%s1359_s10 + $0x20] sm:$0xff] %v990_v33   ;;  %v741_v38 = vadd.f32 %v1102_v30, %v660_v34  ;;  %v663_v39 = vadd.f32 %v1053_v35, %v1351_v58 }
 0x12a   : > { %v744_v40 = vadd.f32 %v1105_v37, %v663_v39  ;;  %v757_v41 = vmax.f32 %v741_v38, 0.0 }
 0x12c   : > { %v758_v42 = vmax.f32 %v744_v40, 0.0 }
 0x12e   : > { %v995_v43 = vpack.c.bf16 %v758_v42, %v757_v41 }
 0x130   : > { %1001 = vst [vmem:[%s1359_s10 + $0x28] sm:$0xff] %v995_v43  }
 0x131 PF: > { %s13_s12 = sadd.s32 1, %s1188_s12  }
 0x132   : > { %p10_p4 = scmp.ge.s32.totalorder %s13_s12, 4  }
 0x134   :  { %12 = sbr.rel (!%p10_p4) target bundleno = 1 (0x1), region = 62 }

// kernel: atari_cnn_forward.6
= control target key start
LH: loop header
LB: loop body
LE: loop exit
PB: predicated region body
PF: predicated region fallthrough
CT: control target
= control target key end

     0   :  { %v1310_v34 = vmov 0.0   ;;  %vm1311_vm0 = vmmov 0   ;;  %vm527_vm1 = vcmask 523264   ;;  %s1638_s1 = inlined_call_operand.vmem [shape: bf16[576,128], index: 1, kind: input, shape index: {}]   ;;  %s1639_s0 = inlined_call_operand.vmem [shape: bf16[112,576], index: 0, kind: input, shape index: {}]   ;;  %s1640_s2 = inlined_call_operand.vmem [shape: f32[1,128], index: 2, kind: input, shape index: {}]   ;;  %s1641_s3 = inlined_call_operand.vmem [shape: bf16[112,128], index: 3, kind: output, shape index: {}]  }
   0x1   :  { %v1225_v0 = vld [vmem:[%s1638_s1 + $0x40] sm:$0xff]   ;;  %v1229_v4 = vld [vmem:[%s1638_s1 + $0x48] sm:$0xff]   ;;  %v1233_v8 = vld [vmem:[%s1638_s1 + $0x50] sm:$0xff]  }
   0x2   :  { %v1226_v1 = vld [vmem:[%s1638_s1 + $0xc0] sm:$0xff]   ;;  %1052 = vmatprep.subr.bf16.mxu0 %v1225_v0  ;;  %v1230_v5 = vld [vmem:[%s1638_s1 + $0xc8] sm:$0xff]   ;;  %v1234_v9 = vld [vmem:[%s1638_s1 + $0xd0] sm:$0xff]  }
   0x3   :  { %v1227_v2 = vld [vmem:[%s1638_s1] sm:$0xff]   ;;  %1110 = vmatprep.subr.bf16.mxu1 %v1226_v1  ;;  %v1231_v6 = vld [vmem:[%s1638_s1 + $0x8] sm:$0xff]   ;;  %v1235_v10 = vld [vmem:[%s1638_s1 + $0x10] sm:$0xff]  }
   0x4   :  { %v1228_v3 = vld [vmem:[%s1638_s1 + $0x80] sm:$0xff]   ;;  %1053 = vmatpush3.bf16.msra.mxu0 %v1227_v2  ;;  %v1232_v7 = vld [vmem:[%s1638_s1 + $0x88] sm:$0xff]   ;;  %v1236_v11 = vld [vmem:[%s1638_s1 + $0x90] sm:$0xff]  }
   0x5   :  { %1111 = vmatpush3.bf16.msra.mxu1 %v1228_v3  ;;  %1054 = vmatprep.subr.bf16.mxu0 %v1229_v4  ;;  %v1237_v12 = vld [vmem:[%s1638_s1 + $0x58] sm:$0xff]   ;;  %v1241_v16 = vld [vmem:[%s1638_s1 + $0x60] sm:$0xff]   ;;  %v1245_v20 = vld [vmem:[%s1638_s1 + $0x68] sm:$0xff]  }
   0x6   :  { %1112 = vmatprep.subr.bf16.mxu1 %v1230_v5  ;;  %v1238_v13 = vld [vmem:[%s1638_s1 + $0xd8] sm:$0xff]   ;;  %v1242_v17 = vld [vmem:[%s1638_s1 + $0xe0] sm:$0xff]   ;;  %v1246_v21 = vld [vmem:[%s1638_s1 + $0xe8] sm:$0xff]  }
   0x7   :  { %v1239_v14 = vld [vmem:[%s1638_s1 + $0x18] sm:$0xff]   ;;  %v1243_v18 = vld [vmem:[%s1638_s1 + $0x20] sm:$0xff]   ;;  %v1247_v22 = vld [vmem:[%s1638_s1 + $0x28] sm:$0xff]  }
   0x8   :  { %1055 = vmatpush3.bf16.msra.mxu0 %v1231_v6  ;;  %v1240_v15 = vld [vmem:[%s1638_s1 + $0x98] sm:$0xff]   ;;  %v1244_v19 = vld [vmem:[%s1638_s1 + $0xa0] sm:$0xff]   ;;  %v1248_v23 = vld [vmem:[%s1638_s1 + $0xa8] sm:$0xff]  }
   0x9   :  { %1113 = vmatpush3.bf16.msra.mxu1 %v1232_v7  ;;  %1056 = vmatprep.subr.bf16.mxu0 %v1233_v8  ;;  %v1249_v24 = vld [vmem:[%s1638_s1 + $0x70] sm:$0xff]   ;;  %v1253_v28 = vld [vmem:[%s1638_s1 + $0x78] sm:$0xff]   ;;  %v1262_v36 = vld [vmem:[%s1639_s0 + $0xc] ss:$20 sps:$4 sm:$0xff]  }
   0xa   :  { %1114 = vmatprep.subr.bf16.mxu1 %v1234_v9  ;;  %v1250_v25 = vld [vmem:[%s1638_s1 + $0xf0] sm:$0xff]   ;;  %v1254_v29 = vld [vmem:[%s1638_s1 + $0xf8] sm:$0xff]   ;;  %v1263_v37 = vld [vmem:[%s1638_s1 + $0x100] sm:$0xff]   ;;  %670 = vmatprep.mubr.bf16.mxu1 %v1262_v36 }
   0xb   :  { %v1251_v26 = vld [vmem:[%s1638_s1 + $0x30] sm:$0xff]   ;;  %v1255_v30 = vld [vmem:[%s1638_s1 + $0x38] sm:$0xff]   ;;  %v1264_v38 = vld [vmem:[%s1639_s0 + $0x2c] ss:$20 sps:$4 sm:$0xff]  }
   0xc   :  { %1057 = vmatpush3.bf16.msra.mxu0 %v1235_v10  ;;  %v1252_v27 = vld [vmem:[%s1638_s1 + $0xb0] sm:$0xff]   ;;  %v1256_v31 = vld [vmem:[%s1638_s1 + $0xb8] sm:$0xff]   ;;  %v1274_v43 = vld [vmem:[%s1638_s1 + $0x108] sm:$0xff]  }
   0xd   :  { %1115 = vmatpush3.bf16.msra.mxu1 %v1236_v11  ;;  %1058 = vmatprep.subr.bf16.mxu0 %v1237_v12  ;;  %v1257_v32 = vld [vmem:[%s1639_s0] ss:$20 sps:$4 sm:$0xff]   ;;  %v1259_v33 = vld [vmem:[%s1639_s0 + $0x4] ss:$20 sps:$4 sm:$0xff]   ;;  %v1260_v35 = vld [vmem:[%s1639_s0 + $0x8] ss:$20 sps:$4 sm:$0xff]  }
   0xe   :  { %1116 = vmatprep.subr.bf16.mxu1 %v1238_v13  ;;  %581 = vmatprep.mubr.bf16.mxu0 %v1259_v33  ;;  %v1266_v39 = vld [vmem:[%s1639_s0 + $0x34] ss:$20 sps:$4 sm:$0xff]   ;;  %v1269_v41 = vld [vmem:[%s1639_s0 + $0x30] ss:$20 sps:$4 sm:$0xff]   ;;  %v1276_v47 = vld [vmem:[%s1639_s0 + $0x58] ss:$20 sps:$4 sm:$0xff]  }
   0xf   :  { %v1268_v40 = vld [vmem:[%s1639_s0 + $0x28] ss:$20 sps:$4 sm:$0xff]   ;;  %v1283_v45 = vld [vmem:[%s1638_s1 + $0x110] sm:$0xff]   ;;  %v1279_v49 = vld [vmem:[%s1639_s0 + $0x84] ss:$20 sps:$4 sm:$0xff]  }
  0x10   :  { %1059 = vmatpush3.bf16.msra.mxu0 %v1239_v14  ;;  %v1270_v42 = vld [vmem:[%s1639_s0 + $0x54] ss:$20 sps:$4 sm:$0xff]   ;;  %v1272_v44 = vld [vmem:[%s1639_s0 + $0x5c] ss:$20 sps:$4 sm:$0xff]   ;;  %v1281_v51 = vld [vmem:[%s1639_s0 + $0x78] ss:$20 sps:$4 sm:$0xff]  }
  0x11   :  { %1117 = vmatpush3.bf16.msra.mxu1 %v1240_v15  ;;  %1060 = vmatprep.subr.bf16.mxu0 %v1241_v16  ;;  %v1275_v46 = vld [vmem:[%s1639_s0 + $0x50] ss:$20 sps:$4 sm:$0xff]   ;;  %v1296_v50 = vld [vmem:[%s1638_s1 + $0x118] sm:$0xff]   ;;  %v1282_v52 = vld [vmem:[%s1639_s0 + $0x80] ss:$20 sps:$4 sm:$0xff]  }
  0x12   :  { %1118 = vmatprep.subr.bf16.mxu1 %v1242_v17  ;;  %v1277_v48 = vld [vmem:[%s1639_s0 + $0x7c] ss:$20 sps:$4 sm:$0xff]   ;;  %v1284_v53 = vld [vmem:[%s1639_s0 + $0xa4] ss:$20 sps:$4 sm:$0xff]   ;;  %v1286_v54 = vld [vmem:[%s1639_s0 + $0xac] ss:$20 sps:$4 sm:$0xff]  }
  0x13   :  { %v1288_v55 = vld [vmem:[%s1639_s0 + $0xa0] ss:$20 sps:$4 sm:$0xff]   ;;  %v1289_v56 = vld [vmem:[%s1639_s0 + $0xa8] ss:$20 sps:$4 sm:$0xff]   ;;  %v1295_v60 = vld [vmem:[%s1639_s0 + $0xd0] ss:$20 sps:$4 sm:$0xff]  }
  0x14   :  { %1061 = vmatpush3.bf16.msra.mxu0 %v1243_v18  ;;  %v1290_v57 = vld [vmem:[%s1639_s0 + $0xcc] ss:$20 sps:$4 sm:$0xff]   ;;  %v1292_v58 = vld [vmem:[%s1639_s0 + $0xd4] ss:$20 sps:$4 sm:$0xff]   ;;  %v1299_v62 = vld [vmem:[%s1639_s0 + $0xfc] ss:$20 sps:$4 sm:$0xff]  }
  0x15   :  { %1119 = vmatpush3.bf16.msra.mxu1 %v1244_v19  ;;  %1062 = vmatprep.subr.bf16.mxu0 %v1245_v20  ;;  %v1294_v59 = vld [vmem:[%s1639_s0 + $0xc8] ss:$20 sps:$4 sm:$0xff]   ;;  %v1301_v63 = vld [vmem:[%s1639_s0 + $0xf0] ss:$20 sps:$4 sm:$0xff]   ;;  %v1302_v0 = vld [vmem:[%s1639_s0 + $0xf8] ss:$20 sps:$4 sm:$0xff]  }
  0x16   :  { %1120 = vmatprep.subr.bf16.mxu1 %v1246_v21  ;;  %v1297_v61 = vld [vmem:[%s1639_s0 + $0xf4] ss:$20 sps:$4 sm:$0xff]   ;;  %v1303_v1 = vld [vmem:[%s1639_s0 + $0x10] ss:$20 sps:$4 sm:$0xff]   ;;  %v1305_v3 = vld [vmem:[%s1639_s0 + $0x38] ss:$20 sps:$4 sm:$0xff]  }
  0x17   :  { %v1304_v2 = vld [vmem:[%s1639_s0 + $0xb0] ss:$20 sps:$4 sm:$0xff]   ;;  %v1306_v4 = vld [vmem:[%s1639_s0 + $0xd8] ss:$20 sps:$4 sm:$0xff]   ;;  %v1307_v5 = vld [vmem:[%s1639_s0 + $0x60] ss:$20 sps:$4 sm:$0xff]  }
  0x18   :  { %1063 = vmatpush3.bf16.msra.mxu0 %v1247_v22  ;;  %v1308_v6 = vld [vmem:[%s1639_s0 + $0x100] ss:$20 sps:$4 sm:$0xff]   ;;  %v1309_v7 = vld [vmem:[%s1639_s0 + $0x88] ss:$20 sps:$4 sm:$0xff]  }
  0x19   :  { %1121 = vmatpush3.bf16.msra.mxu1 %v1248_v23  ;;  %1064 = vmatprep.subr.bf16.mxu0 %v1249_v24  ;;  %v1577_v9 = vld [vmem:[%s1640_s2] ss:$0 sm:$0xff] }
  0x1a   :  { %1122 = vmatprep.subr.bf16.mxu1 %v1250_v25 }
  0x1c   :  { %1065 = vmatpush3.bf16.msra.mxu0 %v1251_v26 }
  0x1d   :  { %1123 = vmatpush3.bf16.msra.mxu1 %v1252_v27  ;;  %1066 = vmatprep.subr.bf16.mxu0 %v1253_v28 }
  0x1e   :  { %1124 = vmatprep.subr.bf16.mxu1 %v1254_v29 }
  0x20   :  { %1067 = vmatpush3.bf16.msra.mxu0 %v1255_v30 }
  0x21   :  { %1125 = vmatpush3.bf16.msra.mxu1 %v1256_v31  ;;  %1179 = vmatprep.subr.bf16.mxu0 %v1310_v34 }
  0x22   :  { %1215 = vmatprep.subr.bf16.mxu1 %v1310_v34 }
  0x23   :  { %582 = vmatmul.mubr.bf16.vlgmr.msra.gmra.mrb[0].mxu0 %v1257_v32 }
  0x24   :  { %671 = vmatmul.mubr.bf16.vlgmr.msra.gmra.mrb[0].mxu1 %v1260_v35  ;;  %1180 = vmatpush3.bf16.msra.mxu0 %v1263_v37 }
  0x25   :  { %589 = vmatprep.mubr.bf16.mxu0 %v1264_v38  ;;  %1219 = vmatpush3.bf16.msra.mxu1 %v1263_v37 }
  0x26   :  { %678 = vmatprep.mubr.bf16.mxu1 %v1266_v39  ;;  %1181 = vmatprep.subr.bf16.mxu0 %v1310_v34 }
  0x27   :  { %1216 = vmatprep.subr.bf16.mxu1 %v1310_v34 }
  0x28   :  { %1182 = vmatpush3.bf16.msra.mxu0 %v1274_v43 }
  0x29   :  { %1220 = vmatpush3.bf16.msra.mxu1 %v1274_v43  ;;  %1183 = vmatprep.subr.bf16.mxu0 %v1310_v34 }
  0x2a   :  { %1217 = vmatprep.subr.bf16.mxu1 %v1310_v34 }
  0x2b   :  { %590 = vmatmul.mubr.bf16.gmra.mrb[4].mxu0 %v1268_v40 }
  0x2c   :  { %679 = vmatmul.mubr.bf16.gmra.mrb[4].mxu1 %v1269_v41  ;;  %597 = vmatprep.mubr.bf16.mxu0 %v1270_v42 }
  0x2d   :  { %686 = vmatprep.mubr.bf16.mxu1 %v1272_v44  ;;  %1184 = vmatpush3.bf16.msra.mxu0 %v1283_v45 }
  0x2e   :  { %1221 = vmatpush3.bf16.msra.mxu1 %v1283_v45  ;;  %1185 = vmatprep.subr.bf16.mxu0 %v1310_v34 }
  0x2f   :  { %1218 = vmatprep.subr.bf16.mxu1 %v1310_v34 }
  0x31   :  { %1186 = vmatpush3.bf16.msra.mxu0 %v1296_v50 }
  0x32   :  { %1222 = vmatpush3.bf16.msra.mxu1 %v1296_v50 }
  0x33   :  { %598 = vmatmul.mubr.bf16.gmra.mrb[8].mxu0 %v1275_v46 }
  0x34   :  { %687 = vmatmul.mubr.bf16.gmra.mrb[8].mxu1 %v1276_v47  ;;  %605 = vmatprep.mubr.bf16.mxu0 %v1277_v48 }
  0x35   :  { %694 = vmatprep.mubr.bf16.mxu1 %v1279_v49 }
  0x3b   :  { %606 = vmatmul.mubr.bf16.gmra.mrb[12].mxu0 %v1281_v51 }
  0x3c   :  { %695 = vmatmul.mubr.bf16.gmra.mrb[12].mxu1 %v1282_v52  ;;  %613 = vmatprep.mubr.bf16.mxu0 %v1284_v53 }
  0x3d   :  { %702 = vmatprep.mubr.bf16.mxu1 %v1286_v54 }
  0x43   :  { %614 = vmatmul.mubr.bf16.gmra.mrb[16].mxu0 %v1288_v55 }
  0x44   :  { %703 = vmatmul.mubr.bf16.gmra.mrb[16].mxu1 %v1289_v56  ;;  %621 = vmatprep.mubr.bf16.mxu0 %v1290_v57 }
  0x45   :  { %710 = vmatprep.mubr.bf16.mxu1 %v1292_v58 }
  0x4b   :  { %622 = vmatmul.mubr.bf16.gmra.mrb[20].mxu0 %v1294_v59 }
  0x4c   :  { %711 = vmatmul.mubr.bf16.gmra.mrb[20].mxu1 %v1295_v60  ;;  %629 = vmatprep.mubr.bf16.mxu0 %v1297_v61 }
  0x4d   :  { %718 = vmatprep.mubr.bf16.mxu1 %v1299_v62 }
  0x53   :  { %630 = vmatmul.mubr.bf16.gmra.mrb[24].mxu0 %v1301_v63 }
  0x54   :  { %719 = vmatmul.mubr.bf16.gmra.mrb[24].mxu1 %v1302_v0  ;;  %1187 = vmatprep.mubr.msk.bf16.mxu0 %vm1311_vm0, %v1310_v34 }
  0x55   :  { %1203 = vmatprep.mubr.msk.bf16.mxu1 %vm1311_vm0, %v1310_v34 }
  0x5b   :  { %1188 = vmatmul.mubr.msk.bf16.vlgmr.msra.gmra.mrb[28].mxu0 %vm527_vm1, %v1303_v1 }
  0x5c   :  { %1204 = vmatmul.mubr.msk.bf16.vlgmr.msra.gmra.mrb[28].mxu1 %vm527_vm1, %v1304_v2  ;;  %1191 = vmatprep.mubr.msk.bf16.mxu0 %vm1311_vm0, %v1310_v34 }
  0x5d   :  { %1207 = vmatprep.mubr.msk.bf16.mxu1 %vm1311_vm0, %v1310_v34 }
  0x63   :  { %1192 = vmatmul.mubr.msk.bf16.gmra.mrb[32].mxu0 %vm527_vm1, %v1305_v3 }
  0x64   :  { %1208 = vmatmul.mubr.msk.bf16.gmra.mrb[32].mxu1 %vm527_vm1, %v1306_v4  ;;  %1195 = vmatprep.mubr.msk.bf16.mxu0 %vm1311_vm0, %v1310_v34 }
  0x65   :  { %1211 = vmatprep.mubr.msk.bf16.mxu1 %vm1311_vm0, %v1310_v34 }
  0x6b   :  { %1196 = vmatmul.mubr.msk.bf16.gmra.mrb[36].mxu0 %vm527_vm1, %v1307_v5 }
  0x6c   :  { %1212 = vmatmul.mubr.msk.bf16.gmra.mrb[36].mxu1 %vm527_vm1, %v1308_v6  ;;  %1199 = vmatprep.mubr.msk.bf16.mxu0 %vm1311_vm0, %v1310_v34 }
  0x73   :  { %1200 = vmatmul.mubr.msk.bf16.gmra.mrb[40].mxu0 %vm527_vm1, %v1309_v7 }
  0xf6   :  { %v1068_v8 = vpop.f32.mrb[0].mxu0 }
  0xf7   :  { %v1069_v10 = vpop.f32.mrb[1].mxu0  ;;  %v1126_v11 = vpop.f32.mrb[0].mxu1 }
  0xf8   :  { %v1070_v12 = vadd.f32 %v1069_v10, %v1068_v8  ;;  %v1071_v13 = vpop.f32.mrb[2].mxu0  ;;  %v1127_v14 = vpop.f32.mrb[1].mxu1 }
  0xf9   :  { %v1072_v15 = vpop.f32.mrb[3].mxu0  ;;  %v1128_v16 = vadd.f32 %v1127_v14, %v1126_v11  ;;  %v1129_v17 = vpop.f32.mrb[2].mxu1 }
  0xfa   :  { %v584_v18 = vadd.f32 %v1070_v12, %v1577_v9  ;;  %v1073_v19 = vadd.f32 %v1072_v15, %v1071_v13  ;;  %v1130_v20 = vpop.f32.mrb[3].mxu1 }
  0xfb   :  { %v1131_v21 = vadd.f32 %v1130_v20, %v1129_v17 }
  0xfc   :  { %v587_v22 = vadd.f32 %v1073_v19, %v1577_v9  ;;  %v1581_v23 = vadd.f32 %v1128_v16, %v584_v18 }
  0xfe   :  { %v1074_v24 = vpop.f32.mrb[4].mxu0  ;;  %v1583_v25 = vadd.f32 %v1131_v21, %v587_v22 }
  0xff   :  { %v1075_v26 = vpop.f32.mrb[5].mxu0  ;;  %v1132_v27 = vpop.f32.mrb[4].mxu1 }
 0x100   :  { %v1076_v28 = vadd.f32 %v1075_v26, %v1074_v24  ;;  %v1077_v29 = vpop.f32.mrb[6].mxu0  ;;  %v1133_v30 = vpop.f32.mrb[5].mxu1 }
 0x101   :  { %v1078_v31 = vpop.f32.mrb[7].mxu0  ;;  %v1134_v32 = vadd.f32 %v1133_v30, %v1132_v27  ;;  %v1135_v33 = vpop.f32.mrb[6].mxu1 }
 0x102   :  { %v592_v34 = vadd.f32 %v1076_v28, %v1577_v9  ;;  %v1079_v35 = vadd.f32 %v1078_v31, %v1077_v29  ;;  %v1136_v36 = vpop.f32.mrb[7].mxu1 }
 0x103   :  { %v1137_v37 = vadd.f32 %v1136_v36, %v1135_v33 }
 0x104   :  { %v595_v38 = vadd.f32 %v1079_v35, %v1577_v9  ;;  %v1587_v39 = vadd.f32 %v1134_v32, %v592_v34 }
 0x106   :  { %v1080_v40 = vpop.f32.mrb[8].mxu0  ;;  %v1589_v41 = vadd.f32 %v1137_v37, %v595_v38 }
 0x107   :  { %v1081_v42 = vpop.f32.mrb[9].mxu0  ;;  %v1138_v43 = vpop.f32.mrb[8].mxu1 }
 0x108   :  { %v1082_v44 = vadd.f32 %v1081_v42, %v1080_v40  ;;  %v1083_v45 = vpop.f32.mrb[10].mxu0  ;;  %v1139_v46 = vpop.f32.mrb[9].mxu1 }
 0x109   :  { %v1084_v47 = vpop.f32.mrb[11].mxu0  ;;  %v1140_v48 = vadd.f32 %v1139_v46, %v1138_v43  ;;  %v1141_v49 = vpop.f32.mrb[10].mxu1 }
 0x10a   :  { %v600_v50 = vadd.f32 %v1082_v44, %v1577_v9  ;;  %v1085_v51 = vadd.f32 %v1084_v47, %v1083_v45  ;;  %v1142_v52 = vpop.f32.mrb[11].mxu1 }
 0x10b   :  { %v1143_v53 = vadd.f32 %v1142_v52, %v1141_v49 }
 0x10c   :  { %v603_v54 = vadd.f32 %v1085_v51, %v1577_v9  ;;  %v1593_v55 = vadd.f32 %v1140_v48, %v600_v50 }
 0x10e   :  { %v1086_v56 = vpop.f32.mrb[12].mxu0  ;;  %v1595_v57 = vadd.f32 %v1143_v53, %v603_v54 }
 0x10f   :  { %v1087_v58 = vpop.f32.mrb[13].mxu0  ;;  %v1144_v59 = vpop.f32.mrb[12].mxu1 }
 0x110   :  { %v1088_v60 = vadd.f32 %v1087_v58, %v1086_v56  ;;  %v1089_v61 = vpop.f32.mrb[14].mxu0  ;;  %v1145_v62 = vpop.f32.mrb[13].mxu1 }
 0x111   :  { %v1090_v63 = vpop.f32.mrb[15].mxu0  ;;  %v1146_v0 = vadd.f32 %v1145_v62, %v1144_v59  ;;  %v1147_v1 = vpop.f32.mrb[14].mxu1 }
 0x112   :  { %v608_v2 = vadd.f32 %v1088_v60, %v1577_v9  ;;  %v1091_v3 = vadd.f32 %v1090_v63, %v1089_v61  ;;  %v1148_v4 = vpop.f32.mrb[15].mxu1 }
 0x113   :  { %v1149_v5 = vadd.f32 %v1148_v4, %v1147_v1 }
 0x114   :  { %v611_v6 = vadd.f32 %v1091_v3, %v1577_v9  ;;  %v1599_v7 = vadd.f32 %v1146_v0, %v608_v2 }
 0x116   :  { %v1092_v8 = vpop.f32.mrb[16].mxu0  ;;  %v1601_v10 = vadd.f32 %v1149_v5, %v611_v6 }
 0x117   :  { %v1093_v11 = vpop.f32.mrb[17].mxu0  ;;  %v1150_v12 = vpop.f32.mrb[16].mxu1 }
 0x118   :  { %v1094_v13 = vadd.f32 %v1093_v11, %v1092_v8  ;;  %v1095_v14 = vpop.f32.mrb[18].mxu0  ;;  %v1151_v15 = vpop.f32.mrb[17].mxu1 }
 0x119   :  { %v1096_v16 = vpop.f32.mrb[19].mxu0  ;;  %v1152_v17 = vadd.f32 %v1151_v15, %v1150_v12  ;;  %v1153_v18 = vpop.f32.mrb[18].mxu1 }
 0x11a   :  { %v616_v19 = vadd.f32 %v1094_v13, %v1577_v9  ;;  %v1097_v20 = vadd.f32 %v1096_v16, %v1095_v14  ;;  %v1154_v21 = vpop.f32.mrb[19].mxu1 }
 0x11b   :  { %v1155_v22 = vadd.f32 %v1154_v21, %v1153_v18 }
 0x11c   :  { %v619_v24 = vadd.f32 %v1097_v20, %v1577_v9  ;;  %v705_v26 = vadd.f32 %v1152_v17, %v616_v19 }
 0x11e   :  { %v1098_v27 = vpop.f32.mrb[20].mxu0  ;;  %v708_v28 = vadd.f32 %v1155_v22, %v619_v24 }
 0x11f   :  { %v1099_v29 = vpop.f32.mrb[21].mxu0  ;;  %v1156_v30 = vpop.f32.mrb[20].mxu1 }
 0x120   :  { %v1100_v31 = vadd.f32 %v1099_v29, %v1098_v27  ;;  %v1101_v32 = vpop.f32.mrb[22].mxu0  ;;  %v1157_v33 = vpop.f32.mrb[21].mxu1 }
 0x121   :  { %v1102_v34 = vpop.f32.mrb[23].mxu0  ;;  %v1158_v35 = vadd.f32 %v1157_v33, %v1156_v30  ;;  %v1159_v36 = vpop.f32.mrb[22].mxu1 }
 0x122   :  { %v624_v37 = vadd.f32 %v1100_v31, %v1577_v9  ;;  %v1103_v38 = vadd.f32 %v1102_v34, %v1101_v32  ;;  %v1160_v40 = vpop.f32.mrb[23].mxu1 }
 0x123   :  { %v1161_v42 = vadd.f32 %v1160_v40, %v1159_v36 }
 0x124   :  { %v627_v43 = vadd.f32 %v1103_v38, %v1577_v9  ;;  %v713_v44 = vadd.f32 %v1158_v35, %v624_v37 }
 0x126   :  { %v1104_v45 = vpop.f32.mrb[24].mxu0  ;;  %v716_v46 = vadd.f32 %v1161_v42, %v627_v43 }
 0x127   :  { %v1105_v47 = vpop.f32.mrb[25].mxu0  ;;  %v1162_v48 = vpop.f32.mrb[24].mxu1 }
 0x128   :  { %v1106_v49 = vadd.f32 %v1105_v47, %v1104_v45  ;;  %v1107_v50 = vpop.f32.mrb[26].mxu0  ;;  %v1163_v51 = vpop.f32.mrb[25].mxu1 }
 0x129   :  { %v1108_v52 = vpop.f32.mrb[27].mxu0  ;;  %v1164_v53 = vadd.f32 %v1163_v51, %v1162_v48  ;;  %v1165_v54 = vpop.f32.mrb[26].mxu1 }
 0x12a   :  { %v632_v56 = vadd.f32 %v1106_v49, %v1577_v9  ;;  %v1109_v58 = vadd.f32 %v1108_v52, %v1107_v50  ;;  %v1166_v59 = vpop.f32.mrb[27].mxu1 }
 0x12b   :  { %v1167_v60 = vadd.f32 %v1166_v59, %v1165_v54 }
 0x12c   :  { %v635_v61 = vadd.f32 %v1109_v58, %v1577_v9  ;;  %v721_v62 = vadd.f32 %v1164_v53, %v632_v56 }
 0x12e   :  { %v761_v63 = vpop.f32.mrb[28].mxu0  ;;  %v724_v0 = vadd.f32 %v1167_v60, %v635_v61 }
 0x12f   :  { %v762_v1 = vadd.f32 %v761_v63, %v1581_v23  ;;  %v793_v2 = vpop.f32.mrb[28].mxu1  ;;  %v1189_v3 = vpop.f32.mrb[29].mxu0 }
 0x130   :  { %v794_v4 = vadd.f32 %v793_v2, %v705_v26  ;;  %v1205_v5 = vpop.f32.mrb[29].mxu1  ;;  %v764_v6 = vpop.f32.mrb[30].mxu0 }
 0x131   :  { %v765_v8 = vadd.f32 %v764_v6, %v1583_v25  ;;  %v796_v11 = vpop.f32.mrb[30].mxu1  ;;  %v1190_v12 = vpop.f32.mrb[31].mxu0  ;;  %v816_v15 = vmax.f32 %v762_v1, 0.0 }
 0x132   :  { %v797_v13 = vadd.f32 %v796_v11, %v708_v28  ;;  %v1206_v14 = vpop.f32.mrb[31].mxu1  ;;  %v824_v17 = vmax.f32 %v794_v4, 0.0 }
 0x133   :  { %v817_v16 = vmax.f32 %v765_v8, 0.0 }
 0x134   :  { %v825_v9 = vmax.f32 %v797_v13, 0.0 }
 0x135   :  { %v1014_v18 = vpack.c.bf16 %v817_v16, %v816_v15 }
 0x136   :  { %v1034_v19 = vpack.c.bf16 %v825_v9, %v824_v17  ;;  %v769_v20 = vpop.f32.mrb[32].mxu0 }
 0x137   :  { %1015 = vst [vmem:[%s1641_s3] sm:$0xff] %v1014_v18   ;;  %v770_v23 = vadd.f32 %v769_v20, %v1587_v39  ;;  %v801_v21 = vpop.f32.mrb[32].mxu1  ;;  %v1193_v22 = vpop.f32.mrb[33].mxu0 }
 0x138   :  { %1049 = vst [vmem:[%s1641_s3 + $0x20] sm:$0xff] %v1034_v19   ;;  %v802_v25 = vadd.f32 %v801_v21, %v713_v44  ;;  %v1209_v24 = vpop.f32.mrb[33].mxu1  ;;  %v772_v26 = vpop.f32.mrb[34].mxu0 }
 0x139   :  { %v773_v27 = vadd.f32 %v772_v26, %v1589_v41  ;;  %v804_v28 = vpop.f32.mrb[34].mxu1  ;;  %v1194_v29 = vpop.f32.mrb[35].mxu0  ;;  %v818_v32 = vmax.f32 %v770_v23, 0.0 }
 0x13a   :  { %v805_v30 = vadd.f32 %v804_v28, %v716_v46  ;;  %v1210_v31 = vpop.f32.mrb[35].mxu1  ;;  %v826_v34 = vmax.f32 %v802_v25, 0.0 }
 0x13b   :  { %v819_v33 = vmax.f32 %v773_v27, 0.0 }
 0x13c   :  { %v827_v35 = vmax.f32 %v805_v30, 0.0 }
 0x13d   :  { %v1019_v39 = vpack.c.bf16 %v819_v33, %v818_v32 }
 0x13e   :  { %v1039_v36 = vpack.c.bf16 %v827_v35, %v826_v34  ;;  %v777_v37 = vpop.f32.mrb[36].mxu0 }
 0x13f   :  { %1046 = vst [vmem:[%s1641_s3 + $0x8] sm:$0xff] %v1019_v39   ;;  %v778_v38 = vadd.f32 %v777_v37, %v1593_v55  ;;  %v809_v40 = vpop.f32.mrb[36].mxu1  ;;  %v1197_v42 = vpop.f32.mrb[37].mxu0 }
 0x140   :  { %1050 = vst [vmem:[%s1641_s3 + $0x28] sm:$0xff] %v1039_v36   ;;  %v810_v41 = vadd.f32 %v809_v40, %v721_v62  ;;  %v1213_v43 = vpop.f32.mrb[37].mxu1  ;;  %v780_v44 = vpop.f32.mrb[38].mxu0 }
 0x141   :  { %v781_v45 = vadd.f32 %v780_v44, %v1595_v57  ;;  %v812_v46 = vpop.f32.mrb[38].mxu1  ;;  %v1198_v47 = vpop.f32.mrb[39].mxu0  ;;  %v820_v50 = vmax.f32 %v778_v38, 0.0 }
 0x142   :  { %v813_v48 = vadd.f32 %v812_v46, %v724_v0  ;;  %v1214_v49 = vpop.f32.mrb[39].mxu1  ;;  %v828_v52 = vmax.f32 %v810_v41, 0.0 }
 0x143   :  { %v821_v51 = vmax.f32 %v781_v45, 0.0 }
 0x144   :  { %v829_v53 = vmax.f32 %v813_v48, 0.0 }
 0x145   :  { %v1024_v55 = vpack.c.bf16 %v821_v51, %v820_v50 }
 0x146   :  { %v1044_v54 = vpack.c.bf16 %v829_v53, %v828_v52  ;;  %v785_v56 = vpop.f32.mrb[40].mxu0 }
 0x147   :  { %1047 = vst [vmem:[%s1641_s3 + $0x10] sm:$0xff] %v1024_v55   ;;  %v786_v58 = vadd.f32 %v785_v56, %v1599_v7  ;;  %v1201_v59 = vpop.f32.mrb[41].mxu0 }
 0x148   :  { %1051 = vst [vmem:[%s1641_s3 + $0x30] sm:$0xff] %v1044_v54   ;;  %v788_v57 = vpop.f32.mrb[42].mxu0 }
 0x149   :  { %v789_v60 = vadd.f32 %v788_v57, %v1601_v10  ;;  %v1202_v61 = vpop.f32.mrb[43].mxu0  ;;  %v822_v62 = vmax.f32 %v786_v58, 0.0 }
 0x14b   :  { %v823_v63 = vmax.f32 %v789_v60, 0.0 }
 0x14d   :  { %v1029_v0 = vpack.c.bf16 %v823_v63, %v822_v62 }
 0x14f   :  { %1048 = vst [vmem:[%s1641_s3 + $0x18] sm:$0xff] %v1029_v0  }

// kernel: atari_cnn_forward.7
= control target key start
LH: loop header
LB: loop body
LE: loop exit
PB: predicated region body
PF: predicated region fallthrough
CT: control target
= control target key end

     0   :  { %vm4892_vm0 = vcmask 523264   ;;  %s10638_s1 = inlined_call_operand.vmem [shape: bf16[3136,512], index: 1, kind: input, shape index: {}]   ;;  %s10639_s0 = inlined_call_operand.vmem [shape: bf16[16,3136], index: 0, kind: input, shape index: {}]   ;;  %s10640_s2 = inlined_call_operand.vmem [shape: f32[1,512], index: 2, kind: input, shape index: {}]   ;;  %s10641_s3 = inlined_call_operand.vmem [shape: f32[16,512], index: 3, kind: output, shape index: {}]  }
   0x1   :  { %v6950_v0 = vld [vmem:[%s10638_s1 + $0x4] ss:$16 sps:$4 sm:$0xff]   ;;  %v6952_v1 = vld [vmem:[%s10638_s1 + $0xc] ss:$16 sps:$4 sm:$0xff]   ;;  %v6954_v2 = vld [vmem:[%s10638_s1] ss:$16 sps:$4 sm:$0xff]  }
   0x2   :  { %4896 = vmatprep.subr.bf16.mxu0 %v6950_v0  ;;  %v6955_v3 = vld [vmem:[%s10638_s1 + $0x8] ss:$16 sps:$4 sm:$0xff]   ;;  %5455 = vmatprep.subr.bf16.mxu1 %v6952_v1  ;;  %v6956_v4 = vld [vmem:[%s10638_s1 + $0x24] ss:$16 sps:$4 sm:$0xff]   ;;  %v6958_v5 = vld [vmem:[%s10638_s1 + $0x2c] ss:$16 sps:$4 sm:$0xff]  }
   0x3   :  { %4897 = vmatpush1.bf16.msra.mxu0 %v6954_v2  ;;  %5456 = vmatpush1.bf16.msra.mxu1 %v6955_v3  ;;  %v6960_v6 = vld [vmem:[%s10638_s1 + $0x20] ss:$16 sps:$4 sm:$0xff]   ;;  %v6961_v7 = vld [vmem:[%s10638_s1 + $0x28] ss:$16 sps:$4 sm:$0xff]   ;;  %v6962_v8 = vld [vmem:[%s10638_s1 + $0x44] ss:$16 sps:$4 sm:$0xff]  }
   0x4   :  { %4898 = vmatprep.subr.bf16.mxu0 %v6956_v4  ;;  %5457 = vmatprep.subr.bf16.mxu1 %v6958_v5  ;;  %v6964_v9 = vld [vmem:[%s10638_s1 + $0x4c] ss:$16 sps:$4 sm:$0xff]   ;;  %v6966_v10 = vld [vmem:[%s10638_s1 + $0x40] ss:$16 sps:$4 sm:$0xff]   ;;  %v6967_v11 = vld [vmem:[%s10638_s1 + $0x48] ss:$16 sps:$4 sm:$0xff]  }
   0x5   :  { %v6968_v12 = vld [vmem:[%s10638_s1 + $0x64] ss:$16 sps:$4 sm:$0xff]   ;;  %v6970_v13 = vld [vmem:[%s10638_s1 + $0x6c] ss:$16 sps:$4 sm:$0xff]   ;;  %v6972_v14 = vld [vmem:[%s10638_s1 + $0x60] ss:$16 sps:$4 sm:$0xff]  }
   0x6   :  { %v6973_v15 = vld [vmem:[%s10638_s1 + $0x68] ss:$16 sps:$4 sm:$0xff]   ;;  %v6974_v16 = vld [vmem:[%s10638_s1 + $0x84] ss:$16 sps:$4 sm:$0xff]   ;;  %v6976_v17 = vld [vmem:[%s10638_s1 + $0x8c] ss:$16 sps:$4 sm:$0xff]  }
   0x7   :  { %4899 = vmatpush1.bf16.msra.mxu0 %v6960_v6  ;;  %5458 = vmatpush1.bf16.msra.mxu1 %v6961_v7  ;;  %v6978_v18 = vld [vmem:[%s10638_s1 + $0x80] ss:$16 sps:$4 sm:$0xff]   ;;  %v6979_v19 = vld [vmem:[%s10638_s1 + $0x88] ss:$16 sps:$4 sm:$0xff]   ;;  %v6980_v20 = vld [vmem:[%s10638_s1 + $0xa4] ss:$16 sps:$4 sm:$0xff]  }
   0x8   :  { %4900 = vmatprep.subr.bf16.mxu0 %v6962_v8  ;;  %5459 = vmatprep.subr.bf16.mxu1 %v6964_v9  ;;  %v6982_v21 = vld [vmem:[%s10638_s1 + $0xac] ss:$16 sps:$4 sm:$0xff]   ;;  %v6984_v22 = vld [vmem:[%s10638_s1 + $0xa0] ss:$16 sps:$4 sm:$0xff]   ;;  %v6985_v23 = vld [vmem:[%s10638_s1 + $0xa8] ss:$16 sps:$4 sm:$0xff]  }
   0x9   :  { %v6986_v24 = vld [vmem:[%s10638_s1 + $0xc4] ss:$16 sps:$4 sm:$0xff]   ;;  %v6988_v25 = vld [vmem:[%s10638_s1 + $0xcc] ss:$16 sps:$4 sm:$0xff]   ;;  %v6990_v26 = vld [vmem:[%s10638_s1 + $0xc0] ss:$16 sps:$4 sm:$0xff]  }
   0xa   :  { %v6991_v27 = vld [vmem:[%s10638_s1 + $0xc8] ss:$16 sps:$4 sm:$0xff]   ;;  %v6992_v28 = vld [vmem:[%s10638_s1 + $0xe4] ss:$16 sps:$4 sm:$0xff]   ;;  %v6994_v29 = vld [vmem:[%s10638_s1 + $0xec] ss:$16 sps:$4 sm:$0xff]  }
   0xb   :  { %4901 = vmatpush1.bf16.msra.mxu0 %v6966_v10  ;;  %5460 = vmatpush1.bf16.msra.mxu1 %v6967_v11  ;;  %v6996_v30 = vld [vmem:[%s10638_s1 + $0xe0] ss:$16 sps:$4 sm:$0xff]   ;;  %v6997_v31 = vld [vmem:[%s10638_s1 + $0xe8] ss:$16 sps:$4 sm:$0xff]   ;;  %v6998_v32 = vld [vmem:[%s10638_s1 + $0x104] ss:$16 sps:$4 sm:$0xff]  }
   0xc   :  { %4902 = vmatprep.subr.bf16.mxu0 %v6968_v12  ;;  %5461 = vmatprep.subr.bf16.mxu1 %v6970_v13  ;;  %v7000_v33 = vld [vmem:[%s10638_s1 + $0x10c] ss:$16 sps:$4 sm:$0xff]   ;;  %v7002_v34 = vld [vmem:[%s10638_s1 + $0x100] ss:$16 sps:$4 sm:$0xff]   ;;  %v7003_v35 = vld [vmem:[%s10638_s1 + $0x108] ss:$16 sps:$4 sm:$0xff]  }
   0xd   :  { %v7004_v36 = vld [vmem:[%s10638_s1 + $0x124] ss:$16 sps:$4 sm:$0xff]   ;;  %v7006_v37 = vld [vmem:[%s10638_s1 + $0x12c] ss:$16 sps:$4 sm:$0xff]   ;;  %v7008_v38 = vld [vmem:[%s10638_s1 + $0x120] ss:$16 sps:$4 sm:$0xff]  }
   0xe   :  { %v7009_v39 = vld [vmem:[%s10638_s1 + $0x128] ss:$16 sps:$4 sm:$0xff]   ;;  %v7010_v40 = vld [vmem:[%s10638_s1 + $0x144] ss:$16 sps:$4 sm:$0xff]   ;;  %v7012_v41 = vld [vmem:[%s10638_s1 + $0x14c] ss:$16 sps:$4 sm:$0xff]  }
   0xf   :  { %4903 = vmatpush1.bf16.msra.mxu0 %v6972_v14  ;;  %5462 = vmatpush1.bf16.msra.mxu1 %v6973_v15  ;;  %v7014_v42 = vld [vmem:[%s10638_s1 + $0x140] ss:$16 sps:$4 sm:$0xff]   ;;  %v7015_v43 = vld [vmem:[%s10638_s1 + $0x148] ss:$16 sps:$4 sm:$0xff]   ;;  %v7016_v44 = vld [vmem:[%s10638_s1 + $0x164] ss:$16 sps:$4 sm:$0xff]  }
  0x10   :  { %4904 = vmatprep.subr.bf16.mxu0 %v6974_v16  ;;  %5463 = vmatprep.subr.bf16.mxu1 %v6976_v17  ;;  %v7018_v45 = vld [vmem:[%s10638_s1 + $0x16c] ss:$16 sps:$4 sm:$0xff]   ;;  %v7020_v46 = vld [vmem:[%s10638_s1 + $0x160] ss:$16 sps:$4 sm:$0xff]   ;;  %v7021_v47 = vld [vmem:[%s10638_s1 + $0x168] ss:$16 sps:$4 sm:$0xff]  }
  0x11   :  { %v7048_v48 = vld [vmem:[%s10639_s0 + $0x4] ss:$100 sps:$4 sm:$0xff]   ;;  %v7024_v50 = vld [vmem:[%s10638_s1 + $0x18c] ss:$16 sps:$4 sm:$0xff]   ;;  %v7026_v51 = vld [vmem:[%s10638_s1 + $0x180] ss:$16 sps:$4 sm:$0xff]  }
  0x12   :  { %v7022_v49 = vld [vmem:[%s10638_s1 + $0x184] ss:$16 sps:$4 sm:$0xff]   ;;  %4928 = vmatprep.mubr.bf16.mxu0 %v7048_v48  ;;  %5487 = vmatprep.mubr.bf16.mxu1 %v7048_v48  ;;  %v7027_v52 = vld [vmem:[%s10638_s1 + $0x188] ss:$16 sps:$4 sm:$0xff]   ;;  %v7030_v54 = vld [vmem:[%s10638_s1 + $0x1ac] ss:$16 sps:$4 sm:$0xff]  }
  0x13   :  { %4905 = vmatpush1.bf16.msra.mxu0 %v6978_v18  ;;  %5464 = vmatpush1.bf16.msra.mxu1 %v6979_v19  ;;  %v7028_v53 = vld [vmem:[%s10638_s1 + $0x1a4] ss:$16 sps:$4 sm:$0xff]   ;;  %v7032_v55 = vld [vmem:[%s10638_s1 + $0x1a0] ss:$16 sps:$4 sm:$0xff]   ;;  %v7033_v56 = vld [vmem:[%s10638_s1 + $0x1a8] ss:$16 sps:$4 sm:$0xff]  }
  0x14   :  { %4906 = vmatprep.subr.bf16.mxu0 %v6980_v20  ;;  %5465 = vmatprep.subr.bf16.mxu1 %v6982_v21  ;;  %v7034_v57 = vld [vmem:[%s10638_s1 + $0x1c4] ss:$16 sps:$4 sm:$0xff]   ;;  %v7036_v58 = vld [vmem:[%s10638_s1 + $0x1cc] ss:$16 sps:$4 sm:$0xff]   ;;  %v7038_v59 = vld [vmem:[%s10638_s1 + $0x1c0] ss:$16 sps:$4 sm:$0xff]  }
  0x15   :  { %v7039_v60 = vld [vmem:[%s10638_s1 + $0x1c8] ss:$16 sps:$4 sm:$0xff]   ;;  %v7040_v61 = vld [vmem:[%s10638_s1 + $0x1e4] ss:$16 sps:$4 sm:$0xff]   ;;  %v7042_v62 = vld [vmem:[%s10638_s1 + $0x1ec] ss:$16 sps:$4 sm:$0xff]  }
  0x16   :  { %v7044_v63 = vld [vmem:[%s10638_s1 + $0x1e0] ss:$16 sps:$4 sm:$0xff]   ;;  %v7045_v0 = vld [vmem:[%s10638_s1 + $0x1e8] ss:$16 sps:$4 sm:$0xff]   ;;  %v7051_v1 = vld [vmem:[%s10638_s1 + $0x204] ss:$16 sps:$4 sm:$0xff]  }
  0x17   :  { %4907 = vmatpush1.bf16.msra.mxu0 %v6984_v22  ;;  %5466 = vmatpush1.bf16.msra.mxu1 %v6985_v23  ;;  %v7054_v2 = vld [vmem:[%s10638_s1 + $0x20c] ss:$16 sps:$4 sm:$0xff]   ;;  %v7046_v3 = vld [vmem:[%s10639_s0] ss:$100 sps:$4 sm:$0xff]   ;;  %v7052_v5 = vld [vmem:[%s10638_s1 + $0x208] ss:$16 sps:$4 sm:$0xff]  }
  0x18   :  { %4908 = vmatprep.subr.bf16.mxu0 %v6986_v24  ;;  %5467 = vmatprep.subr.bf16.mxu1 %v6988_v25  ;;  %v7049_v4 = vld [vmem:[%s10638_s1 + $0x200] ss:$16 sps:$4 sm:$0xff]   ;;  %v7057_v6 = vld [vmem:[%s10638_s1 + $0x224] ss:$16 sps:$4 sm:$0xff]   ;;  %v7060_v7 = vld [vmem:[%s10638_s1 + $0x22c] ss:$16 sps:$4 sm:$0xff]  }
  0x19   :  { %v7055_v8 = vld [vmem:[%s10638_s1 + $0x220] ss:$16 sps:$4 sm:$0xff]   ;;  %v7058_v9 = vld [vmem:[%s10638_s1 + $0x228] ss:$16 sps:$4 sm:$0xff]   ;;  %v7063_v10 = vld [vmem:[%s10638_s1 + $0x244] ss:$16 sps:$4 sm:$0xff]  }
  0x1a   :  { %v7066_v11 = vld [vmem:[%s10638_s1 + $0x24c] ss:$16 sps:$4 sm:$0xff]   ;;  %v7061_v12 = vld [vmem:[%s10638_s1 + $0x240] ss:$16 sps:$4 sm:$0xff]   ;;  %v7064_v13 = vld [vmem:[%s10638_s1 + $0x248] ss:$16 sps:$4 sm:$0xff]  }
  0x1b   :  { %4909 = vmatpush1.bf16.msra.mxu0 %v6990_v26  ;;  %5468 = vmatpush1.bf16.msra.mxu1 %v6991_v27  ;;  %v7069_v14 = vld [vmem:[%s10638_s1 + $0x264] ss:$16 sps:$4 sm:$0xff]   ;;  %v7072_v15 = vld [vmem:[%s10638_s1 + $0x26c] ss:$16 sps:$4 sm:$0xff]   ;;  %v7067_v16 = vld [vmem:[%s10638_s1 + $0x260] ss:$16 sps:$4 sm:$0xff]  }
  0x1c   :  { %4910 = vmatprep.subr.bf16.mxu0 %v6992_v28  ;;  %5469 = vmatprep.subr.bf16.mxu1 %v6994_v29  ;;  %v7070_v17 = vld [vmem:[%s10638_s1 + $0x268] ss:$16 sps:$4 sm:$0xff]   ;;  %v7075_v18 = vld [vmem:[%s10638_s1 + $0x284] ss:$16 sps:$4 sm:$0xff]   ;;  %v7078_v19 = vld [vmem:[%s10638_s1 + $0x28c] ss:$16 sps:$4 sm:$0xff]  }
  0x1d   :  { %v7073_v20 = vld [vmem:[%s10638_s1 + $0x280] ss:$16 sps:$4 sm:$0xff]   ;;  %v7076_v21 = vld [vmem:[%s10638_s1 + $0x288] ss:$16 sps:$4 sm:$0xff]   ;;  %v7081_v22 = vld [vmem:[%s10638_s1 + $0x2a4] ss:$16 sps:$4 sm:$0xff]  }
  0x1e   :  { %v7084_v23 = vld [vmem:[%s10638_s1 + $0x2ac] ss:$16 sps:$4 sm:$0xff]   ;;  %v7079_v24 = vld [vmem:[%s10638_s1 + $0x2a0] ss:$16 sps:$4 sm:$0xff]   ;;  %v7082_v25 = vld [vmem:[%s10638_s1 + $0x2a8] ss:$16 sps:$4 sm:$0xff]  }
  0x1f   :  { %4911 = vmatpush1.bf16.msra.mxu0 %v6996_v30  ;;  %5470 = vmatpush1.bf16.msra.mxu1 %v6997_v31  ;;  %v7087_v26 = vld [vmem:[%s10638_s1 + $0x2c4] ss:$16 sps:$4 sm:$0xff]   ;;  %v7090_v27 = vld [vmem:[%s10638_s1 + $0x2cc] ss:$16 sps:$4 sm:$0xff]   ;;  %v7085_v28 = vld [vmem:[%s10638_s1 + $0x2c0] ss:$16 sps:$4 sm:$0xff]  }
  0x20   :  { %4912 = vmatprep.subr.bf16.mxu0 %v6998_v32  ;;  %5471 = vmatprep.subr.bf16.mxu1 %v7000_v33  ;;  %v7088_v29 = vld [vmem:[%s10638_s1 + $0x2c8] ss:$16 sps:$4 sm:$0xff]   ;;  %v7147_v30 = vld [vmem:[%s10639_s0 + $0xc] ss:$100 sps:$4 sm:$0xff]   ;;  %v7093_v31 = vld [vmem:[%s10638_s1 + $0x2e4] ss:$16 sps:$4 sm:$0xff]  }
  0x21   :  { %v7096_v32 = vld [vmem:[%s10638_s1 + $0x2ec] ss:$16 sps:$4 sm:$0xff]   ;;  %v7091_v33 = vld [vmem:[%s10638_s1 + $0x2e0] ss:$16 sps:$4 sm:$0xff]  }
  0x22   :  { %v7120_v48 = vld [vmem:[%s10638_s1 + $0x36c] ss:$16 sps:$4 sm:$0xff]  }
  0x23   :  { %4913 = vmatpush1.bf16.msra.mxu0 %v7002_v34  ;;  %5472 = vmatpush1.bf16.msra.mxu1 %v7003_v35  ;;  %v7094_v34 = vld [vmem:[%s10638_s1 + $0x2e8] ss:$16 sps:$4 sm:$0xff]   ;;  %v7099_v35 = vld [vmem:[%s10638_s1 + $0x304] ss:$16 sps:$4 sm:$0xff]  }
  0x24   :  { %4914 = vmatprep.subr.bf16.mxu0 %v7004_v36  ;;  %5473 = vmatprep.subr.bf16.mxu1 %v7006_v37  ;;  %v7102_v36 = vld [vmem:[%s10638_s1 + $0x30c] ss:$16 sps:$4 sm:$0xff]   ;;  %v7097_v37 = vld [vmem:[%s10638_s1 + $0x300] ss:$16 sps:$4 sm:$0xff]  }
  0x27   :  { %4915 = vmatpush1.bf16.msra.mxu0 %v7008_v38  ;;  %5474 = vmatpush1.bf16.msra.mxu1 %v7009_v39  ;;  %v7100_v38 = vld [vmem:[%s10638_s1 + $0x308] ss:$16 sps:$4 sm:$0xff]   ;;  %v7105_v39 = vld [vmem:[%s10638_s1 + $0x324] ss:$16 sps:$4 sm:$0xff]  }
  0x28   :  { %4916 = vmatprep.subr.bf16.mxu0 %v7010_v40  ;;  %5475 = vmatprep.subr.bf16.mxu1 %v7012_v41  ;;  %v7108_v40 = vld [vmem:[%s10638_s1 + $0x32c] ss:$16 sps:$4 sm:$0xff]   ;;  %v7103_v41 = vld [vmem:[%s10638_s1 + $0x320] ss:$16 sps:$4 sm:$0xff]  }
  0x2b   :  { %4917 = vmatpush1.bf16.msra.mxu0 %v7014_v42  ;;  %5476 = vmatpush1.bf16.msra.mxu1 %v7015_v43  ;;  %v7106_v42 = vld [vmem:[%s10638_s1 + $0x328] ss:$16 sps:$4 sm:$0xff]   ;;  %v7111_v43 = vld [vmem:[%s10638_s1 + $0x344] ss:$16 sps:$4 sm:$0xff]  }
  0x2c   :  { %4918 = vmatprep.subr.bf16.mxu0 %v7016_v44  ;;  %5477 = vmatprep.subr.bf16.mxu1 %v7018_v45  ;;  %v7114_v44 = vld [vmem:[%s10638_s1 + $0x34c] ss:$16 sps:$4 sm:$0xff]   ;;  %v7109_v45 = vld [vmem:[%s10638_s1 + $0x340] ss:$16 sps:$4 sm:$0xff]  }
  0x2f   :  { %4919 = vmatpush1.bf16.msra.mxu0 %v7020_v46  ;;  %5478 = vmatpush1.bf16.msra.mxu1 %v7021_v47  ;;  %v7112_v46 = vld [vmem:[%s10638_s1 + $0x348] ss:$16 sps:$4 sm:$0xff]   ;;  %v7117_v47 = vld [vmem:[%s10638_s1 + $0x364] ss:$16 sps:$4 sm:$0xff]  }
  0x30   :  { %4920 = vmatprep.subr.bf16.mxu0 %v7022_v49  ;;  %5479 = vmatprep.subr.bf16.mxu1 %v7024_v50  ;;  %v7115_v49 = vld [vmem:[%s10638_s1 + $0x360] ss:$16 sps:$4 sm:$0xff]   ;;  %v7118_v50 = vld [vmem:[%s10638_s1 + $0x368] ss:$16 sps:$4 sm:$0xff]  }
  0x33   :  { %4921 = vmatpush1.bf16.msra.mxu0 %v7026_v51  ;;  %5480 = vmatpush1.bf16.msra.mxu1 %v7027_v52  ;;  %v7123_v51 = vld [vmem:[%s10638_s1 + $0x384] ss:$16 sps:$4 sm:$0xff]   ;;  %v7126_v52 = vld [vmem:[%s10638_s1 + $0x38c] ss:$16 sps:$4 sm:$0xff]  }
  0x34   :  { %4922 = vmatprep.subr.bf16.mxu0 %v7028_v53  ;;  %5481 = vmatprep.subr.bf16.mxu1 %v7030_v54  ;;  %v7121_v53 = vld [vmem:[%s10638_s1 + $0x380] ss:$16 sps:$4 sm:$0xff]   ;;  %v7124_v54 = vld [vmem:[%s10638_s1 + $0x388] ss:$16 sps:$4 sm:$0xff]  }
  0x37   :  { %4923 = vmatpush1.bf16.msra.mxu0 %v7032_v55  ;;  %5482 = vmatpush1.bf16.msra.mxu1 %v7033_v56  ;;  %v7129_v55 = vld [vmem:[%s10638_s1 + $0x3a4] ss:$16 sps:$4 sm:$0xff]   ;;  %v7132_v56 = vld [vmem:[%s10638_s1 + $0x3ac] ss:$16 sps:$4 sm:$0xff]  }
  0x38   :  { %4924 = vmatprep.subr.bf16.mxu0 %v7034_v57  ;;  %5483 = vmatprep.subr.bf16.mxu1 %v7036_v58  ;;  %v7127_v57 = vld [vmem:[%s10638_s1 + $0x3a0] ss:$16 sps:$4 sm:$0xff]   ;;  %v7130_v58 = vld [vmem:[%s10638_s1 + $0x3a8] ss:$16 sps:$4 sm:$0xff]  }
  0x3b   :  { %4925 = vmatpush1.bf16.msra.mxu0 %v7038_v59  ;;  %5484 = vmatpush1.bf16.msra.mxu1 %v7039_v60  ;;  %v7135_v59 = vld [vmem:[%s10638_s1 + $0x3c4] ss:$16 sps:$4 sm:$0xff]   ;;  %v7138_v60 = vld [vmem:[%s10638_s1 + $0x3cc] ss:$16 sps:$4 sm:$0xff]  }
  0x3c   :  { %4926 = vmatprep.subr.bf16.mxu0 %v7040_v61  ;;  %5485 = vmatprep.subr.bf16.mxu1 %v7042_v62  ;;  %v7133_v61 = vld [vmem:[%s10638_s1 + $0x3c0] ss:$16 sps:$4 sm:$0xff]   ;;  %v7136_v62 = vld [vmem:[%s10638_s1 + $0x3c8] ss:$16 sps:$4 sm:$0xff]  }
  0x3f   :  { %4927 = vmatpush1.bf16.msra.mxu0 %v7044_v63  ;;  %5486 = vmatpush1.bf16.msra.mxu1 %v7045_v0  ;;  %v7141_v63 = vld [vmem:[%s10638_s1 + $0x3e4] ss:$16 sps:$4 sm:$0xff]   ;;  %v7144_v0 = vld [vmem:[%s10638_s1 + $0x3ec] ss:$16 sps:$4 sm:$0xff]  }
  0x40   :  { %4939 = vmatprep.subr.bf16.mxu0 %v7051_v1  ;;  %5498 = vmatprep.subr.bf16.mxu1 %v7054_v2  ;;  %v7139_v1 = vld [vmem:[%s10638_s1 + $0x3e0] ss:$16 sps:$4 sm:$0xff]   ;;  %v7142_v2 = vld [vmem:[%s10638_s1 + $0x3e8] ss:$16 sps:$4 sm:$0xff]  }
  0x42   :  { %4929 = vmatmul.mubr.bf16.vlgmr.msra.gmra.mrb[0].mxu0 %v7046_v3  ;;  %5488 = vmatmul.mubr.bf16.vlgmr.msra.gmra.mrb[0].mxu1 %v7046_v3  ;;  %v7150_v3 = vld [vmem:[%s10638_s1 + $0x404] ss:$16 sps:$4 sm:$0xff]  }
  0x43   :  { %4940 = vmatpush1.bf16.msra.mxu0 %v7049_v4  ;;  %5499 = vmatpush1.bf16.msra.mxu1 %v7052_v5  ;;  %v7153_v4 = vld [vmem:[%s10638_s1 + $0x40c] ss:$16 sps:$4 sm:$0xff]  }
  0x44   :  { %4941 = vmatprep.subr.bf16.mxu0 %v7057_v6  ;;  %5500 = vmatprep.subr.bf16.mxu1 %v7060_v7  ;;  %v7145_v5 = vld [vmem:[%s10639_s0 + $0x8] ss:$100 sps:$4 sm:$0xff]   ;;  %v7148_v6 = vld [vmem:[%s10638_s1 + $0x400] ss:$16 sps:$4 sm:$0xff]  }
  0x45   :  { %4971 = vmatprep.mubr.bf16.mxu0 %v7147_v30  ;;  %5530 = vmatprep.mubr.bf16.mxu1 %v7147_v30  ;;  %v7151_v7 = vld [vmem:[%s10638_s1 + $0x408] ss:$16 sps:$4 sm:$0xff]   ;;  %v7189_v30 = vld [vmem:[%s10638_s1 + $0x4cc] ss:$16 sps:$4 sm:$0xff]  }
  0x47   :  { %4942 = vmatpush1.bf16.msra.mxu0 %v7055_v8  ;;  %5501 = vmatpush1.bf16.msra.mxu1 %v7058_v9  ;;  %v7156_v8 = vld [vmem:[%s10638_s1 + $0x424] ss:$16 sps:$4 sm:$0xff]   ;;  %v7159_v9 = vld [vmem:[%s10638_s1 + $0x42c] ss:$16 sps:$4 sm:$0xff]  }
  0x48   :  { %4943 = vmatprep.subr.bf16.mxu0 %v7063_v10  ;;  %5502 = vmatprep.subr.bf16.mxu1 %v7066_v11  ;;  %v7154_v10 = vld [vmem:[%s10638_s1 + $0x420] ss:$16 sps:$4 sm:$0xff]   ;;  %v7157_v11 = vld [vmem:[%s10638_s1 + $0x428] ss:$16 sps:$4 sm:$0xff]  }
  0x4b   :  { %4944 = vmatpush1.bf16.msra.mxu0 %v7061_v12  ;;  %5503 = vmatpush1.bf16.msra.mxu1 %v7064_v13  ;;  %v7246_v12 = vld [vmem:[%s10639_s0 + $0x14] ss:$100 sps:$4 sm:$0xff]  }
  0x4c   :  { %4945 = vmatprep.subr.bf16.mxu0 %v7069_v14  ;;  %5504 = vmatprep.subr.bf16.mxu1 %v7072_v15  ;;  %v7162_v13 = vld [vmem:[%s10638_s1 + $0x444] ss:$16 sps:$4 sm:$0xff]   ;;  %v7165_v14 = vld [vmem:[%s10638_s1 + $0x44c] ss:$16 sps:$4 sm:$0xff]   ;;  %v7160_v15 = vld [vmem:[%s10638_s1 + $0x440] ss:$16 sps:$4 sm:$0xff]  }
  0x4f   :  { %4946 = vmatpush1.bf16.msra.mxu0 %v7067_v16  ;;  %5505 = vmatpush1.bf16.msra.mxu1 %v7070_v17  ;;  %v7163_v16 = vld [vmem:[%s10638_s1 + $0x448] ss:$16 sps:$4 sm:$0xff]   ;;  %v7168_v17 = vld [vmem:[%s10638_s1 + $0x464] ss:$16 sps:$4 sm:$0xff]  }
  0x50   :  { %4947 = vmatprep.subr.bf16.mxu0 %v7075_v18  ;;  %5506 = vmatprep.subr.bf16.mxu1 %v7078_v19  ;;  %v7171_v18 = vld [vmem:[%s10638_s1 + $0x46c] ss:$16 sps:$4 sm:$0xff]   ;;  %v7166_v19 = vld [vmem:[%s10638_s1 + $0x460] ss:$16 sps:$4 sm:$0xff]  }
  0x53   :  { %4948 = vmatpush1.bf16.msra.mxu0 %v7073_v20  ;;  %5507 = vmatpush1.bf16.msra.mxu1 %v7076_v21  ;;  %v7169_v20 = vld [vmem:[%s10638_s1 + $0x468] ss:$16 sps:$4 sm:$0xff]   ;;  %v7174_v21 = vld [vmem:[%s10638_s1 + $0x484] ss:$16 sps:$4 sm:$0xff]  }
  0x54   :  { %4949 = vmatprep.subr.bf16.mxu0 %v7081_v22  ;;  %5508 = vmatprep.subr.bf16.mxu1 %v7084_v23  ;;  %v7177_v22 = vld [vmem:[%s10638_s1 + $0x48c] ss:$16 sps:$4 sm:$0xff]   ;;  %v7172_v23 = vld [vmem:[%s10638_s1 + $0x480] ss:$16 sps:$4 sm:$0xff]  }
  0x57   :  { %4950 = vmatpush1.bf16.msra.mxu0 %v7079_v24  ;;  %5509 = vmatpush1.bf16.msra.mxu1 %v7082_v25  ;;  %v7175_v24 = vld [vmem:[%s10638_s1 + $0x488] ss:$16 sps:$4 sm:$0xff]   ;;  %v7180_v25 = vld [vmem:[%s10638_s1 + $0x4a4] ss:$16 sps:$4 sm:$0xff]  }
  0x58   :  { %4951 = vmatprep.subr.bf16.mxu0 %v7087_v26  ;;  %5510 = vmatprep.subr.bf16.mxu1 %v7090_v27  ;;  %v7183_v26 = vld [vmem:[%s10638_s1 + $0x4ac] ss:$16 sps:$4 sm:$0xff]   ;;  %v7178_v27 = vld [vmem:[%s10638_s1 + $0x4a0] ss:$16 sps:$4 sm:$0xff]  }
  0x5b   :  { %4952 = vmatpush1.bf16.msra.mxu0 %v7085_v28  ;;  %5511 = vmatpush1.bf16.msra.mxu1 %v7088_v29  ;;  %v7181_v28 = vld [vmem:[%s10638_s1 + $0x4a8] ss:$16 sps:$4 sm:$0xff]   ;;  %v7186_v29 = vld [vmem:[%s10638_s1 + $0x4c4] ss:$16 sps:$4 sm:$0xff]  }
  0x5c   :  { %4953 = vmatprep.subr.bf16.mxu0 %v7093_v31  ;;  %5512 = vmatprep.subr.bf16.mxu1 %v7096_v32  ;;  %v7184_v31 = vld [vmem:[%s10638_s1 + $0x4c0] ss:$16 sps:$4 sm:$0xff]   ;;  %v7187_v32 = vld [vmem:[%s10638_s1 + $0x4c8] ss:$16 sps:$4 sm:$0xff]  }
  0x5f   :  { %4954 = vmatpush1.bf16.msra.mxu0 %v7091_v33  ;;  %5513 = vmatpush1.bf16.msra.mxu1 %v7094_v34  ;;  %v7192_v33 = vld [vmem:[%s10638_s1 + $0x4e4] ss:$16 sps:$4 sm:$0xff]   ;;  %v7195_v34 = vld [vmem:[%s10638_s1 + $0x4ec] ss:$16 sps:$4 sm:$0xff]  }
  0x60   :  { %4955 = vmatprep.subr.bf16.mxu0 %v7099_v35  ;;  %5514 = vmatprep.subr.bf16.mxu1 %v7102_v36  ;;  %v7190_v35 = vld [vmem:[%s10638_s1 + $0x4e0] ss:$16 sps:$4 sm:$0xff]   ;;  %v7193_v36 = vld [vmem:[%s10638_s1 + $0x4e8] ss:$16 sps:$4 sm:$0xff]  }
  0x63   :  { %4956 = vmatpush1.bf16.msra.mxu0 %v7097_v37  ;;  %5515 = vmatpush1.bf16.msra.mxu1 %v7100_v38  ;;  %v7198_v37 = vld [vmem:[%s10638_s1 + $0x504] ss:$16 sps:$4 sm:$0xff]   ;;  %v7201_v38 = vld [vmem:[%s10638_s1 + $0x50c] ss:$16 sps:$4 sm:$0xff]  }
  0x64   :  { %4957 = vmatprep.subr.bf16.mxu0 %v7105_v39  ;;  %5516 = vmatprep.subr.bf16.mxu1 %v7108_v40  ;;  %v7196_v39 = vld [vmem:[%s10638_s1 + $0x500] ss:$16 sps:$4 sm:$0xff]   ;;  %v7199_v40 = vld [vmem:[%s10638_s1 + $0x508] ss:$16 sps:$4 sm:$0xff]  }
  0x67   :  { %4958 = vmatpush1.bf16.msra.mxu0 %v7103_v41  ;;  %5517 = vmatpush1.bf16.msra.mxu1 %v7106_v42  ;;  %v7204_v41 = vld [vmem:[%s10638_s1 + $0x524] ss:$16 sps:$4 sm:$0xff]   ;;  %v7207_v42 = vld [vmem:[%s10638_s1 + $0x52c] ss:$16 sps:$4 sm:$0xff]  }
  0x68   :  { %4959 = vmatprep.subr.bf16.mxu0 %v7111_v43  ;;  %5518 = vmatprep.subr.bf16.mxu1 %v7114_v44  ;;  %v7202_v43 = vld [vmem:[%s10638_s1 + $0x520] ss:$16 sps:$4 sm:$0xff]   ;;  %v7205_v44 = vld [vmem:[%s10638_s1 + $0x528] ss:$16 sps:$4 sm:$0xff]  }
  0x6b   :  { %4960 = vmatpush1.bf16.msra.mxu0 %v7109_v45  ;;  %5519 = vmatpush1.bf16.msra.mxu1 %v7112_v46  ;;  %v7210_v45 = vld [vmem:[%s10638_s1 + $0x544] ss:$16 sps:$4 sm:$0xff]   ;;  %v7213_v46 = vld [vmem:[%s10638_s1 + $0x54c] ss:$16 sps:$4 sm:$0xff]  }
  0x6c   :  { %4961 = vmatprep.subr.bf16.mxu0 %v7117_v47  ;;  %5520 = vmatprep.subr.bf16.mxu1 %v7120_v48  ;;  %v7208_v47 = vld [vmem:[%s10638_s1 + $0x540] ss:$16 sps:$4 sm:$0xff]   ;;  %v7211_v48 = vld [vmem:[%s10638_s1 + $0x548] ss:$16 sps:$4 sm:$0xff]  }
  0x6f   :  { %4962 = vmatpush1.bf16.msra.mxu0 %v7115_v49  ;;  %5521 = vmatpush1.bf16.msra.mxu1 %v7118_v50  ;;  %v7216_v49 = vld [vmem:[%s10638_s1 + $0x564] ss:$16 sps:$4 sm:$0xff]   ;;  %v7219_v50 = vld [vmem:[%s10638_s1 + $0x56c] ss:$16 sps:$4 sm:$0xff]  }
  0x70   :  { %4963 = vmatprep.subr.bf16.mxu0 %v7123_v51  ;;  %5522 = vmatprep.subr.bf16.mxu1 %v7126_v52  ;;  %v7214_v51 = vld [vmem:[%s10638_s1 + $0x560] ss:$16 sps:$4 sm:$0xff]   ;;  %v7217_v52 = vld [vmem:[%s10638_s1 + $0x568] ss:$16 sps:$4 sm:$0xff]  }
  0x73   :  { %4964 = vmatpush1.bf16.msra.mxu0 %v7121_v53  ;;  %5523 = vmatpush1.bf16.msra.mxu1 %v7124_v54  ;;  %v7222_v53 = vld [vmem:[%s10638_s1 + $0x584] ss:$16 sps:$4 sm:$0xff]   ;;  %v7225_v54 = vld [vmem:[%s10638_s1 + $0x58c] ss:$16 sps:$4 sm:$0xff]  }
  0x74   :  { %4965 = vmatprep.subr.bf16.mxu0 %v7129_v55  ;;  %5524 = vmatprep.subr.bf16.mxu1 %v7132_v56  ;;  %v7220_v55 = vld [vmem:[%s10638_s1 + $0x580] ss:$16 sps:$4 sm:$0xff]   ;;  %v7223_v56 = vld [vmem:[%s10638_s1 + $0x588] ss:$16 sps:$4 sm:$0xff]  }
  0x77   :  { %4966 = vmatpush1.bf16.msra.mxu0 %v7127_v57  ;;  %5525 = vmatpush1.bf16.msra.mxu1 %v7130_v58  ;;  %v7228_v57 = vld [vmem:[%s10638_s1 + $0x5a4] ss:$16 sps:$4 sm:$0xff]   ;;  %v7231_v58 = vld [vmem:[%s10638_s1 + $0x5ac] ss:$16 sps:$4 sm:$0xff]  }
  0x78   :  { %4967 = vmatprep.subr.bf16.mxu0 %v7135_v59  ;;  %5526 = vmatprep.subr.bf16.mxu1 %v7138_v60  ;;  %v7226_v59 = vld [vmem:[%s10638_s1 + $0x5a0] ss:$16 sps:$4 sm:$0xff]   ;;  %v7229_v60 = vld [vmem:[%s10638_s1 + $0x5a8] ss:$16 sps:$4 sm:$0xff]  }
  0x7b   :  { %4968 = vmatpush1.bf16.msra.mxu0 %v7133_v61  ;;  %5527 = vmatpush1.bf16.msra.mxu1 %v7136_v62  ;;  %v7234_v61 = vld [vmem:[%s10638_s1 + $0x5c4] ss:$16 sps:$4 sm:$0xff]   ;;  %v7237_v62 = vld [vmem:[%s10638_s1 + $0x5cc] ss:$16 sps:$4 sm:$0xff]  }
  0x7c   :  { %4969 = vmatprep.subr.bf16.mxu0 %v7141_v63  ;;  %5528 = vmatprep.subr.bf16.mxu1 %v7144_v0  ;;  %v7232_v63 = vld [vmem:[%s10638_s1 + $0x5c0] ss:$16 sps:$4 sm:$0xff]   ;;  %v7235_v0 = vld [vmem:[%s10638_s1 + $0x5c8] ss:$16 sps:$4 sm:$0xff]  }
  0x7f   :  { %4970 = vmatpush1.bf16.msra.mxu0 %v7139_v1  ;;  %5529 = vmatpush1.bf16.msra.mxu1 %v7142_v2  ;;  %v7240_v1 = vld [vmem:[%s10638_s1 + $0x5e4] ss:$16 sps:$4 sm:$0xff]   ;;  %v7243_v2 = vld [vmem:[%s10638_s1 + $0x5ec] ss:$16 sps:$4 sm:$0xff]  }
  0x80   :  { %4982 = vmatprep.subr.bf16.mxu0 %v7150_v3  ;;  %5541 = vmatprep.subr.bf16.mxu1 %v7153_v4  ;;  %v7238_v3 = vld [vmem:[%s10638_s1 + $0x5e0] ss:$16 sps:$4 sm:$0xff]   ;;  %v7241_v4 = vld [vmem:[%s10638_s1 + $0x5e8] ss:$16 sps:$4 sm:$0xff]  }
  0x82   :  { %4972 = vmatmul.mubr.bf16.vlgmr.msra.gmra.mrb[0].mxu0 %v7145_v5  ;;  %5531 = vmatmul.mubr.bf16.vlgmr.msra.gmra.mrb[0].mxu1 %v7145_v5  ;;  %v7249_v5 = vld [vmem:[%s10638_s1 + $0x604] ss:$16 sps:$4 sm:$0xff]  }
  0x83   :  { %4983 = vmatpush1.bf16.msra.mxu0 %v7148_v6  ;;  %5542 = vmatpush1.bf16.msra.mxu1 %v7151_v7  ;;  %v7252_v6 = vld [vmem:[%s10638_s1 + $0x60c] ss:$16 sps:$4 sm:$0xff]   ;;  %v7244_v7 = vld [vmem:[%s10639_s0 + $0x10] ss:$100 sps:$4 sm:$0xff]  }
  0x84   :  { %4984 = vmatprep.subr.bf16.mxu0 %v7156_v8  ;;  %5543 = vmatprep.subr.bf16.mxu1 %v7159_v9  ;;  %v7247_v8 = vld [vmem:[%s10638_s1 + $0x600] ss:$16 sps:$4 sm:$0xff]   ;;  %v7250_v9 = vld [vmem:[%s10638_s1 + $0x608] ss:$16 sps:$4 sm:$0xff]  }
  0x85   :  { %5014 = vmatprep.mubr.bf16.mxu0 %v7246_v12  ;;  %5573 = vmatprep.mubr.bf16.mxu1 %v7246_v12  ;;  %v7345_v12 = vld [vmem:[%s10639_s0 + $0x1c] ss:$100 sps:$4 sm:$0xff]  }
  0x87   :  { %4985 = vmatpush1.bf16.msra.mxu0 %v7154_v10  ;;  %5544 = vmatpush1.bf16.msra.mxu1 %v7157_v11  ;;  %v7255_v10 = vld [vmem:[%s10638_s1 + $0x624] ss:$16 sps:$4 sm:$0xff]   ;;  %v7258_v11 = vld [vmem:[%s10638_s1 + $0x62c] ss:$16 sps:$4 sm:$0xff]  }
  0x88   :  { %4986 = vmatprep.subr.bf16.mxu0 %v7162_v13  ;;  %5545 = vmatprep.subr.bf16.mxu1 %v7165_v14  ;;  %v7253_v13 = vld [vmem:[%s10638_s1 + $0x620] ss:$16 sps:$4 sm:$0xff]   ;;  %v7256_v14 = vld [vmem:[%s10638_s1 + $0x628] ss:$16 sps:$4 sm:$0xff]  }
  0x8b   :  { %4987 = vmatpush1.bf16.msra.mxu0 %v7160_v15  ;;  %5546 = vmatpush1.bf16.msra.mxu1 %v7163_v16  ;;  %v7261_v15 = vld [vmem:[%s10638_s1 + $0x644] ss:$16 sps:$4 sm:$0xff]   ;;  %v7264_v16 = vld [vmem:[%s10638_s1 + $0x64c] ss:$16 sps:$4 sm:$0xff]  }
  0x8c   :  { %4988 = vmatprep.subr.bf16.mxu0 %v7168_v17  ;;  %5547 = vmatprep.subr.bf16.mxu1 %v7171_v18  ;;  %v7259_v17 = vld [vmem:[%s10638_s1 + $0x640] ss:$16 sps:$4 sm:$0xff]   ;;  %v7262_v18 = vld [vmem:[%s10638_s1 + $0x648] ss:$16 sps:$4 sm:$0xff]  }
  0x8f   :  { %4989 = vmatpush1.bf16.msra.mxu0 %v7166_v19  ;;  %5548 = vmatpush1.bf16.msra.mxu1 %v7169_v20  ;;  %v7267_v19 = vld [vmem:[%s10638_s1 + $0x664] ss:$16 sps:$4 sm:$0xff]   ;;  %v7270_v20 = vld [vmem:[%s10638_s1 + $0x66c] ss:$16 sps:$4 sm:$0xff]  }
  0x90   :  { %4990 = vmatprep.subr.bf16.mxu0 %v7174_v21  ;;  %5549 = vmatprep.subr.bf16.mxu1 %v7177_v22  ;;  %v7265_v21 = vld [vmem:[%s10638_s1 + $0x660] ss:$16 sps:$4 sm:$0xff]   ;;  %v7268_v22 = vld [vmem:[%s10638_s1 + $0x668] ss:$16 sps:$4 sm:$0xff]  }
  0x93   :  { %4991 = vmatpush1.bf16.msra.mxu0 %v7172_v23  ;;  %5550 = vmatpush1.bf16.msra.mxu1 %v7175_v24  ;;  %v7273_v23 = vld [vmem:[%s10638_s1 + $0x684] ss:$16 sps:$4 sm:$0xff]   ;;  %v7276_v24 = vld [vmem:[%s10638_s1 + $0x68c] ss:$16 sps:$4 sm:$0xff]  }
  0x94   :  { %4992 = vmatprep.subr.bf16.mxu0 %v7180_v25  ;;  %5551 = vmatprep.subr.bf16.mxu1 %v7183_v26  ;;  %v7271_v25 = vld [vmem:[%s10638_s1 + $0x680] ss:$16 sps:$4 sm:$0xff]   ;;  %v7274_v26 = vld [vmem:[%s10638_s1 + $0x688] ss:$16 sps:$4 sm:$0xff]  }
  0x97   :  { %4993 = vmatpush1.bf16.msra.mxu0 %v7178_v27  ;;  %5552 = vmatpush1.bf16.msra.mxu1 %v7181_v28  ;;  %v7279_v27 = vld [vmem:[%s10638_s1 + $0x6a4] ss:$16 sps:$4 sm:$0xff]   ;;  %v7282_v28 = vld [vmem:[%s10638_s1 + $0x6ac] ss:$16 sps:$4 sm:$0xff]  }
  0x98   :  { %4994 = vmatprep.subr.bf16.mxu0 %v7186_v29  ;;  %5553 = vmatprep.subr.bf16.mxu1 %v7189_v30  ;;  %v7277_v29 = vld [vmem:[%s10638_s1 + $0x6a0] ss:$16 sps:$4 sm:$0xff]   ;;  %v7280_v30 = vld [vmem:[%s10638_s1 + $0x6a8] ss:$16 sps:$4 sm:$0xff]  }
  0x9b   :  { %4995 = vmatpush1.bf16.msra.mxu0 %v7184_v31  ;;  %5554 = vmatpush1.bf16.msra.mxu1 %v7187_v32  ;;  %v7285_v31 = vld [vmem:[%s10638_s1 + $0x6c4] ss:$16 sps:$4 sm:$0xff]   ;;  %v7288_v32 = vld [vmem:[%s10638_s1 + $0x6cc] ss:$16 sps:$4 sm:$0xff]  }
  0x9c   :  { %4996 = vmatprep.subr.bf16.mxu0 %v7192_v33  ;;  %5555 = vmatprep.subr.bf16.mxu1 %v7195_v34  ;;  %v7283_v33 = vld [vmem:[%s10638_s1 + $0x6c0] ss:$16 sps:$4 sm:$0xff]   ;;  %v7286_v34 = vld [vmem:[%s10638_s1 + $0x6c8] ss:$16 sps:$4 sm:$0xff]  }
  0x9f   :  { %4997 = vmatpush1.bf16.msra.mxu0 %v7190_v35  ;;  %5556 = vmatpush1.bf16.msra.mxu1 %v7193_v36  ;;  %v7291_v35 = vld [vmem:[%s10638_s1 + $0x6e4] ss:$16 sps:$4 sm:$0xff]   ;;  %v7294_v36 = vld [vmem:[%s10638_s1 + $0x6ec] ss:$16 sps:$4 sm:$0xff]  }
  0xa0   :  { %4998 = vmatprep.subr.bf16.mxu0 %v7198_v37  ;;  %5557 = vmatprep.subr.bf16.mxu1 %v7201_v38  ;;  %v7289_v37 = vld [vmem:[%s10638_s1 + $0x6e0] ss:$16 sps:$4 sm:$0xff]   ;;  %v7292_v38 = vld [vmem:[%s10638_s1 + $0x6e8] ss:$16 sps:$4 sm:$0xff]  }
  0xa3   :  { %4999 = vmatpush1.bf16.msra.mxu0 %v7196_v39  ;;  %5558 = vmatpush1.bf16.msra.mxu1 %v7199_v40  ;;  %v7297_v39 = vld [vmem:[%s10638_s1 + $0x704] ss:$16 sps:$4 sm:$0xff]   ;;  %v7300_v40 = vld [vmem:[%s10638_s1 + $0x70c] ss:$16 sps:$4 sm:$0xff]  }
  0xa4   :  { %5000 = vmatprep.subr.bf16.mxu0 %v7204_v41  ;;  %5559 = vmatprep.subr.bf16.mxu1 %v7207_v42  ;;  %v7295_v41 = vld [vmem:[%s10638_s1 + $0x700] ss:$16 sps:$4 sm:$0xff]   ;;  %v7298_v42 = vld [vmem:[%s10638_s1 + $0x708] ss:$16 sps:$4 sm:$0xff]  }
  0xa7   :  { %5001 = vmatpush1.bf16.msra.mxu0 %v7202_v43  ;;  %5560 = vmatpush1.bf16.msra.mxu1 %v7205_v44  ;;  %v7303_v43 = vld [vmem:[%s10638_s1 + $0x724] ss:$16 sps:$4 sm:$0xff]   ;;  %v7306_v44 = vld [vmem:[%s10638_s1 + $0x72c] ss:$16 sps:$4 sm:$0xff]  }
  0xa8   :  { %5002 = vmatprep.subr.bf16.mxu0 %v7210_v45  ;;  %5561 = vmatprep.subr.bf16.mxu1 %v7213_v46  ;;  %v7301_v45 = vld [vmem:[%s10638_s1 + $0x720] ss:$16 sps:$4 sm:$0xff]   ;;  %v7304_v46 = vld [vmem:[%s10638_s1 + $0x728] ss:$16 sps:$4 sm:$0xff]  }
  0xab   :  { %5003 = vmatpush1.bf16.msra.mxu0 %v7208_v47  ;;  %5562 = vmatpush1.bf16.msra.mxu1 %v7211_v48  ;;  %v7309_v47 = vld [vmem:[%s10638_s1 + $0x744] ss:$16 sps:$4 sm:$0xff]   ;;  %v7312_v48 = vld [vmem:[%s10638_s1 + $0x74c] ss:$16 sps:$4 sm:$0xff]  }
  0xac   :  { %5004 = vmatprep.subr.bf16.mxu0 %v7216_v49  ;;  %5563 = vmatprep.subr.bf16.mxu1 %v7219_v50  ;;  %v7307_v49 = vld [vmem:[%s10638_s1 + $0x740] ss:$16 sps:$4 sm:$0xff]   ;;  %v7310_v50 = vld [vmem:[%s10638_s1 + $0x748] ss:$16 sps:$4 sm:$0xff]  }
  0xaf   :  { %5005 = vmatpush1.bf16.msra.mxu0 %v7214_v51  ;;  %5564 = vmatpush1.bf16.msra.mxu1 %v7217_v52  ;;  %v7315_v51 = vld [vmem:[%s10638_s1 + $0x764] ss:$16 sps:$4 sm:$0xff]   ;;  %v7318_v52 = vld [vmem:[%s10638_s1 + $0x76c] ss:$16 sps:$4 sm:$0xff]  }
  0xb0   :  { %5006 = vmatprep.subr.bf16.mxu0 %v7222_v53  ;;  %5565 = vmatprep.subr.bf16.mxu1 %v7225_v54  ;;  %v7313_v53 = vld [vmem:[%s10638_s1 + $0x760] ss:$16 sps:$4 sm:$0xff]   ;;  %v7316_v54 = vld [vmem:[%s10638_s1 + $0x768] ss:$16 sps:$4 sm:$0xff]  }
  0xb3   :  { %5007 = vmatpush1.bf16.msra.mxu0 %v7220_v55  ;;  %5566 = vmatpush1.bf16.msra.mxu1 %v7223_v56  ;;  %v7321_v55 = vld [vmem:[%s10638_s1 + $0x784] ss:$16 sps:$4 sm:$0xff]   ;;  %v7324_v56 = vld [vmem:[%s10638_s1 + $0x78c] ss:$16 sps:$4 sm:$0xff]  }
  0xb4   :  { %5008 = vmatprep.subr.bf16.mxu0 %v7228_v57  ;;  %5567 = vmatprep.subr.bf16.mxu1 %v7231_v58  ;;  %v7319_v57 = vld [vmem:[%s10638_s1 + $0x780] ss:$16 sps:$4 sm:$0xff]   ;;  %v7322_v58 = vld [vmem:[%s10638_s1 + $0x788] ss:$16 sps:$4 sm:$0xff]  }
  0xb7   :  { %5009 = vmatpush1.bf16.msra.mxu0 %v7226_v59  ;;  %5568 = vmatpush1.bf16.msra.mxu1 %v7229_v60  ;;  %v7327_v59 = vld [vmem:[%s10638_s1 + $0x7a4] ss:$16 sps:$4 sm:$0xff]   ;;  %v7330_v60 = vld [vmem:[%s10638_s1 + $0x7ac] ss:$16 sps:$4 sm:$0xff]  }
  0xb8   :  { %5010 = vmatprep.subr.bf16.mxu0 %v7234_v61  ;;  %5569 = vmatprep.subr.bf16.mxu1 %v7237_v62  ;;  %v7325_v61 = vld [vmem:[%s10638_s1 + $0x7a0] ss:$16 sps:$4 sm:$0xff]   ;;  %v7328_v62 = vld [vmem:[%s10638_s1 + $0x7a8] ss:$16 sps:$4 sm:$0xff]  }
  0xbb   :  { %5011 = vmatpush1.bf16.msra.mxu0 %v7232_v63  ;;  %5570 = vmatpush1.bf16.msra.mxu1 %v7235_v0  ;;  %v7333_v63 = vld [vmem:[%s10638_s1 + $0x7c4] ss:$16 sps:$4 sm:$0xff]   ;;  %v7336_v0 = vld [vmem:[%s10638_s1 + $0x7cc] ss:$16 sps:$4 sm:$0xff]  }
  0xbc   :  { %5012 = vmatprep.subr.bf16.mxu0 %v7240_v1  ;;  %5571 = vmatprep.subr.bf16.mxu1 %v7243_v2  ;;  %v7331_v1 = vld [vmem:[%s10638_s1 + $0x7c0] ss:$16 sps:$4 sm:$0xff]   ;;  %v7334_v2 = vld [vmem:[%s10638_s1 + $0x7c8] ss:$16 sps:$4 sm:$0xff]  }
  0xbf   :  { %5013 = vmatpush1.bf16.msra.mxu0 %v7238_v3  ;;  %5572 = vmatpush1.bf16.msra.mxu1 %v7241_v4  ;;  %v7339_v3 = vld [vmem:[%s10638_s1 + $0x7e4] ss:$16 sps:$4 sm:$0xff]   ;;  %v7342_v4 = vld [vmem:[%s10638_s1 + $0x7ec] ss:$16 sps:$4 sm:$0xff]  }
  0xc0   :  { %5025 = vmatprep.subr.bf16.mxu0 %v7249_v5  ;;  %5584 = vmatprep.subr.bf16.mxu1 %v7252_v6  ;;  %v7337_v5 = vld [vmem:[%s10638_s1 + $0x7e0] ss:$16 sps:$4 sm:$0xff]   ;;  %v7340_v6 = vld [vmem:[%s10638_s1 + $0x7e8] ss:$16 sps:$4 sm:$0xff]  }
  0xc2   :  { %5015 = vmatmul.mubr.bf16.vlgmr.msra.gmra.mrb[0].mxu0 %v7244_v7  ;;  %5574 = vmatmul.mubr.bf16.vlgmr.msra.gmra.mrb[0].mxu1 %v7244_v7  ;;  %v7348_v7 = vld [vmem:[%s10638_s1 + $0x804] ss:$16 sps:$4 sm:$0xff]  }
  0xc3   :  { %5026 = vmatpush1.bf16.msra.mxu0 %v7247_v8  ;;  %5585 = vmatpush1.bf16.msra.mxu1 %v7250_v9  ;;  %v7351_v8 = vld [vmem:[%s10638_s1 + $0x80c] ss:$16 sps:$4 sm:$0xff]  }
  0xc4   :  { %5027 = vmatprep.subr.bf16.mxu0 %v7255_v10  ;;  %5586 = vmatprep.subr.bf16.mxu1 %v7258_v11  ;;  %v7343_v9 = vld [vmem:[%s10639_s0 + $0x18] ss:$100 sps:$4 sm:$0xff]   ;;  %v7346_v10 = vld [vmem:[%s10638_s1 + $0x800] ss:$16 sps:$4 sm:$0xff]  }
  0xc5   :  { %5057 = vmatprep.mubr.bf16.mxu0 %v7345_v12  ;;  %5616 = vmatprep.mubr.bf16.mxu1 %v7345_v12  ;;  %v7349_v11 = vld [vmem:[%s10638_s1 + $0x808] ss:$16 sps:$4 sm:$0xff]   ;;  %v7354_v12 = vld [vmem:[%s10638_s1 + $0x824] ss:$16 sps:$4 sm:$0xff]  }
  0xc7   :  { %5028 = vmatpush1.bf16.msra.mxu0 %v7253_v13  ;;  %5587 = vmatpush1.bf16.msra.mxu1 %v7256_v14  ;;  %v7357_v13 = vld [vmem:[%s10638_s1 + $0x82c] ss:$16 sps:$4 sm:$0xff]   ;;  %v7444_v14 = vld [vmem:[%s10639_s0 + $0x24] ss:$100 sps:$4 sm:$0xff]  }
  0xc8   :  { %5029 = vmatprep.subr.bf16.mxu0 %v7261_v15  ;;  %5588 = vmatprep.subr.bf16.mxu1 %v7264_v16  ;;  %v7352_v15 = vld [vmem:[%s10638_s1 + $0x820] ss:$16 sps:$4 sm:$0xff]   ;;  %v7355_v16 = vld [vmem:[%s10638_s1 + $0x828] ss:$16 sps:$4 sm:$0xff]  }
  0xcb   :  { %5030 = vmatpush1.bf16.msra.mxu0 %v7259_v17  ;;  %5589 = vmatpush1.bf16.msra.mxu1 %v7262_v18  ;;  %v7360_v17 = vld [vmem:[%s10638_s1 + $0x844] ss:$16 sps:$4 sm:$0xff]   ;;  %v7363_v18 = vld [vmem:[%s10638_s1 + $0x84c] ss:$16 sps:$4 sm:$0xff]  }
  0xcc   :  { %5031 = vmatprep.subr.bf16.mxu0 %v7267_v19  ;;  %5590 = vmatprep.subr.bf16.mxu1 %v7270_v20  ;;  %v7358_v19 = vld [vmem:[%s10638_s1 + $0x840] ss:$16 sps:$4 sm:$0xff]   ;;  %v7361_v20 = vld [vmem:[%s10638_s1 + $0x848] ss:$16 sps:$4 sm:$0xff]  }
  0xcf   :  { %5032 = vmatpush1.bf16.msra.mxu0 %v7265_v21  ;;  %5591 = vmatpush1.bf16.msra.mxu1 %v7268_v22  ;;  %v7366_v21 = vld [vmem:[%s10638_s1 + $0x864] ss:$16 sps:$4 sm:$0xff]   ;;  %v7369_v22 = vld [vmem:[%s10638_s1 + $0x86c] ss:$16 sps:$4 sm:$0xff]  }
  0xd0   :  { %5033 = vmatprep.subr.bf16.mxu0 %v7273_v23  ;;  %5592 = vmatprep.subr.bf16.mxu1 %v7276_v24  ;;  %v7364_v23 = vld [vmem:[%s10638_s1 + $0x860] ss:$16 sps:$4 sm:$0xff]   ;;  %v7367_v24 = vld [vmem:[%s10638_s1 + $0x868] ss:$16 sps:$4 sm:$0xff]  }
  0xd3   :  { %5034 = vmatpush1.bf16.msra.mxu0 %v7271_v25  ;;  %5593 = vmatpush1.bf16.msra.mxu1 %v7274_v26  ;;  %v7372_v25 = vld [vmem:[%s10638_s1 + $0x884] ss:$16 sps:$4 sm:$0xff]   ;;  %v7375_v26 = vld [vmem:[%s10638_s1 + $0x88c] ss:$16 sps:$4 sm:$0xff]  }
  0xd4   :  { %5035 = vmatprep.subr.bf16.mxu0 %v7279_v27  ;;  %5594 = vmatprep.subr.bf16.mxu1 %v7282_v28  ;;  %v7370_v27 = vld [vmem:[%s10638_s1 + $0x880] ss:$16 sps:$4 sm:$0xff]   ;;  %v7373_v28 = vld [vmem:[%s10638_s1 + $0x888] ss:$16 sps:$4 sm:$0xff]  }
  0xd7   :  { %5036 = vmatpush1.bf16.msra.mxu0 %v7277_v29  ;;  %5595 = vmatpush1.bf16.msra.mxu1 %v7280_v30  ;;  %v7378_v29 = vld [vmem:[%s10638_s1 + $0x8a4] ss:$16 sps:$4 sm:$0xff]   ;;  %v7381_v30 = vld [vmem:[%s10638_s1 + $0x8ac] ss:$16 sps:$4 sm:$0xff]  }
  0xd8   :  { %5037 = vmatprep.subr.bf16.mxu0 %v7285_v31  ;;  %5596 = vmatprep.subr.bf16.mxu1 %v7288_v32  ;;  %v7376_v31 = vld [vmem:[%s10638_s1 + $0x8a0] ss:$16 sps:$4 sm:$0xff]   ;;  %v7379_v32 = vld [vmem:[%s10638_s1 + $0x8a8] ss:$16 sps:$4 sm:$0xff]  }
  0xdb   :  { %5038 = vmatpush1.bf16.msra.mxu0 %v7283_v33  ;;  %5597 = vmatpush1.bf16.msra.mxu1 %v7286_v34  ;;  %v7384_v33 = vld [vmem:[%s10638_s1 + $0x8c4] ss:$16 sps:$4 sm:$0xff]   ;;  %v7387_v34 = vld [vmem:[%s10638_s1 + $0x8cc] ss:$16 sps:$4 sm:$0xff]  }
  0xdc   :  { %5039 = vmatprep.subr.bf16.mxu0 %v7291_v35  ;;  %5598 = vmatprep.subr.bf16.mxu1 %v7294_v36  ;;  %v7382_v35 = vld [vmem:[%s10638_s1 + $0x8c0] ss:$16 sps:$4 sm:$0xff]   ;;  %v7385_v36 = vld [vmem:[%s10638_s1 + $0x8c8] ss:$16 sps:$4 sm:$0xff]  }
  0xdf   :  { %5040 = vmatpush1.bf16.msra.mxu0 %v7289_v37  ;;  %5599 = vmatpush1.bf16.msra.mxu1 %v7292_v38  ;;  %v7390_v37 = vld [vmem:[%s10638_s1 + $0x8e4] ss:$16 sps:$4 sm:$0xff]   ;;  %v7393_v38 = vld [vmem:[%s10638_s1 + $0x8ec] ss:$16 sps:$4 sm:$0xff]  }
  0xe0   :  { %5041 = vmatprep.subr.bf16.mxu0 %v7297_v39  ;;  %5600 = vmatprep.subr.bf16.mxu1 %v7300_v40  ;;  %v7388_v39 = vld [vmem:[%s10638_s1 + $0x8e0] ss:$16 sps:$4 sm:$0xff]   ;;  %v7391_v40 = vld [vmem:[%s10638_s1 + $0x8e8] ss:$16 sps:$4 sm:$0xff]  }
  0xe3   :  { %5042 = vmatpush1.bf16.msra.mxu0 %v7295_v41  ;;  %5601 = vmatpush1.bf16.msra.mxu1 %v7298_v42  ;;  %v7396_v41 = vld [vmem:[%s10638_s1 + $0x904] ss:$16 sps:$4 sm:$0xff]   ;;  %v7399_v42 = vld [vmem:[%s10638_s1 + $0x90c] ss:$16 sps:$4 sm:$0xff]  }
  0xe4   :  { %5043 = vmatprep.subr.bf16.mxu0 %v7303_v43  ;;  %5602 = vmatprep.subr.bf16.mxu1 %v7306_v44  ;;  %v7394_v43 = vld [vmem:[%s10638_s1 + $0x900] ss:$16 sps:$4 sm:$0xff]   ;;  %v7397_v44 = vld [vmem:[%s10638_s1 + $0x908] ss:$16 sps:$4 sm:$0xff]  }
  0xe7   :  { %5044 = vmatpush1.bf16.msra.mxu0 %v7301_v45  ;;  %5603 = vmatpush1.bf16.msra.mxu1 %v7304_v46  ;;  %v7402_v45 = vld [vmem:[%s10638_s1 + $0x924] ss:$16 sps:$4 sm:$0xff]   ;;  %v7405_v46 = vld [vmem:[%s10638_s1 + $0x92c] ss:$16 sps:$4 sm:$0xff]  }
  0xe8   :  { %5045 = vmatprep.subr.bf16.mxu0 %v7309_v47  ;;  %5604 = vmatprep.subr.bf16.mxu1 %v7312_v48  ;;  %v7400_v47 = vld [vmem:[%s10638_s1 + $0x920] ss:$16 sps:$4 sm:$0xff]   ;;  %v7403_v48 = vld [vmem:[%s10638_s1 + $0x928] ss:$16 sps:$4 sm:$0xff]  }
  0xeb   :  { %5046 = vmatpush1.bf16.msra.mxu0 %v7307_v49  ;;  %5605 = vmatpush1.bf16.msra.mxu1 %v7310_v50  ;;  %v7408_v49 = vld [vmem:[%s10638_s1 + $0x944] ss:$16 sps:$4 sm:$0xff]   ;;  %v7411_v50 = vld [vmem:[%s10638_s1 + $0x94c] ss:$16 sps:$4 sm:$0xff]  }
  0xec   :  { %5047 = vmatprep.subr.bf16.mxu0 %v7315_v51  ;;  %5606 = vmatprep.subr.bf16.mxu1 %v7318_v52  ;;  %v7406_v51 = vld [vmem:[%s10638_s1 + $0x940] ss:$16 sps:$4 sm:$0xff]   ;;  %v7409_v52 = vld [vmem:[%s10638_s1 + $0x948] ss:$16 sps:$4 sm:$0xff]  }
  0xef   :  { %5048 = vmatpush1.bf16.msra.mxu0 %v7313_v53  ;;  %5607 = vmatpush1.bf16.msra.mxu1 %v7316_v54  ;;  %v7414_v53 = vld [vmem:[%s10638_s1 + $0x964] ss:$16 sps:$4 sm:$0xff]   ;;  %v7417_v54 = vld [vmem:[%s10638_s1 + $0x96c] ss:$16 sps:$4 sm:$0xff]  }
  0xf0   :  { %5049 = vmatprep.subr.bf16.mxu0 %v7321_v55  ;;  %5608 = vmatprep.subr.bf16.mxu1 %v7324_v56  ;;  %v7412_v55 = vld [vmem:[%s10638_s1 + $0x960] ss:$16 sps:$4 sm:$0xff]   ;;  %v7415_v56 = vld [vmem:[%s10638_s1 + $0x968] ss:$16 sps:$4 sm:$0xff]  }
  0xf3   :  { %5050 = vmatpush1.bf16.msra.mxu0 %v7319_v57  ;;  %5609 = vmatpush1.bf16.msra.mxu1 %v7322_v58  ;;  %v7420_v57 = vld [vmem:[%s10638_s1 + $0x984] ss:$16 sps:$4 sm:$0xff]   ;;  %v7423_v58 = vld [vmem:[%s10638_s1 + $0x98c] ss:$16 sps:$4 sm:$0xff]  }
  0xf4   :  { %5051 = vmatprep.subr.bf16.mxu0 %v7327_v59  ;;  %5610 = vmatprep.subr.bf16.mxu1 %v7330_v60  ;;  %v7418_v59 = vld [vmem:[%s10638_s1 + $0x980] ss:$16 sps:$4 sm:$0xff]   ;;  %v7421_v60 = vld [vmem:[%s10638_s1 + $0x988] ss:$16 sps:$4 sm:$0xff]  }
  0xf7   :  { %5052 = vmatpush1.bf16.msra.mxu0 %v7325_v61  ;;  %5611 = vmatpush1.bf16.msra.mxu1 %v7328_v62  ;;  %v7426_v61 = vld [vmem:[%s10638_s1 + $0x9a4] ss:$16 sps:$4 sm:$0xff]   ;;  %v7429_v62 = vld [vmem:[%s10638_s1 + $0x9ac] ss:$16 sps:$4 sm:$0xff]  }
  0xf8   :  { %5053 = vmatprep.subr.bf16.mxu0 %v7333_v63  ;;  %5612 = vmatprep.subr.bf16.mxu1 %v7336_v0  ;;  %v7424_v63 = vld [vmem:[%s10638_s1 + $0x9a0] ss:$16 sps:$4 sm:$0xff]   ;;  %v7427_v0 = vld [vmem:[%s10638_s1 + $0x9a8] ss:$16 sps:$4 sm:$0xff]  }
  0xfb   :  { %5054 = vmatpush1.bf16.msra.mxu0 %v7331_v1  ;;  %5613 = vmatpush1.bf16.msra.mxu1 %v7334_v2  ;;  %v7432_v1 = vld [vmem:[%s10638_s1 + $0x9c4] ss:$16 sps:$4 sm:$0xff]   ;;  %v7435_v2 = vld [vmem:[%s10638_s1 + $0x9cc] ss:$16 sps:$4 sm:$0xff]  }
  0xfc   :  { %5055 = vmatprep.subr.bf16.mxu0 %v7339_v3  ;;  %5614 = vmatprep.subr.bf16.mxu1 %v7342_v4  ;;  %v7430_v3 = vld [vmem:[%s10638_s1 + $0x9c0] ss:$16 sps:$4 sm:$0xff]   ;;  %v7433_v4 = vld [vmem:[%s10638_s1 + $0x9c8] ss:$16 sps:$4 sm:$0xff]  }
  0xff   :  { %5056 = vmatpush1.bf16.msra.mxu0 %v7337_v5  ;;  %5615 = vmatpush1.bf16.msra.mxu1 %v7340_v6  ;;  %v7438_v5 = vld [vmem:[%s10638_s1 + $0x9e4] ss:$16 sps:$4 sm:$0xff]   ;;  %v7441_v6 = vld [vmem:[%s10638_s1 + $0x9ec] ss:$16 sps:$4 sm:$0xff]  }
 0x100   :  { %5068 = vmatprep.subr.bf16.mxu0 %v7348_v7  ;;  %5627 = vmatprep.subr.bf16.mxu1 %v7351_v8  ;;  %v7436_v7 = vld [vmem:[%s10638_s1 + $0x9e0] ss:$16 sps:$4 sm:$0xff]   ;;  %v7439_v8 = vld [vmem:[%s10638_s1 + $0x9e8] ss:$16 sps:$4 sm:$0xff]  }
 0x102   :  { %5058 = vmatmul.mubr.bf16.vlgmr.msra.gmra.mrb[0].mxu0 %v7343_v9  ;;  %5617 = vmatmul.mubr.bf16.vlgmr.msra.gmra.mrb[0].mxu1 %v7343_v9  ;;  %v7442_v9 = vld [vmem:[%s10639_s0 + $0x20] ss:$100 sps:$4 sm:$0xff]  }
 0x103   :  { %5069 = vmatpush1.bf16.msra.mxu0 %v7346_v10  ;;  %5628 = vmatpush1.bf16.msra.mxu1 %v7349_v11  ;;  %v7447_v10 = vld [vmem:[%s10638_s1 + $0xa04] ss:$16 sps:$4 sm:$0xff]   ;;  %v7450_v11 = vld [vmem:[%s10638_s1 + $0xa0c] ss:$16 sps:$4 sm:$0xff]  }
 0x104   :  { %5070 = vmatprep.subr.bf16.mxu0 %v7354_v12  ;;  %5629 = vmatprep.subr.bf16.mxu1 %v7357_v13  ;;  %v7445_v12 = vld [vmem:[%s10638_s1 + $0xa00] ss:$16 sps:$4 sm:$0xff]   ;;  %v7448_v13 = vld [vmem:[%s10638_s1 + $0xa08] ss:$16 sps:$4 sm:$0xff]  }
 0x105   :  { %5100 = vmatprep.mubr.bf16.mxu0 %v7444_v14  ;;  %5659 = vmatprep.mubr.bf16.mxu1 %v7444_v14  ;;  %v7453_v14 = vld [vmem:[%s10638_s1 + $0xa24] ss:$16 sps:$4 sm:$0xff]  }
 0x107   :  { %5071 = vmatpush1.bf16.msra.mxu0 %v7352_v15  ;;  %5630 = vmatpush1.bf16.msra.mxu1 %v7355_v16  ;;  %v7456_v15 = vld [vmem:[%s10638_s1 + $0xa2c] ss:$16 sps:$4 sm:$0xff]  }
 0x108   :  { %5072 = vmatprep.subr.bf16.mxu0 %v7360_v17  ;;  %5631 = vmatprep.subr.bf16.mxu1 %v7363_v18  ;;  %v7543_v16 = vld [vmem:[%s10639_s0 + $0x2c] ss:$100 sps:$4 sm:$0xff]   ;;  %v7454_v18 = vld [vmem:[%s10638_s1 + $0xa28] ss:$16 sps:$4 sm:$0xff]  }
 0x109   :  { %v7451_v17 = vld [vmem:[%s10638_s1 + $0xa20] ss:$16 sps:$4 sm:$0xff]  }
 0x10b   :  { %5073 = vmatpush1.bf16.msra.mxu0 %v7358_v19  ;;  %5632 = vmatpush1.bf16.msra.mxu1 %v7361_v20  ;;  %v7459_v19 = vld [vmem:[%s10638_s1 + $0xa44] ss:$16 sps:$4 sm:$0xff]   ;;  %v7462_v20 = vld [vmem:[%s10638_s1 + $0xa4c] ss:$16 sps:$4 sm:$0xff]  }
 0x10c   :  { %5074 = vmatprep.subr.bf16.mxu0 %v7366_v21  ;;  %5633 = vmatprep.subr.bf16.mxu1 %v7369_v22  ;;  %v7457_v21 = vld [vmem:[%s10638_s1 + $0xa40] ss:$16 sps:$4 sm:$0xff]   ;;  %v7460_v22 = vld [vmem:[%s10638_s1 + $0xa48] ss:$16 sps:$4 sm:$0xff]  }
 0x10f   :  { %5075 = vmatpush1.bf16.msra.mxu0 %v7364_v23  ;;  %5634 = vmatpush1.bf16.msra.mxu1 %v7367_v24  ;;  %v7465_v23 = vld [vmem:[%s10638_s1 + $0xa64] ss:$16 sps:$4 sm:$0xff]   ;;  %v7468_v24 = vld [vmem:[%s10638_s1 + $0xa6c] ss:$16 sps:$4 sm:$0xff]  }
 0x110   :  { %5076 = vmatprep.subr.bf16.mxu0 %v7372_v25  ;;  %5635 = vmatprep.subr.bf16.mxu1 %v7375_v26  ;;  %v7463_v25 = vld [vmem:[%s10638_s1 + $0xa60] ss:$16 sps:$4 sm:$0xff]   ;;  %v7466_v26 = vld [vmem:[%s10638_s1 + $0xa68] ss:$16 sps:$4 sm:$0xff]  }
 0x113   :  { %5077 = vmatpush1.bf16.msra.mxu0 %v7370_v27  ;;  %5636 = vmatpush1.bf16.msra.mxu1 %v7373_v28  ;;  %v7471_v27 = vld [vmem:[%s10638_s1 + $0xa84] ss:$16 sps:$4 sm:$0xff]   ;;  %v7474_v28 = vld [vmem:[%s10638_s1 + $0xa8c] ss:$16 sps:$4 sm:$0xff]  }
 0x114   :  { %5078 = vmatprep.subr.bf16.mxu0 %v7378_v29  ;;  %5637 = vmatprep.subr.bf16.mxu1 %v7381_v30  ;;  %v7469_v29 = vld [vmem:[%s10638_s1 + $0xa80] ss:$16 sps:$4 sm:$0xff]   ;;  %v7472_v30 = vld [vmem:[%s10638_s1 + $0xa88] ss:$16 sps:$4 sm:$0xff]  }
 0x117   :  { %5079 = vmatpush1.bf16.msra.mxu0 %v7376_v31  ;;  %5638 = vmatpush1.bf16.msra.mxu1 %v7379_v32  ;;  %v7477_v31 = vld [vmem:[%s10638_s1 + $0xaa4] ss:$16 sps:$4 sm:$0xff]   ;;  %v7480_v32 = vld [vmem:[%s10638_s1 + $0xaac] ss:$16 sps:$4 sm:$0xff]  }
 0x118   :  { %5080 = vmatprep.subr.bf16.mxu0 %v7384_v33  ;;  %5639 = vmatprep.subr.bf16.mxu1 %v7387_v34  ;;  %v7475_v33 = vld [vmem:[%s10638_s1 + $0xaa0] ss:$16 sps:$4 sm:$0xff]   ;;  %v7478_v34 = vld [vmem:[%s10638_s1 + $0xaa8] ss:$16 sps:$4 sm:$0xff]  }
 0x11b   :  { %5081 = vmatpush1.bf16.msra.mxu0 %v7382_v35  ;;  %5640 = vmatpush1.bf16.msra.mxu1 %v7385_v36  ;;  %v7483_v35 = vld [vmem:[%s10638_s1 + $0xac4] ss:$16 sps:$4 sm:$0xff]   ;;  %v7486_v36 = vld [vmem:[%s10638_s1 + $0xacc] ss:$16 sps:$4 sm:$0xff]  }
 0x11c   :  { %5082 = vmatprep.subr.bf16.mxu0 %v7390_v37  ;;  %5641 = vmatprep.subr.bf16.mxu1 %v7393_v38  ;;  %v7481_v37 = vld [vmem:[%s10638_s1 + $0xac0] ss:$16 sps:$4 sm:$0xff]   ;;  %v7484_v38 = vld [vmem:[%s10638_s1 + $0xac8] ss:$16 sps:$4 sm:$0xff]  }
 0x11f   :  { %5083 = vmatpush1.bf16.msra.mxu0 %v7388_v39  ;;  %5642 = vmatpush1.bf16.msra.mxu1 %v7391_v40  ;;  %v7489_v39 = vld [vmem:[%s10638_s1 + $0xae4] ss:$16 sps:$4 sm:$0xff]   ;;  %v7492_v40 = vld [vmem:[%s10638_s1 + $0xaec] ss:$16 sps:$4 sm:$0xff]  }
 0x120   :  { %5084 = vmatprep.subr.bf16.mxu0 %v7396_v41  ;;  %5643 = vmatprep.subr.bf16.mxu1 %v7399_v42  ;;  %v7487_v41 = vld [vmem:[%s10638_s1 + $0xae0] ss:$16 sps:$4 sm:$0xff]   ;;  %v7490_v42 = vld [vmem:[%s10638_s1 + $0xae8] ss:$16 sps:$4 sm:$0xff]  }
 0x123   :  { %5085 = vmatpush1.bf16.msra.mxu0 %v7394_v43  ;;  %5644 = vmatpush1.bf16.msra.mxu1 %v7397_v44  ;;  %v7495_v43 = vld [vmem:[%s10638_s1 + $0xb04] ss:$16 sps:$4 sm:$0xff]   ;;  %v7498_v44 = vld [vmem:[%s10638_s1 + $0xb0c] ss:$16 sps:$4 sm:$0xff]  }
 0x124   :  { %5086 = vmatprep.subr.bf16.mxu0 %v7402_v45  ;;  %5645 = vmatprep.subr.bf16.mxu1 %v7405_v46  ;;  %v7493_v45 = vld [vmem:[%s10638_s1 + $0xb00] ss:$16 sps:$4 sm:$0xff]   ;;  %v7496_v46 = vld [vmem:[%s10638_s1 + $0xb08] ss:$16 sps:$4 sm:$0xff]  }
 0x127   :  { %5087 = vmatpush1.bf16.msra.mxu0 %v7400_v47  ;;  %5646 = vmatpush1.bf16.msra.mxu1 %v7403_v48  ;;  %v7501_v47 = vld [vmem:[%s10638_s1 + $0xb24] ss:$16 sps:$4 sm:$0xff]   ;;  %v7504_v48 = vld [vmem:[%s10638_s1 + $0xb2c] ss:$16 sps:$4 sm:$0xff]  }
 0x128   :  { %5088 = vmatprep.subr.bf16.mxu0 %v7408_v49  ;;  %5647 = vmatprep.subr.bf16.mxu1 %v7411_v50  ;;  %v7499_v49 = vld [vmem:[%s10638_s1 + $0xb20] ss:$16 sps:$4 sm:$0xff]   ;;  %v7502_v50 = vld [vmem:[%s10638_s1 + $0xb28] ss:$16 sps:$4 sm:$0xff]  }
 0x12b   :  { %5089 = vmatpush1.bf16.msra.mxu0 %v7406_v51  ;;  %5648 = vmatpush1.bf16.msra.mxu1 %v7409_v52  ;;  %v7507_v51 = vld [vmem:[%s10638_s1 + $0xb44] ss:$16 sps:$4 sm:$0xff]   ;;  %v7510_v52 = vld [vmem:[%s10638_s1 + $0xb4c] ss:$16 sps:$4 sm:$0xff]  }
 0x12c   :  { %5090 = vmatprep.subr.bf16.mxu0 %v7414_v53  ;;  %5649 = vmatprep.subr.bf16.mxu1 %v7417_v54  ;;  %v7505_v53 = vld [vmem:[%s10638_s1 + $0xb40] ss:$16 sps:$4 sm:$0xff]   ;;  %v7508_v54 = vld [vmem:[%s10638_s1 + $0xb48] ss:$16 sps:$4 sm:$0xff]  }
 0x12f   :  { %5091 = vmatpush1.bf16.msra.mxu0 %v7412_v55  ;;  %5650 = vmatpush1.bf16.msra.mxu1 %v7415_v56  ;;  %v7513_v55 = vld [vmem:[%s10638_s1 + $0xb64] ss:$16 sps:$4 sm:$0xff]   ;;  %v7516_v56 = vld [vmem:[%s10638_s1 + $0xb6c] ss:$16 sps:$4 sm:$0xff]  }
 0x130   :  { %5092 = vmatprep.subr.bf16.mxu0 %v7420_v57  ;;  %5651 = vmatprep.subr.bf16.mxu1 %v7423_v58  ;;  %v7511_v57 = vld [vmem:[%s10638_s1 + $0xb60] ss:$16 sps:$4 sm:$0xff]   ;;  %v7514_v58 = vld [vmem:[%s10638_s1 + $0xb68] ss:$16 sps:$4 sm:$0xff]  }
 0x133   :  { %5093 = vmatpush1.bf16.msra.mxu0 %v7418_v59  ;;  %5652 = vmatpush1.bf16.msra.mxu1 %v7421_v60  ;;  %v7519_v59 = vld [vmem:[%s10638_s1 + $0xb84] ss:$16 sps:$4 sm:$0xff]   ;;  %v7522_v60 = vld [vmem:[%s10638_s1 + $0xb8c] ss:$16 sps:$4 sm:$0xff]  }
 0x134   :  { %5094 = vmatprep.subr.bf16.mxu0 %v7426_v61  ;;  %5653 = vmatprep.subr.bf16.mxu1 %v7429_v62  ;;  %v7517_v61 = vld [vmem:[%s10638_s1 + $0xb80] ss:$16 sps:$4 sm:$0xff]   ;;  %v7520_v62 = vld [vmem:[%s10638_s1 + $0xb88] ss:$16 sps:$4 sm:$0xff]  }
 0x137   :  { %5095 = vmatpush1.bf16.msra.mxu0 %v7424_v63  ;;  %5654 = vmatpush1.bf16.msra.mxu1 %v7427_v0  ;;  %v7525_v63 = vld [vmem:[%s10638_s1 + $0xba4] ss:$16 sps:$4 sm:$0xff]   ;;  %v7528_v0 = vld [vmem:[%s10638_s1 + $0xbac] ss:$16 sps:$4 sm:$0xff]  }
 0x138   :  { %5096 = vmatprep.subr.bf16.mxu0 %v7432_v1  ;;  %5655 = vmatprep.subr.bf16.mxu1 %v7435_v2  ;;  %v7523_v1 = vld [vmem:[%s10638_s1 + $0xba0] ss:$16 sps:$4 sm:$0xff]   ;;  %v7526_v2 = vld [vmem:[%s10638_s1 + $0xba8] ss:$16 sps:$4 sm:$0xff]  }
 0x13b   :  { %5097 = vmatpush1.bf16.msra.mxu0 %v7430_v3  ;;  %5656 = vmatpush1.bf16.msra.mxu1 %v7433_v4  ;;  %v7531_v3 = vld [vmem:[%s10638_s1 + $0xbc4] ss:$16 sps:$4 sm:$0xff]   ;;  %v7534_v4 = vld [vmem:[%s10638_s1 + $0xbcc] ss:$16 sps:$4 sm:$0xff]  }
 0x13c   :  { %5098 = vmatprep.subr.bf16.mxu0 %v7438_v5  ;;  %5657 = vmatprep.subr.bf16.mxu1 %v7441_v6  ;;  %v7529_v5 = vld [vmem:[%s10638_s1 + $0xbc0] ss:$16 sps:$4 sm:$0xff]   ;;  %v7532_v6 = vld [vmem:[%s10638_s1 + $0xbc8] ss:$16 sps:$4 sm:$0xff]  }
 0x13f   :  { %5099 = vmatpush1.bf16.msra.mxu0 %v7436_v7  ;;  %5658 = vmatpush1.bf16.msra.mxu1 %v7439_v8  ;;  %v7537_v7 = vld [vmem:[%s10638_s1 + $0xbe4] ss:$16 sps:$4 sm:$0xff]   ;;  %v7540_v8 = vld [vmem:[%s10638_s1 + $0xbec] ss:$16 sps:$4 sm:$0xff]  }
 0x140   :  { %5111 = vmatprep.subr.bf16.mxu0 %v7447_v10  ;;  %5670 = vmatprep.subr.bf16.mxu1 %v7450_v11  ;;  %v7538_v10 = vld [vmem:[%s10638_s1 + $0xbe8] ss:$16 sps:$4 sm:$0xff]  }
 0x141   :  { %v7541_v11 = vld [vmem:[%s10639_s0 + $0x28] ss:$100 sps:$4 sm:$0xff]  }
 0x142   :  { %5101 = vmatmul.mubr.bf16.vlgmr.msra.gmra.mrb[0].mxu0 %v7442_v9  ;;  %5660 = vmatmul.mubr.bf16.vlgmr.msra.gmra.mrb[0].mxu1 %v7442_v9  ;;  %v7535_v9 = vld [vmem:[%s10638_s1 + $0xbe0] ss:$16 sps:$4 sm:$0xff]  }
 0x143   :  { %5112 = vmatpush1.bf16.msra.mxu0 %v7445_v12  ;;  %5671 = vmatpush1.bf16.msra.mxu1 %v7448_v13  ;;  %v7546_v12 = vld [vmem:[%s10638_s1 + $0xc04] ss:$16 sps:$4 sm:$0xff]   ;;  %v7549_v13 = vld [vmem:[%s10638_s1 + $0xc0c] ss:$16 sps:$4 sm:$0xff]  }
 0x144   :  { %5113 = vmatprep.subr.bf16.mxu0 %v7453_v14  ;;  %5672 = vmatprep.subr.bf16.mxu1 %v7456_v15  ;;  %v7544_v14 = vld [vmem:[%s10638_s1 + $0xc00] ss:$16 sps:$4 sm:$0xff]   ;;  %v7547_v15 = vld [vmem:[%s10638_s1 + $0xc08] ss:$16 sps:$4 sm:$0xff]  }
 0x145   :  { %5143 = vmatprep.mubr.bf16.mxu0 %v7543_v16  ;;  %5702 = vmatprep.mubr.bf16.mxu1 %v7543_v16  ;;  %v7552_v16 = vld [vmem:[%s10638_s1 + $0xc24] ss:$16 sps:$4 sm:$0xff]  }
 0x147   :  { %5114 = vmatpush1.bf16.msra.mxu0 %v7451_v17  ;;  %5673 = vmatpush1.bf16.msra.mxu1 %v7454_v18  ;;  %v7555_v17 = vld [vmem:[%s10638_s1 + $0xc2c] ss:$16 sps:$4 sm:$0xff]   ;;  %v7642_v18 = vld [vmem:[%s10639_s0 + $0x34] ss:$100 sps:$4 sm:$0xff]  }
 0x148   :  { %5115 = vmatprep.subr.bf16.mxu0 %v7459_v19  ;;  %5674 = vmatprep.subr.bf16.mxu1 %v7462_v20  ;;  %v7550_v19 = vld [vmem:[%s10638_s1 + $0xc20] ss:$16 sps:$4 sm:$0xff]   ;;  %v7553_v20 = vld [vmem:[%s10638_s1 + $0xc28] ss:$16 sps:$4 sm:$0xff]  }
 0x14b   :  { %5116 = vmatpush1.bf16.msra.mxu0 %v7457_v21  ;;  %5675 = vmatpush1.bf16.msra.mxu1 %v7460_v22  ;;  %v7558_v21 = vld [vmem:[%s10638_s1 + $0xc44] ss:$16 sps:$4 sm:$0xff]   ;;  %v7561_v22 = vld [vmem:[%s10638_s1 + $0xc4c] ss:$16 sps:$4 sm:$0xff]  }
 0x14c   :  { %5117 = vmatprep.subr.bf16.mxu0 %v7465_v23  ;;  %5676 = vmatprep.subr.bf16.mxu1 %v7468_v24  ;;  %v7556_v23 = vld [vmem:[%s10638_s1 + $0xc40] ss:$16 sps:$4 sm:$0xff]   ;;  %v7559_v24 = vld [vmem:[%s10638_s1 + $0xc48] ss:$16 sps:$4 sm:$0xff]  }
 0x14f   :  { %5118 = vmatpush1.bf16.msra.mxu0 %v7463_v25  ;;  %5677 = vmatpush1.bf16.msra.mxu1 %v7466_v26  ;;  %v7564_v25 = vld [vmem:[%s10638_s1 + $0xc64] ss:$16 sps:$4 sm:$0xff]   ;;  %v7567_v26 = vld [vmem:[%s10638_s1 + $0xc6c] ss:$16 sps:$4 sm:$0xff]  }
 0x150   :  { %5119 = vmatprep.subr.bf16.mxu0 %v7471_v27  ;;  %5678 = vmatprep.subr.bf16.mxu1 %v7474_v28  ;;  %v7562_v27 = vld [vmem:[%s10638_s1 + $0xc60] ss:$16 sps:$4 sm:$0xff]   ;;  %v7565_v28 = vld [vmem:[%s10638_s1 + $0xc68] ss:$16 sps:$4 sm:$0xff]  }
 0x153   :  { %5120 = vmatpush1.bf16.msra.mxu0 %v7469_v29  ;;  %5679 = vmatpush1.bf16.msra.mxu1 %v7472_v30  ;;  %v7570_v29 = vld [vmem:[%s10638_s1 + $0xc84] ss:$16 sps:$4 sm:$0xff]   ;;  %v7573_v30 = vld [vmem:[%s10638_s1 + $0xc8c] ss:$16 sps:$4 sm:$0xff]  }
 0x154   :  { %5121 = vmatprep.subr.bf16.mxu0 %v7477_v31  ;;  %5680 = vmatprep.subr.bf16.mxu1 %v7480_v32  ;;  %v7568_v31 = vld [vmem:[%s10638_s1 + $0xc80] ss:$16 sps:$4 sm:$0xff]   ;;  %v7571_v32 = vld [vmem:[%s10638_s1 + $0xc88] ss:$16 sps:$4 sm:$0xff]  }
 0x157   :  { %5122 = vmatpush1.bf16.msra.mxu0 %v7475_v33  ;;  %5681 = vmatpush1.bf16.msra.mxu1 %v7478_v34  ;;  %v7576_v33 = vld [vmem:[%s10638_s1 + $0xca4] ss:$16 sps:$4 sm:$0xff]   ;;  %v7579_v34 = vld [vmem:[%s10638_s1 + $0xcac] ss:$16 sps:$4 sm:$0xff]  }
 0x158   :  { %5123 = vmatprep.subr.bf16.mxu0 %v7483_v35  ;;  %5682 = vmatprep.subr.bf16.mxu1 %v7486_v36  ;;  %v7574_v35 = vld [vmem:[%s10638_s1 + $0xca0] ss:$16 sps:$4 sm:$0xff]   ;;  %v7577_v36 = vld [vmem:[%s10638_s1 + $0xca8] ss:$16 sps:$4 sm:$0xff]  }
 0x15b   :  { %5124 = vmatpush1.bf16.msra.mxu0 %v7481_v37  ;;  %5683 = vmatpush1.bf16.msra.mxu1 %v7484_v38  ;;  %v7582_v37 = vld [vmem:[%s10638_s1 + $0xcc4] ss:$16 sps:$4 sm:$0xff]   ;;  %v7585_v38 = vld [vmem:[%s10638_s1 + $0xccc] ss:$16 sps:$4 sm:$0xff]  }
 0x15c   :  { %5125 = vmatprep.subr.bf16.mxu0 %v7489_v39  ;;  %5684 = vmatprep.subr.bf16.mxu1 %v7492_v40  ;;  %v7580_v39 = vld [vmem:[%s10638_s1 + $0xcc0] ss:$16 sps:$4 sm:$0xff]   ;;  %v7583_v40 = vld [vmem:[%s10638_s1 + $0xcc8] ss:$16 sps:$4 sm:$0xff]  }
 0x15f   :  { %5126 = vmatpush1.bf16.msra.mxu0 %v7487_v41  ;;  %5685 = vmatpush1.bf16.msra.mxu1 %v7490_v42  ;;  %v7588_v41 = vld [vmem:[%s10638_s1 + $0xce4] ss:$16 sps:$4 sm:$0xff]   ;;  %v7591_v42 = vld [vmem:[%s10638_s1 + $0xcec] ss:$16 sps:$4 sm:$0xff]  }
 0x160   :  { %5127 = vmatprep.subr.bf16.mxu0 %v7495_v43  ;;  %5686 = vmatprep.subr.bf16.mxu1 %v7498_v44  ;;  %v7586_v43 = vld [vmem:[%s10638_s1 + $0xce0] ss:$16 sps:$4 sm:$0xff]   ;;  %v7589_v44 = vld [vmem:[%s10638_s1 + $0xce8] ss:$16 sps:$4 sm:$0xff]  }
 0x163   :  { %5128 = vmatpush1.bf16.msra.mxu0 %v7493_v45  ;;  %5687 = vmatpush1.bf16.msra.mxu1 %v7496_v46  ;;  %v7594_v45 = vld [vmem:[%s10638_s1 + $0xd04] ss:$16 sps:$4 sm:$0xff]   ;;  %v7597_v46 = vld [vmem:[%s10638_s1 + $0xd0c] ss:$16 sps:$4 sm:$0xff]  }
 0x164   :  { %5129 = vmatprep.subr.bf16.mxu0 %v7501_v47  ;;  %5688 = vmatprep.subr.bf16.mxu1 %v7504_v48  ;;  %v7592_v47 = vld [vmem:[%s10638_s1 + $0xd00] ss:$16 sps:$4 sm:$0xff]   ;;  %v7595_v48 = vld [vmem:[%s10638_s1 + $0xd08] ss:$16 sps:$4 sm:$0xff]  }
 0x167   :  { %5130 = vmatpush1.bf16.msra.mxu0 %v7499_v49  ;;  %5689 = vmatpush1.bf16.msra.mxu1 %v7502_v50  ;;  %v7600_v49 = vld [vmem:[%s10638_s1 + $0xd24] ss:$16 sps:$4 sm:$0xff]   ;;  %v7603_v50 = vld [vmem:[%s10638_s1 + $0xd2c] ss:$16 sps:$4 sm:$0xff]  }
 0x168   :  { %5131 = vmatprep.subr.bf16.mxu0 %v7507_v51  ;;  %5690 = vmatprep.subr.bf16.mxu1 %v7510_v52  ;;  %v7598_v51 = vld [vmem:[%s10638_s1 + $0xd20] ss:$16 sps:$4 sm:$0xff]   ;;  %v7601_v52 = vld [vmem:[%s10638_s1 + $0xd28] ss:$16 sps:$4 sm:$0xff]  }
 0x16b   :  { %5132 = vmatpush1.bf16.msra.mxu0 %v7505_v53  ;;  %5691 = vmatpush1.bf16.msra.mxu1 %v7508_v54  ;;  %v7606_v53 = vld [vmem:[%s10638_s1 + $0xd44] ss:$16 sps:$4 sm:$0xff]   ;;  %v7609_v54 = vld [vmem:[%s10638_s1 + $0xd4c] ss:$16 sps:$4 sm:$0xff]  }
 0x16c   :  { %5133 = vmatprep.subr.bf16.mxu0 %v7513_v55  ;;  %5692 = vmatprep.subr.bf16.mxu1 %v7516_v56  ;;  %v7604_v55 = vld [vmem:[%s10638_s1 + $0xd40] ss:$16 sps:$4 sm:$0xff]   ;;  %v7607_v56 = vld [vmem:[%s10638_s1 + $0xd48] ss:$16 sps:$4 sm:$0xff]  }
 0x16f   :  { %5134 = vmatpush1.bf16.msra.mxu0 %v7511_v57  ;;  %5693 = vmatpush1.bf16.msra.mxu1 %v7514_v58  ;;  %v7612_v57 = vld [vmem:[%s10638_s1 + $0xd64] ss:$16 sps:$4 sm:$0xff]   ;;  %v7615_v58 = vld [vmem:[%s10638_s1 + $0xd6c] ss:$16 sps:$4 sm:$0xff]  }
 0x170   :  { %5135 = vmatprep.subr.bf16.mxu0 %v7519_v59  ;;  %5694 = vmatprep.subr.bf16.mxu1 %v7522_v60  ;;  %v7610_v59 = vld [vmem:[%s10638_s1 + $0xd60] ss:$16 sps:$4 sm:$0xff]   ;;  %v7613_v60 = vld [vmem:[%s10638_s1 + $0xd68] ss:$16 sps:$4 sm:$0xff]  }
 0x173   :  { %5136 = vmatpush1.bf16.msra.mxu0 %v7517_v61  ;;  %5695 = vmatpush1.bf16.msra.mxu1 %v7520_v62  ;;  %v7618_v61 = vld [vmem:[%s10638_s1 + $0xd84] ss:$16 sps:$4 sm:$0xff]   ;;  %v7621_v62 = vld [vmem:[%s10638_s1 + $0xd8c] ss:$16 sps:$4 sm:$0xff]  }
 0x174   :  { %5137 = vmatprep.subr.bf16.mxu0 %v7525_v63  ;;  %5696 = vmatprep.subr.bf16.mxu1 %v7528_v0  ;;  %v7616_v63 = vld [vmem:[%s10638_s1 + $0xd80] ss:$16 sps:$4 sm:$0xff]   ;;  %v7619_v0 = vld [vmem:[%s10638_s1 + $0xd88] ss:$16 sps:$4 sm:$0xff]  }
 0x177   :  { %5138 = vmatpush1.bf16.msra.mxu0 %v7523_v1  ;;  %5697 = vmatpush1.bf16.msra.mxu1 %v7526_v2  ;;  %v7624_v1 = vld [vmem:[%s10638_s1 + $0xda4] ss:$16 sps:$4 sm:$0xff]   ;;  %v7627_v2 = vld [vmem:[%s10638_s1 + $0xdac] ss:$16 sps:$4 sm:$0xff]  }
 0x178   :  { %5139 = vmatprep.subr.bf16.mxu0 %v7531_v3  ;;  %5698 = vmatprep.subr.bf16.mxu1 %v7534_v4  ;;  %v7622_v3 = vld [vmem:[%s10638_s1 + $0xda0] ss:$16 sps:$4 sm:$0xff]   ;;  %v7625_v4 = vld [vmem:[%s10638_s1 + $0xda8] ss:$16 sps:$4 sm:$0xff]  }
 0x17b   :  { %5140 = vmatpush1.bf16.msra.mxu0 %v7529_v5  ;;  %5699 = vmatpush1.bf16.msra.mxu1 %v7532_v6  ;;  %v7630_v5 = vld [vmem:[%s10638_s1 + $0xdc4] ss:$16 sps:$4 sm:$0xff]   ;;  %v7633_v6 = vld [vmem:[%s10638_s1 + $0xdcc] ss:$16 sps:$4 sm:$0xff]  }
 0x17c   :  { %5141 = vmatprep.subr.bf16.mxu0 %v7537_v7  ;;  %5700 = vmatprep.subr.bf16.mxu1 %v7540_v8  ;;  %v7628_v7 = vld [vmem:[%s10638_s1 + $0xdc0] ss:$16 sps:$4 sm:$0xff]   ;;  %v7631_v8 = vld [vmem:[%s10638_s1 + $0xdc8] ss:$16 sps:$4 sm:$0xff]  }
 0x17f   :  { %5142 = vmatpush1.bf16.msra.mxu0 %v7535_v9  ;;  %5701 = vmatpush1.bf16.msra.mxu1 %v7538_v10  ;;  %v7636_v9 = vld [vmem:[%s10638_s1 + $0xde4] ss:$16 sps:$4 sm:$0xff]   ;;  %v7639_v10 = vld [vmem:[%s10638_s1 + $0xdec] ss:$16 sps:$4 sm:$0xff]  }
 0x180   :  { %5154 = vmatprep.subr.bf16.mxu0 %v7546_v12  ;;  %5713 = vmatprep.subr.bf16.mxu1 %v7549_v13  ;;  %v7637_v12 = vld [vmem:[%s10638_s1 + $0xde8] ss:$16 sps:$4 sm:$0xff]   ;;  %v7640_v13 = vld [vmem:[%s10639_s0 + $0x30] ss:$100 sps:$4 sm:$0xff]  }
 0x182   :  { %5144 = vmatmul.mubr.bf16.vlgmr.msra.gmra.mrb[0].mxu0 %v7541_v11  ;;  %5703 = vmatmul.mubr.bf16.vlgmr.msra.gmra.mrb[0].mxu1 %v7541_v11  ;;  %v7634_v11 = vld [vmem:[%s10638_s1 + $0xde0] ss:$16 sps:$4 sm:$0xff]  }
 0x183   :  { %5155 = vmatpush1.bf16.msra.mxu0 %v7544_v14  ;;  %5714 = vmatpush1.bf16.msra.mxu1 %v7547_v15  ;;  %v7645_v14 = vld [vmem:[%s10638_s1 + $0xe04] ss:$16 sps:$4 sm:$0xff]   ;;  %v7648_v15 = vld [vmem:[%s10638_s1 + $0xe0c] ss:$16 sps:$4 sm:$0xff]  }
 0x184   :  { %5156 = vmatprep.subr.bf16.mxu0 %v7552_v16  ;;  %5715 = vmatprep.subr.bf16.mxu1 %v7555_v17  ;;  %v7643_v16 = vld [vmem:[%s10638_s1 + $0xe00] ss:$16 sps:$4 sm:$0xff]   ;;  %v7646_v17 = vld [vmem:[%s10638_s1 + $0xe08] ss:$16 sps:$4 sm:$0xff]  }
 0x185   :  { %5186 = vmatprep.mubr.bf16.mxu0 %v7642_v18  ;;  %5745 = vmatprep.mubr.bf16.mxu1 %v7642_v18  ;;  %v7651_v18 = vld [vmem:[%s10638_s1 + $0xe24] ss:$16 sps:$4 sm:$0xff]  }
 0x187   :  { %5157 = vmatpush1.bf16.msra.mxu0 %v7550_v19  ;;  %5716 = vmatpush1.bf16.msra.mxu1 %v7553_v20  ;;  %v7654_v19 = vld [vmem:[%s10638_s1 + $0xe2c] ss:$16 sps:$4 sm:$0xff]  }
 0x188   :  { %5158 = vmatprep.subr.bf16.mxu0 %v7558_v21  ;;  %5717 = vmatprep.subr.bf16.mxu1 %v7561_v22  ;;  %v7741_v20 = vld [vmem:[%s10639_s0 + $0x3c] ss:$100 sps:$4 sm:$0xff]   ;;  %v7652_v22 = vld [vmem:[%s10638_s1 + $0xe28] ss:$16 sps:$4 sm:$0xff]  }
 0x189   :  { %v7649_v21 = vld [vmem:[%s10638_s1 + $0xe20] ss:$16 sps:$4 sm:$0xff]  }
 0x18b   :  { %5159 = vmatpush1.bf16.msra.mxu0 %v7556_v23  ;;  %5718 = vmatpush1.bf16.msra.mxu1 %v7559_v24  ;;  %v7657_v23 = vld [vmem:[%s10638_s1 + $0xe44] ss:$16 sps:$4 sm:$0xff]   ;;  %v7660_v24 = vld [vmem:[%s10638_s1 + $0xe4c] ss:$16 sps:$4 sm:$0xff]  }
 0x18c   :  { %5160 = vmatprep.subr.bf16.mxu0 %v7564_v25  ;;  %5719 = vmatprep.subr.bf16.mxu1 %v7567_v26  ;;  %v7655_v25 = vld [vmem:[%s10638_s1 + $0xe40] ss:$16 sps:$4 sm:$0xff]   ;;  %v7658_v26 = vld [vmem:[%s10638_s1 + $0xe48] ss:$16 sps:$4 sm:$0xff]  }
 0x18f   :  { %5161 = vmatpush1.bf16.msra.mxu0 %v7562_v27  ;;  %5720 = vmatpush1.bf16.msra.mxu1 %v7565_v28  ;;  %v7663_v27 = vld [vmem:[%s10638_s1 + $0xe64] ss:$16 sps:$4 sm:$0xff]   ;;  %v7666_v28 = vld [vmem:[%s10638_s1 + $0xe6c] ss:$16 sps:$4 sm:$0xff]  }
 0x190   :  { %5162 = vmatprep.subr.bf16.mxu0 %v7570_v29  ;;  %5721 = vmatprep.subr.bf16.mxu1 %v7573_v30  ;;  %v7661_v29 = vld [vmem:[%s10638_s1 + $0xe60] ss:$16 sps:$4 sm:$0xff]   ;;  %v7664_v30 = vld [vmem:[%s10638_s1 + $0xe68] ss:$16 sps:$4 sm:$0xff]  }
 0x193   :  { %5163 = vmatpush1.bf16.msra.mxu0 %v7568_v31  ;;  %5722 = vmatpush1.bf16.msra.mxu1 %v7571_v32  ;;  %v7669_v31 = vld [vmem:[%s10638_s1 + $0xe84] ss:$16 sps:$4 sm:$0xff]   ;;  %v7672_v32 = vld [vmem:[%s10638_s1 + $0xe8c] ss:$16 sps:$4 sm:$0xff]  }
 0x194   :  { %5164 = vmatprep.subr.bf16.mxu0 %v7576_v33  ;;  %5723 = vmatprep.subr.bf16.mxu1 %v7579_v34  ;;  %v7667_v33 = vld [vmem:[%s10638_s1 + $0xe80] ss:$16 sps:$4 sm:$0xff]   ;;  %v7670_v34 = vld [vmem:[%s10638_s1 + $0xe88] ss:$16 sps:$4 sm:$0xff]  }
 0x197   :  { %5165 = vmatpush1.bf16.msra.mxu0 %v7574_v35  ;;  %5724 = vmatpush1.bf16.msra.mxu1 %v7577_v36  ;;  %v7675_v35 = vld [vmem:[%s10638_s1 + $0xea4] ss:$16 sps:$4 sm:$0xff]   ;;  %v7678_v36 = vld [vmem:[%s10638_s1 + $0xeac] ss:$16 sps:$4 sm:$0xff]  }
 0x198   :  { %5166 = vmatprep.subr.bf16.mxu0 %v7582_v37  ;;  %5725 = vmatprep.subr.bf16.mxu1 %v7585_v38  ;;  %v7673_v37 = vld [vmem:[%s10638_s1 + $0xea0] ss:$16 sps:$4 sm:$0xff]   ;;  %v7676_v38 = vld [vmem:[%s10638_s1 + $0xea8] ss:$16 sps:$4 sm:$0xff]  }
 0x19b   :  { %5167 = vmatpush1.bf16.msra.mxu0 %v7580_v39  ;;  %5726 = vmatpush1.bf16.msra.mxu1 %v7583_v40  ;;  %v7681_v39 = vld [vmem:[%s10638_s1 + $0xec4] ss:$16 sps:$4 sm:$0xff]   ;;  %v7684_v40 = vld [vmem:[%s10638_s1 + $0xecc] ss:$16 sps:$4 sm:$0xff]  }
 0x19c   :  { %5168 = vmatprep.subr.bf16.mxu0 %v7588_v41  ;;  %5727 = vmatprep.subr.bf16.mxu1 %v7591_v42  ;;  %v7679_v41 = vld [vmem:[%s10638_s1 + $0xec0] ss:$16 sps:$4 sm:$0xff]   ;;  %v7682_v42 = vld [vmem:[%s10638_s1 + $0xec8] ss:$16 sps:$4 sm:$0xff]  }
 0x19f   :  { %5169 = vmatpush1.bf16.msra.mxu0 %v7586_v43  ;;  %5728 = vmatpush1.bf16.msra.mxu1 %v7589_v44  ;;  %v7687_v43 = vld [vmem:[%s10638_s1 + $0xee4] ss:$16 sps:$4 sm:$0xff]   ;;  %v7690_v44 = vld [vmem:[%s10638_s1 + $0xeec] ss:$16 sps:$4 sm:$0xff]  }
 0x1a0   :  { %5170 = vmatprep.subr.bf16.mxu0 %v7594_v45  ;;  %5729 = vmatprep.subr.bf16.mxu1 %v7597_v46  ;;  %v7685_v45 = vld [vmem:[%s10638_s1 + $0xee0] ss:$16 sps:$4 sm:$0xff]   ;;  %v7688_v46 = vld [vmem:[%s10638_s1 + $0xee8] ss:$16 sps:$4 sm:$0xff]  }
 0x1a3   :  { %5171 = vmatpush1.bf16.msra.mxu0 %v7592_v47  ;;  %5730 = vmatpush1.bf16.msra.mxu1 %v7595_v48  ;;  %v7693_v47 = vld [vmem:[%s10638_s1 + $0xf04] ss:$16 sps:$4 sm:$0xff]   ;;  %v7696_v48 = vld [vmem:[%s10638_s1 + $0xf0c] ss:$16 sps:$4 sm:$0xff]  }
 0x1a4   :  { %5172 = vmatprep.subr.bf16.mxu0 %v7600_v49  ;;  %5731 = vmatprep.subr.bf16.mxu1 %v7603_v50  ;;  %v7691_v49 = vld [vmem:[%s10638_s1 + $0xf00] ss:$16 sps:$4 sm:$0xff]   ;;  %v7694_v50 = vld [vmem:[%s10638_s1 + $0xf08] ss:$16 sps:$4 sm:$0xff]  }
 0x1a7   :  { %5173 = vmatpush1.bf16.msra.mxu0 %v7598_v51  ;;  %5732 = vmatpush1.bf16.msra.mxu1 %v7601_v52  ;;  %v7699_v51 = vld [vmem:[%s10638_s1 + $0xf24] ss:$16 sps:$4 sm:$0xff]   ;;  %v7702_v52 = vld [vmem:[%s10638_s1 + $0xf2c] ss:$16 sps:$4 sm:$0xff]  }
 0x1a8   :  { %5174 = vmatprep.subr.bf16.mxu0 %v7606_v53  ;;  %5733 = vmatprep.subr.bf16.mxu1 %v7609_v54  ;;  %v7697_v53 = vld [vmem:[%s10638_s1 + $0xf20] ss:$16 sps:$4 sm:$0xff]   ;;  %v7700_v54 = vld [vmem:[%s10638_s1 + $0xf28] ss:$16 sps:$4 sm:$0xff]  }
 0x1ab   :  { %5175 = vmatpush1.bf16.msra.mxu0 %v7604_v55  ;;  %5734 = vmatpush1.bf16.msra.mxu1 %v7607_v56  ;;  %v7705_v55 = vld [vmem:[%s10638_s1 + $0xf44] ss:$16 sps:$4 sm:$0xff]   ;;  %v7708_v56 = vld [vmem:[%s10638_s1 + $0xf4c] ss:$16 sps:$4 sm:$0xff]  }
 0x1ac   :  { %5176 = vmatprep.subr.bf16.mxu0 %v7612_v57  ;;  %5735 = vmatprep.subr.bf16.mxu1 %v7615_v58  ;;  %v7703_v57 = vld [vmem:[%s10638_s1 + $0xf40] ss:$16 sps:$4 sm:$0xff]   ;;  %v7706_v58 = vld [vmem:[%s10638_s1 + $0xf48] ss:$16 sps:$4 sm:$0xff]  }
 0x1af   :  { %5177 = vmatpush1.bf16.msra.mxu0 %v7610_v59  ;;  %5736 = vmatpush1.bf16.msra.mxu1 %v7613_v60  ;;  %v7711_v59 = vld [vmem:[%s10638_s1 + $0xf64] ss:$16 sps:$4 sm:$0xff]   ;;  %v7714_v60 = vld [vmem:[%s10638_s1 + $0xf6c] ss:$16 sps:$4 sm:$0xff]  }
 0x1b0   :  { %5178 = vmatprep.subr.bf16.mxu0 %v7618_v61  ;;  %5737 = vmatprep.subr.bf16.mxu1 %v7621_v62  ;;  %v7709_v61 = vld [vmem:[%s10638_s1 + $0xf60] ss:$16 sps:$4 sm:$0xff]   ;;  %v7712_v62 = vld [vmem:[%s10638_s1 + $0xf68] ss:$16 sps:$4 sm:$0xff]  }
 0x1b3   :  { %5179 = vmatpush1.bf16.msra.mxu0 %v7616_v63  ;;  %5738 = vmatpush1.bf16.msra.mxu1 %v7619_v0  ;;  %v7717_v63 = vld [vmem:[%s10638_s1 + $0xf84] ss:$16 sps:$4 sm:$0xff]   ;;  %v7720_v0 = vld [vmem:[%s10638_s1 + $0xf8c] ss:$16 sps:$4 sm:$0xff]  }
 0x1b4   :  { %5180 = vmatprep.subr.bf16.mxu0 %v7624_v1  ;;  %5739 = vmatprep.subr.bf16.mxu1 %v7627_v2  ;;  %v7715_v1 = vld [vmem:[%s10638_s1 + $0xf80] ss:$16 sps:$4 sm:$0xff]   ;;  %v7718_v2 = vld [vmem:[%s10638_s1 + $0xf88] ss:$16 sps:$4 sm:$0xff]  }
 0x1b7   :  { %5181 = vmatpush1.bf16.msra.mxu0 %v7622_v3  ;;  %5740 = vmatpush1.bf16.msra.mxu1 %v7625_v4  ;;  %v7723_v3 = vld [vmem:[%s10638_s1 + $0xfa4] ss:$16 sps:$4 sm:$0xff]   ;;  %v7726_v4 = vld [vmem:[%s10638_s1 + $0xfac] ss:$16 sps:$4 sm:$0xff]  }
 0x1b8   :  { %5182 = vmatprep.subr.bf16.mxu0 %v7630_v5  ;;  %5741 = vmatprep.subr.bf16.mxu1 %v7633_v6  ;;  %v7721_v5 = vld [vmem:[%s10638_s1 + $0xfa0] ss:$16 sps:$4 sm:$0xff]   ;;  %v7724_v6 = vld [vmem:[%s10638_s1 + $0xfa8] ss:$16 sps:$4 sm:$0xff]  }
 0x1bb   :  { %5183 = vmatpush1.bf16.msra.mxu0 %v7628_v7  ;;  %5742 = vmatpush1.bf16.msra.mxu1 %v7631_v8  ;;  %v7729_v7 = vld [vmem:[%s10638_s1 + $0xfc4] ss:$16 sps:$4 sm:$0xff]   ;;  %v7732_v8 = vld [vmem:[%s10638_s1 + $0xfcc] ss:$16 sps:$4 sm:$0xff]  }
 0x1bc   :  { %5184 = vmatprep.subr.bf16.mxu0 %v7636_v9  ;;  %5743 = vmatprep.subr.bf16.mxu1 %v7639_v10  ;;  %v7727_v9 = vld [vmem:[%s10638_s1 + $0xfc0] ss:$16 sps:$4 sm:$0xff]   ;;  %v7730_v10 = vld [vmem:[%s10638_s1 + $0xfc8] ss:$16 sps:$4 sm:$0xff]  }
 0x1bf   :  { %5185 = vmatpush1.bf16.msra.mxu0 %v7634_v11  ;;  %5744 = vmatpush1.bf16.msra.mxu1 %v7637_v12  ;;  %v7735_v11 = vld [vmem:[%s10638_s1 + $0xfe4] ss:$16 sps:$4 sm:$0xff]   ;;  %v7738_v12 = vld [vmem:[%s10638_s1 + $0xfec] ss:$16 sps:$4 sm:$0xff]  }
 0x1c0   :  { %5197 = vmatprep.subr.bf16.mxu0 %v7645_v14  ;;  %5756 = vmatprep.subr.bf16.mxu1 %v7648_v15  ;;  %v7736_v14 = vld [vmem:[%s10638_s1 + $0xfe8] ss:$16 sps:$4 sm:$0xff]   ;;  %v7744_v15 = vld [vmem:[%s10638_s1 + $0x1004] ss:$16 sps:$4 sm:$0xff]  }
 0x1c2   :  { %5187 = vmatmul.mubr.bf16.vlgmr.msra.gmra.mrb[0].mxu0 %v7640_v13  ;;  %5746 = vmatmul.mubr.bf16.vlgmr.msra.gmra.mrb[0].mxu1 %v7640_v13  ;;  %v7733_v13 = vld [vmem:[%s10638_s1 + $0xfe0] ss:$16 sps:$4 sm:$0xff]  }
 0x1c3   :  { %5198 = vmatpush1.bf16.msra.mxu0 %v7643_v16  ;;  %5757 = vmatpush1.bf16.msra.mxu1 %v7646_v17  ;;  %v7747_v16 = vld [vmem:[%s10638_s1 + $0x100c] ss:$16 sps:$4 sm:$0xff]  }
 0x1c4   :  { %5199 = vmatprep.subr.bf16.mxu0 %v7651_v18  ;;  %5758 = vmatprep.subr.bf16.mxu1 %v7654_v19  ;;  %v7739_v17 = vld [vmem:[%s10639_s0 + $0x38] ss:$100 sps:$4 sm:$0xff]   ;;  %v7742_v18 = vld [vmem:[%s10638_s1 + $0x1000] ss:$16 sps:$4 sm:$0xff]  }
 0x1c5   :  { %5229 = vmatprep.mubr.bf16.mxu0 %v7741_v20  ;;  %5788 = vmatprep.mubr.bf16.mxu1 %v7741_v20  ;;  %v7745_v19 = vld [vmem:[%s10638_s1 + $0x1008] ss:$16 sps:$4 sm:$0xff]   ;;  %v7750_v20 = vld [vmem:[%s10638_s1 + $0x1024] ss:$16 sps:$4 sm:$0xff]  }
 0x1c7   :  { %5200 = vmatpush1.bf16.msra.mxu0 %v7649_v21  ;;  %5759 = vmatpush1.bf16.msra.mxu1 %v7652_v22  ;;  %v7753_v21 = vld [vmem:[%s10638_s1 + $0x102c] ss:$16 sps:$4 sm:$0xff]   ;;  %v7840_v22 = vld [vmem:[%s10639_s0 + $0x44] ss:$100 sps:$4 sm:$0xff]  }
 0x1c8   :  { %5201 = vmatprep.subr.bf16.mxu0 %v7657_v23  ;;  %5760 = vmatprep.subr.bf16.mxu1 %v7660_v24  ;;  %v7748_v23 = vld [vmem:[%s10638_s1 + $0x1020] ss:$16 sps:$4 sm:$0xff]   ;;  %v7751_v24 = vld [vmem:[%s10638_s1 + $0x1028] ss:$16 sps:$4 sm:$0xff]  }
 0x1cb   :  { %5202 = vmatpush1.bf16.msra.mxu0 %v7655_v25  ;;  %5761 = vmatpush1.bf16.msra.mxu1 %v7658_v26  ;;  %v7756_v25 = vld [vmem:[%s10638_s1 + $0x1044] ss:$16 sps:$4 sm:$0xff]   ;;  %v7759_v26 = vld [vmem:[%s10638_s1 + $0x104c] ss:$16 sps:$4 sm:$0xff]  }
 0x1cc   :  { %5203 = vmatprep.subr.bf16.mxu0 %v7663_v27  ;;  %5762 = vmatprep.subr.bf16.mxu1 %v7666_v28  ;;  %v7754_v27 = vld [vmem:[%s10638_s1 + $0x1040] ss:$16 sps:$4 sm:$0xff]   ;;  %v7757_v28 = vld [vmem:[%s10638_s1 + $0x1048] ss:$16 sps:$4 sm:$0xff]  }
 0x1cf   :  { %5204 = vmatpush1.bf16.msra.mxu0 %v7661_v29  ;;  %5763 = vmatpush1.bf16.msra.mxu1 %v7664_v30  ;;  %v7762_v29 = vld [vmem:[%s10638_s1 + $0x1064] ss:$16 sps:$4 sm:$0xff]   ;;  %v7765_v30 = vld [vmem:[%s10638_s1 + $0x106c] ss:$16 sps:$4 sm:$0xff]  }
 0x1d0   :  { %5205 = vmatprep.subr.bf16.mxu0 %v7669_v31  ;;  %5764 = vmatprep.subr.bf16.mxu1 %v7672_v32  ;;  %v7760_v31 = vld [vmem:[%s10638_s1 + $0x1060] ss:$16 sps:$4 sm:$0xff]   ;;  %v7763_v32 = vld [vmem:[%s10638_s1 + $0x1068] ss:$16 sps:$4 sm:$0xff]  }
 0x1d3   :  { %5206 = vmatpush1.bf16.msra.mxu0 %v7667_v33  ;;  %5765 = vmatpush1.bf16.msra.mxu1 %v7670_v34  ;;  %v7768_v33 = vld [vmem:[%s10638_s1 + $0x1084] ss:$16 sps:$4 sm:$0xff]   ;;  %v7771_v34 = vld [vmem:[%s10638_s1 + $0x108c] ss:$16 sps:$4 sm:$0xff]  }
 0x1d4   :  { %5207 = vmatprep.subr.bf16.mxu0 %v7675_v35  ;;  %5766 = vmatprep.subr.bf16.mxu1 %v7678_v36  ;;  %v7766_v35 = vld [vmem:[%s10638_s1 + $0x1080] ss:$16 sps:$4 sm:$0xff]   ;;  %v7769_v36 = vld [vmem:[%s10638_s1 + $0x1088] ss:$16 sps:$4 sm:$0xff]  }
 0x1d7   :  { %5208 = vmatpush1.bf16.msra.mxu0 %v7673_v37  ;;  %5767 = vmatpush1.bf16.msra.mxu1 %v7676_v38  ;;  %v7774_v37 = vld [vmem:[%s10638_s1 + $0x10a4] ss:$16 sps:$4 sm:$0xff]   ;;  %v7777_v38 = vld [vmem:[%s10638_s1 + $0x10ac] ss:$16 sps:$4 sm:$0xff]  }
 0x1d8   :  { %5209 = vmatprep.subr.bf16.mxu0 %v7681_v39  ;;  %5768 = vmatprep.subr.bf16.mxu1 %v7684_v40  ;;  %v7772_v39 = vld [vmem:[%s10638_s1 + $0x10a0] ss:$16 sps:$4 sm:$0xff]   ;;  %v7775_v40 = vld [vmem:[%s10638_s1 + $0x10a8] ss:$16 sps:$4 sm:$0xff]  }
 0x1db   :  { %5210 = vmatpush1.bf16.msra.mxu0 %v7679_v41  ;;  %5769 = vmatpush1.bf16.msra.mxu1 %v7682_v42  ;;  %v7780_v41 = vld [vmem:[%s10638_s1 + $0x10c4] ss:$16 sps:$4 sm:$0xff]   ;;  %v7783_v42 = vld [vmem:[%s10638_s1 + $0x10cc] ss:$16 sps:$4 sm:$0xff]  }
 0x1dc   :  { %5211 = vmatprep.subr.bf16.mxu0 %v7687_v43  ;;  %5770 = vmatprep.subr.bf16.mxu1 %v7690_v44  ;;  %v7778_v43 = vld [vmem:[%s10638_s1 + $0x10c0] ss:$16 sps:$4 sm:$0xff]   ;;  %v7781_v44 = vld [vmem:[%s10638_s1 + $0x10c8] ss:$16 sps:$4 sm:$0xff]  }
 0x1df   :  { %5212 = vmatpush1.bf16.msra.mxu0 %v7685_v45  ;;  %5771 = vmatpush1.bf16.msra.mxu1 %v7688_v46  ;;  %v7786_v45 = vld [vmem:[%s10638_s1 + $0x10e4] ss:$16 sps:$4 sm:$0xff]   ;;  %v7789_v46 = vld [vmem:[%s10638_s1 + $0x10ec] ss:$16 sps:$4 sm:$0xff]  }
 0x1e0   :  { %5213 = vmatprep.subr.bf16.mxu0 %v7693_v47  ;;  %5772 = vmatprep.subr.bf16.mxu1 %v7696_v48  ;;  %v7784_v47 = vld [vmem:[%s10638_s1 + $0x10e0] ss:$16 sps:$4 sm:$0xff]   ;;  %v7787_v48 = vld [vmem:[%s10638_s1 + $0x10e8] ss:$16 sps:$4 sm:$0xff]  }
 0x1e3   :  { %5214 = vmatpush1.bf16.msra.mxu0 %v7691_v49  ;;  %5773 = vmatpush1.bf16.msra.mxu1 %v7694_v50  ;;  %v7792_v49 = vld [vmem:[%s10638_s1 + $0x1104] ss:$16 sps:$4 sm:$0xff]   ;;  %v7795_v50 = vld [vmem:[%s10638_s1 + $0x110c] ss:$16 sps:$4 sm:$0xff]  }
 0x1e4   :  { %5215 = vmatprep.subr.bf16.mxu0 %v7699_v51  ;;  %5774 = vmatprep.subr.bf16.mxu1 %v7702_v52  ;;  %v7790_v51 = vld [vmem:[%s10638_s1 + $0x1100] ss:$16 sps:$4 sm:$0xff]   ;;  %v7793_v52 = vld [vmem:[%s10638_s1 + $0x1108] ss:$16 sps:$4 sm:$0xff]  }
 0x1e7   :  { %5216 = vmatpush1.bf16.msra.mxu0 %v7697_v53  ;;  %5775 = vmatpush1.bf16.msra.mxu1 %v7700_v54  ;;  %v7798_v53 = vld [vmem:[%s10638_s1 + $0x1124] ss:$16 sps:$4 sm:$0xff]   ;;  %v7801_v54 = vld [vmem:[%s10638_s1 + $0x112c] ss:$16 sps:$4 sm:$0xff]  }
 0x1e8   :  { %5217 = vmatprep.subr.bf16.mxu0 %v7705_v55  ;;  %5776 = vmatprep.subr.bf16.mxu1 %v7708_v56  ;;  %v7796_v55 = vld [vmem:[%s10638_s1 + $0x1120] ss:$16 sps:$4 sm:$0xff]   ;;  %v7799_v56 = vld [vmem:[%s10638_s1 + $0x1128] ss:$16 sps:$4 sm:$0xff]  }
 0x1eb   :  { %5218 = vmatpush1.bf16.msra.mxu0 %v7703_v57  ;;  %5777 = vmatpush1.bf16.msra.mxu1 %v7706_v58  ;;  %v7804_v57 = vld [vmem:[%s10638_s1 + $0x1144] ss:$16 sps:$4 sm:$0xff]   ;;  %v7807_v58 = vld [vmem:[%s10638_s1 + $0x114c] ss:$16 sps:$4 sm:$0xff]  }
 0x1ec   :  { %5219 = vmatprep.subr.bf16.mxu0 %v7711_v59  ;;  %5778 = vmatprep.subr.bf16.mxu1 %v7714_v60  ;;  %v7802_v59 = vld [vmem:[%s10638_s1 + $0x1140] ss:$16 sps:$4 sm:$0xff]   ;;  %v7805_v60 = vld [vmem:[%s10638_s1 + $0x1148] ss:$16 sps:$4 sm:$0xff]  }
 0x1ef   :  { %5220 = vmatpush1.bf16.msra.mxu0 %v7709_v61  ;;  %5779 = vmatpush1.bf16.msra.mxu1 %v7712_v62  ;;  %v7810_v61 = vld [vmem:[%s10638_s1 + $0x1164] ss:$16 sps:$4 sm:$0xff]   ;;  %v7813_v62 = vld [vmem:[%s10638_s1 + $0x116c] ss:$16 sps:$4 sm:$0xff]  }
 0x1f0   :  { %5221 = vmatprep.subr.bf16.mxu0 %v7717_v63  ;;  %5780 = vmatprep.subr.bf16.mxu1 %v7720_v0  ;;  %v7808_v63 = vld [vmem:[%s10638_s1 + $0x1160] ss:$16 sps:$4 sm:$0xff]   ;;  %v7811_v0 = vld [vmem:[%s10638_s1 + $0x1168] ss:$16 sps:$4 sm:$0xff]  }
 0x1f3   :  { %5222 = vmatpush1.bf16.msra.mxu0 %v7715_v1  ;;  %5781 = vmatpush1.bf16.msra.mxu1 %v7718_v2  ;;  %v7816_v1 = vld [vmem:[%s10638_s1 + $0x1184] ss:$16 sps:$4 sm:$0xff]   ;;  %v7819_v2 = vld [vmem:[%s10638_s1 + $0x118c] ss:$16 sps:$4 sm:$0xff]  }
 0x1f4   :  { %5223 = vmatprep.subr.bf16.mxu0 %v7723_v3  ;;  %5782 = vmatprep.subr.bf16.mxu1 %v7726_v4  ;;  %v7814_v3 = vld [vmem:[%s10638_s1 + $0x1180] ss:$16 sps:$4 sm:$0xff]   ;;  %v7817_v4 = vld [vmem:[%s10638_s1 + $0x1188] ss:$16 sps:$4 sm:$0xff]  }
 0x1f7   :  { %5224 = vmatpush1.bf16.msra.mxu0 %v7721_v5  ;;  %5783 = vmatpush1.bf16.msra.mxu1 %v7724_v6  ;;  %v7822_v5 = vld [vmem:[%s10638_s1 + $0x11a4] ss:$16 sps:$4 sm:$0xff]   ;;  %v7825_v6 = vld [vmem:[%s10638_s1 + $0x11ac] ss:$16 sps:$4 sm:$0xff]  }
 0x1f8   :  { %5225 = vmatprep.subr.bf16.mxu0 %v7729_v7  ;;  %5784 = vmatprep.subr.bf16.mxu1 %v7732_v8  ;;  %v7820_v7 = vld [vmem:[%s10638_s1 + $0x11a0] ss:$16 sps:$4 sm:$0xff]   ;;  %v7823_v8 = vld [vmem:[%s10638_s1 + $0x11a8] ss:$16 sps:$4 sm:$0xff]  }
 0x1fb   :  { %5226 = vmatpush1.bf16.msra.mxu0 %v7727_v9  ;;  %5785 = vmatpush1.bf16.msra.mxu1 %v7730_v10  ;;  %v7828_v9 = vld [vmem:[%s10638_s1 + $0x11c4] ss:$16 sps:$4 sm:$0xff]   ;;  %v7831_v10 = vld [vmem:[%s10638_s1 + $0x11cc] ss:$16 sps:$4 sm:$0xff]  }
 0x1fc   :  { %5227 = vmatprep.subr.bf16.mxu0 %v7735_v11  ;;  %5786 = vmatprep.subr.bf16.mxu1 %v7738_v12  ;;  %v7826_v11 = vld [vmem:[%s10638_s1 + $0x11c0] ss:$16 sps:$4 sm:$0xff]   ;;  %v7829_v12 = vld [vmem:[%s10638_s1 + $0x11c8] ss:$16 sps:$4 sm:$0xff]  }
 0x1ff   :  { %5228 = vmatpush1.bf16.msra.mxu0 %v7733_v13  ;;  %5787 = vmatpush1.bf16.msra.mxu1 %v7736_v14  ;;  %v7834_v13 = vld [vmem:[%s10638_s1 + $0x11e4] ss:$16 sps:$4 sm:$0xff]   ;;  %v7837_v14 = vld [vmem:[%s10638_s1 + $0x11ec] ss:$16 sps:$4 sm:$0xff]  }
 0x200   :  { %5240 = vmatprep.subr.bf16.mxu0 %v7744_v15  ;;  %5799 = vmatprep.subr.bf16.mxu1 %v7747_v16  ;;  %v7832_v15 = vld [vmem:[%s10638_s1 + $0x11e0] ss:$16 sps:$4 sm:$0xff]   ;;  %v7835_v16 = vld [vmem:[%s10638_s1 + $0x11e8] ss:$16 sps:$4 sm:$0xff]  }
 0x202   :  { %5230 = vmatmul.mubr.bf16.vlgmr.msra.gmra.mrb[0].mxu0 %v7739_v17  ;;  %5789 = vmatmul.mubr.bf16.vlgmr.msra.gmra.mrb[0].mxu1 %v7739_v17  ;;  %v7843_v17 = vld [vmem:[%s10638_s1 + $0x1204] ss:$16 sps:$4 sm:$0xff]  }
 0x203   :  { %5241 = vmatpush1.bf16.msra.mxu0 %v7742_v18  ;;  %5800 = vmatpush1.bf16.msra.mxu1 %v7745_v19  ;;  %v7846_v18 = vld [vmem:[%s10638_s1 + $0x120c] ss:$16 sps:$4 sm:$0xff]   ;;  %v7838_v19 = vld [vmem:[%s10639_s0 + $0x40] ss:$100 sps:$4 sm:$0xff]  }
 0x204   :  { %5242 = vmatprep.subr.bf16.mxu0 %v7750_v20  ;;  %5801 = vmatprep.subr.bf16.mxu1 %v7753_v21  ;;  %v7841_v20 = vld [vmem:[%s10638_s1 + $0x1200] ss:$16 sps:$4 sm:$0xff]   ;;  %v7844_v21 = vld [vmem:[%s10638_s1 + $0x1208] ss:$16 sps:$4 sm:$0xff]  }
 0x205   :  { %5272 = vmatprep.mubr.bf16.mxu0 %v7840_v22  ;;  %5831 = vmatprep.mubr.bf16.mxu1 %v7840_v22  ;;  %v7849_v22 = vld [vmem:[%s10638_s1 + $0x1224] ss:$16 sps:$4 sm:$0xff]  }
 0x207   :  { %5243 = vmatpush1.bf16.msra.mxu0 %v7748_v23  ;;  %5802 = vmatpush1.bf16.msra.mxu1 %v7751_v24  ;;  %v7852_v23 = vld [vmem:[%s10638_s1 + $0x122c] ss:$16 sps:$4 sm:$0xff]  }
 0x208   :  { %5244 = vmatprep.subr.bf16.mxu0 %v7756_v25  ;;  %5803 = vmatprep.subr.bf16.mxu1 %v7759_v26  ;;  %v7939_v24 = vld [vmem:[%s10639_s0 + $0x4c] ss:$100 sps:$4 sm:$0xff]   ;;  %v7850_v26 = vld [vmem:[%s10638_s1 + $0x1228] ss:$16 sps:$4 sm:$0xff]  }
 0x209   :  { %v7847_v25 = vld [vmem:[%s10638_s1 + $0x1220] ss:$16 sps:$4 sm:$0xff]  }
 0x20b   :  { %5245 = vmatpush1.bf16.msra.mxu0 %v7754_v27  ;;  %5804 = vmatpush1.bf16.msra.mxu1 %v7757_v28  ;;  %v7855_v27 = vld [vmem:[%s10638_s1 + $0x1244] ss:$16 sps:$4 sm:$0xff]   ;;  %v7858_v28 = vld [vmem:[%s10638_s1 + $0x124c] ss:$16 sps:$4 sm:$0xff]  }
 0x20c   :  { %5246 = vmatprep.subr.bf16.mxu0 %v7762_v29  ;;  %5805 = vmatprep.subr.bf16.mxu1 %v7765_v30  ;;  %v7853_v29 = vld [vmem:[%s10638_s1 + $0x1240] ss:$16 sps:$4 sm:$0xff]   ;;  %v7856_v30 = vld [vmem:[%s10638_s1 + $0x1248] ss:$16 sps:$4 sm:$0xff]  }
 0x20f   :  { %5247 = vmatpush1.bf16.msra.mxu0 %v7760_v31  ;;  %5806 = vmatpush1.bf16.msra.mxu1 %v7763_v32  ;;  %v7861_v31 = vld [vmem:[%s10638_s1 + $0x1264] ss:$16 sps:$4 sm:$0xff]   ;;  %v7864_v32 = vld [vmem:[%s10638_s1 + $0x126c] ss:$16 sps:$4 sm:$0xff]  }
 0x210   :  { %5248 = vmatprep.subr.bf16.mxu0 %v7768_v33  ;;  %5807 = vmatprep.subr.bf16.mxu1 %v7771_v34  ;;  %v7859_v33 = vld [vmem:[%s10638_s1 + $0x1260] ss:$16 sps:$4 sm:$0xff]   ;;  %v7862_v34 = vld [vmem:[%s10638_s1 + $0x1268] ss:$16 sps:$4 sm:$0xff]  }
 0x213   :  { %5249 = vmatpush1.bf16.msra.mxu0 %v7766_v35  ;;  %5808 = vmatpush1.bf16.msra.mxu1 %v7769_v36  ;;  %v7867_v35 = vld [vmem:[%s10638_s1 + $0x1284] ss:$16 sps:$4 sm:$0xff]   ;;  %v7870_v36 = vld [vmem:[%s10638_s1 + $0x128c] ss:$16 sps:$4 sm:$0xff]  }
 0x214   :  { %5250 = vmatprep.subr.bf16.mxu0 %v7774_v37  ;;  %5809 = vmatprep.subr.bf16.mxu1 %v7777_v38  ;;  %v7865_v37 = vld [vmem:[%s10638_s1 + $0x1280] ss:$16 sps:$4 sm:$0xff]   ;;  %v7868_v38 = vld [vmem:[%s10638_s1 + $0x1288] ss:$16 sps:$4 sm:$0xff]  }
 0x217   :  { %5251 = vmatpush1.bf16.msra.mxu0 %v7772_v39  ;;  %5810 = vmatpush1.bf16.msra.mxu1 %v7775_v40  ;;  %v7873_v39 = vld [vmem:[%s10638_s1 + $0x12a4] ss:$16 sps:$4 sm:$0xff]   ;;  %v7876_v40 = vld [vmem:[%s10638_s1 + $0x12ac] ss:$16 sps:$4 sm:$0xff]  }
 0x218   :  { %5252 = vmatprep.subr.bf16.mxu0 %v7780_v41  ;;  %5811 = vmatprep.subr.bf16.mxu1 %v7783_v42  ;;  %v7871_v41 = vld [vmem:[%s10638_s1 + $0x12a0] ss:$16 sps:$4 sm:$0xff]   ;;  %v7874_v42 = vld [vmem:[%s10638_s1 + $0x12a8] ss:$16 sps:$4 sm:$0xff]  }
 0x21b   :  { %5253 = vmatpush1.bf16.msra.mxu0 %v7778_v43  ;;  %5812 = vmatpush1.bf16.msra.mxu1 %v7781_v44  ;;  %v7879_v43 = vld [vmem:[%s10638_s1 + $0x12c4] ss:$16 sps:$4 sm:$0xff]   ;;  %v7882_v44 = vld [vmem:[%s10638_s1 + $0x12cc] ss:$16 sps:$4 sm:$0xff]  }
 0x21c   :  { %5254 = vmatprep.subr.bf16.mxu0 %v7786_v45  ;;  %5813 = vmatprep.subr.bf16.mxu1 %v7789_v46  ;;  %v7877_v45 = vld [vmem:[%s10638_s1 + $0x12c0] ss:$16 sps:$4 sm:$0xff]   ;;  %v7880_v46 = vld [vmem:[%s10638_s1 + $0x12c8] ss:$16 sps:$4 sm:$0xff]  }
 0x21f   :  { %5255 = vmatpush1.bf16.msra.mxu0 %v7784_v47  ;;  %5814 = vmatpush1.bf16.msra.mxu1 %v7787_v48  ;;  %v7885_v47 = vld [vmem:[%s10638_s1 + $0x12e4] ss:$16 sps:$4 sm:$0xff]   ;;  %v7888_v48 = vld [vmem:[%s10638_s1 + $0x12ec] ss:$16 sps:$4 sm:$0xff]  }
 0x220   :  { %5256 = vmatprep.subr.bf16.mxu0 %v7792_v49  ;;  %5815 = vmatprep.subr.bf16.mxu1 %v7795_v50  ;;  %v7883_v49 = vld [vmem:[%s10638_s1 + $0x12e0] ss:$16 sps:$4 sm:$0xff]   ;;  %v7886_v50 = vld [vmem:[%s10638_s1 + $0x12e8] ss:$16 sps:$4 sm:$0xff]  }
 0x223   :  { %5257 = vmatpush1.bf16.msra.mxu0 %v7790_v51  ;;  %5816 = vmatpush1.bf16.msra.mxu1 %v7793_v52  ;;  %v7891_v51 = vld [vmem:[%s10638_s1 + $0x1304] ss:$16 sps:$4 sm:$0xff]   ;;  %v7894_v52 = vld [vmem:[%s10638_s1 + $0x130c] ss:$16 sps:$4 sm:$0xff]  }
 0x224   :  { %5258 = vmatprep.subr.bf16.mxu0 %v7798_v53  ;;  %5817 = vmatprep.subr.bf16.mxu1 %v7801_v54  ;;  %v7889_v53 = vld [vmem:[%s10638_s1 + $0x1300] ss:$16 sps:$4 sm:$0xff]   ;;  %v7892_v54 = vld [vmem:[%s10638_s1 + $0x1308] ss:$16 sps:$4 sm:$0xff]  }
 0x227   :  { %5259 = vmatpush1.bf16.msra.mxu0 %v7796_v55  ;;  %5818 = vmatpush1.bf16.msra.mxu1 %v7799_v56  ;;  %v7897_v55 = vld [vmem:[%s10638_s1 + $0x1324] ss:$16 sps:$4 sm:$0xff]   ;;  %v7900_v56 = vld [vmem:[%s10638_s1 + $0x132c] ss:$16 sps:$4 sm:$0xff]  }
 0x228   :  { %5260 = vmatprep.subr.bf16.mxu0 %v7804_v57  ;;  %5819 = vmatprep.subr.bf16.mxu1 %v7807_v58  ;;  %v7895_v57 = vld [vmem:[%s10638_s1 + $0x1320] ss:$16 sps:$4 sm:$0xff]   ;;  %v7898_v58 = vld [vmem:[%s10638_s1 + $0x1328] ss:$16 sps:$4 sm:$0xff]  }
 0x22b   :  { %5261 = vmatpush1.bf16.msra.mxu0 %v7802_v59  ;;  %5820 = vmatpush1.bf16.msra.mxu1 %v7805_v60  ;;  %v7903_v59 = vld [vmem:[%s10638_s1 + $0x1344] ss:$16 sps:$4 sm:$0xff]   ;;  %v7906_v60 = vld [vmem:[%s10638_s1 + $0x134c] ss:$16 sps:$4 sm:$0xff]  }
 0x22c   :  { %5262 = vmatprep.subr.bf16.mxu0 %v7810_v61  ;;  %5821 = vmatprep.subr.bf16.mxu1 %v7813_v62  ;;  %v7901_v61 = vld [vmem:[%s10638_s1 + $0x1340] ss:$16 sps:$4 sm:$0xff]   ;;  %v7904_v62 = vld [vmem:[%s10638_s1 + $0x1348] ss:$16 sps:$4 sm:$0xff]  }
 0x22f   :  { %5263 = vmatpush1.bf16.msra.mxu0 %v7808_v63  ;;  %5822 = vmatpush1.bf16.msra.mxu1 %v7811_v0  ;;  %v7909_v63 = vld [vmem:[%s10638_s1 + $0x1364] ss:$16 sps:$4 sm:$0xff]   ;;  %v7912_v0 = vld [vmem:[%s10638_s1 + $0x136c] ss:$16 sps:$4 sm:$0xff]  }
 0x230   :  { %5264 = vmatprep.subr.bf16.mxu0 %v7816_v1  ;;  %5823 = vmatprep.subr.bf16.mxu1 %v7819_v2  ;;  %v7907_v1 = vld [vmem:[%s10638_s1 + $0x1360] ss:$16 sps:$4 sm:$0xff]   ;;  %v7910_v2 = vld [vmem:[%s10638_s1 + $0x1368] ss:$16 sps:$4 sm:$0xff]  }
 0x233   :  { %5265 = vmatpush1.bf16.msra.mxu0 %v7814_v3  ;;  %5824 = vmatpush1.bf16.msra.mxu1 %v7817_v4  ;;  %v7915_v3 = vld [vmem:[%s10638_s1 + $0x1384] ss:$16 sps:$4 sm:$0xff]   ;;  %v7918_v4 = vld [vmem:[%s10638_s1 + $0x138c] ss:$16 sps:$4 sm:$0xff]  }
 0x234   :  { %5266 = vmatprep.subr.bf16.mxu0 %v7822_v5  ;;  %5825 = vmatprep.subr.bf16.mxu1 %v7825_v6  ;;  %v7913_v5 = vld [vmem:[%s10638_s1 + $0x1380] ss:$16 sps:$4 sm:$0xff]   ;;  %v7916_v6 = vld [vmem:[%s10638_s1 + $0x1388] ss:$16 sps:$4 sm:$0xff]  }
 0x237   :  { %5267 = vmatpush1.bf16.msra.mxu0 %v7820_v7  ;;  %5826 = vmatpush1.bf16.msra.mxu1 %v7823_v8  ;;  %v7921_v7 = vld [vmem:[%s10638_s1 + $0x13a4] ss:$16 sps:$4 sm:$0xff]   ;;  %v7924_v8 = vld [vmem:[%s10638_s1 + $0x13ac] ss:$16 sps:$4 sm:$0xff]  }
 0x238   :  { %5268 = vmatprep.subr.bf16.mxu0 %v7828_v9  ;;  %5827 = vmatprep.subr.bf16.mxu1 %v7831_v10  ;;  %v7919_v9 = vld [vmem:[%s10638_s1 + $0x13a0] ss:$16 sps:$4 sm:$0xff]   ;;  %v7922_v10 = vld [vmem:[%s10638_s1 + $0x13a8] ss:$16 sps:$4 sm:$0xff]  }
 0x23b   :  { %5269 = vmatpush1.bf16.msra.mxu0 %v7826_v11  ;;  %5828 = vmatpush1.bf16.msra.mxu1 %v7829_v12  ;;  %v7927_v11 = vld [vmem:[%s10638_s1 + $0x13c4] ss:$16 sps:$4 sm:$0xff]   ;;  %v7930_v12 = vld [vmem:[%s10638_s1 + $0x13cc] ss:$16 sps:$4 sm:$0xff]  }
 0x23c   :  { %5270 = vmatprep.subr.bf16.mxu0 %v7834_v13  ;;  %5829 = vmatprep.subr.bf16.mxu1 %v7837_v14  ;;  %v7925_v13 = vld [vmem:[%s10638_s1 + $0x13c0] ss:$16 sps:$4 sm:$0xff]   ;;  %v7928_v14 = vld [vmem:[%s10638_s1 + $0x13c8] ss:$16 sps:$4 sm:$0xff]  }
 0x23f   :  { %5271 = vmatpush1.bf16.msra.mxu0 %v7832_v15  ;;  %5830 = vmatpush1.bf16.msra.mxu1 %v7835_v16  ;;  %v7933_v15 = vld [vmem:[%s10638_s1 + $0x13e4] ss:$16 sps:$4 sm:$0xff]   ;;  %v7936_v16 = vld [vmem:[%s10638_s1 + $0x13ec] ss:$16 sps:$4 sm:$0xff]  }
 0x240   :  { %5283 = vmatprep.subr.bf16.mxu0 %v7843_v17  ;;  %5842 = vmatprep.subr.bf16.mxu1 %v7846_v18  ;;  %v7931_v17 = vld [vmem:[%s10638_s1 + $0x13e0] ss:$16 sps:$4 sm:$0xff]   ;;  %v7934_v18 = vld [vmem:[%s10638_s1 + $0x13e8] ss:$16 sps:$4 sm:$0xff]  }
 0x242   :  { %5273 = vmatmul.mubr.bf16.vlgmr.msra.gmra.mrb[0].mxu0 %v7838_v19  ;;  %5832 = vmatmul.mubr.bf16.vlgmr.msra.gmra.mrb[0].mxu1 %v7838_v19  ;;  %v7942_v19 = vld [vmem:[%s10638_s1 + $0x1404] ss:$16 sps:$4 sm:$0xff]  }
 0x243   :  { %5284 = vmatpush1.bf16.msra.mxu0 %v7841_v20  ;;  %5843 = vmatpush1.bf16.msra.mxu1 %v7844_v21  ;;  %v7945_v20 = vld [vmem:[%s10638_s1 + $0x140c] ss:$16 sps:$4 sm:$0xff]  }
 0x244   :  { %5285 = vmatprep.subr.bf16.mxu0 %v7849_v22  ;;  %5844 = vmatprep.subr.bf16.mxu1 %v7852_v23  ;;  %v7937_v21 = vld [vmem:[%s10639_s0 + $0x48] ss:$100 sps:$4 sm:$0xff]   ;;  %v7940_v22 = vld [vmem:[%s10638_s1 + $0x1400] ss:$16 sps:$4 sm:$0xff]  }
 0x245   :  { %5315 = vmatprep.mubr.bf16.mxu0 %v7939_v24  ;;  %5874 = vmatprep.mubr.bf16.mxu1 %v7939_v24  ;;  %v7943_v23 = vld [vmem:[%s10638_s1 + $0x1408] ss:$16 sps:$4 sm:$0xff]   ;;  %v7948_v24 = vld [vmem:[%s10638_s1 + $0x1424] ss:$16 sps:$4 sm:$0xff]  }
 0x247   :  { %5286 = vmatpush1.bf16.msra.mxu0 %v7847_v25  ;;  %5845 = vmatpush1.bf16.msra.mxu1 %v7850_v26  ;;  %v7951_v25 = vld [vmem:[%s10638_s1 + $0x142c] ss:$16 sps:$4 sm:$0xff]   ;;  %v8038_v26 = vld [vmem:[%s10639_s0 + $0x54] ss:$100 sps:$4 sm:$0xff]  }
 0x248   :  { %5287 = vmatprep.subr.bf16.mxu0 %v7855_v27  ;;  %5846 = vmatprep.subr.bf16.mxu1 %v7858_v28  ;;  %v7946_v27 = vld [vmem:[%s10638_s1 + $0x1420] ss:$16 sps:$4 sm:$0xff]   ;;  %v7949_v28 = vld [vmem:[%s10638_s1 + $0x1428] ss:$16 sps:$4 sm:$0xff]  }
 0x24b   :  { %5288 = vmatpush1.bf16.msra.mxu0 %v7853_v29  ;;  %5847 = vmatpush1.bf16.msra.mxu1 %v7856_v30  ;;  %v7954_v29 = vld [vmem:[%s10638_s1 + $0x1444] ss:$16 sps:$4 sm:$0xff]   ;;  %v7957_v30 = vld [vmem:[%s10638_s1 + $0x144c] ss:$16 sps:$4 sm:$0xff]  }
 0x24c   :  { %5289 = vmatprep.subr.bf16.mxu0 %v7861_v31  ;;  %5848 = vmatprep.subr.bf16.mxu1 %v7864_v32  ;;  %v7952_v31 = vld [vmem:[%s10638_s1 + $0x1440] ss:$16 sps:$4 sm:$0xff]   ;;  %v7955_v32 = vld [vmem:[%s10638_s1 + $0x1448] ss:$16 sps:$4 sm:$0xff]  }
 0x24f   :  { %5290 = vmatpush1.bf16.msra.mxu0 %v7859_v33  ;;  %5849 = vmatpush1.bf16.msra.mxu1 %v7862_v34  ;;  %v7960_v33 = vld [vmem:[%s10638_s1 + $0x1464] ss:$16 sps:$4 sm:$0xff]   ;;  %v7963_v34 = vld [vmem:[%s10638_s1 + $0x146c] ss:$16 sps:$4 sm:$0xff]  }
 0x250   :  { %5291 = vmatprep.subr.bf16.mxu0 %v7867_v35  ;;  %5850 = vmatprep.subr.bf16.mxu1 %v7870_v36  ;;  %v7958_v35 = vld [vmem:[%s10638_s1 + $0x1460] ss:$16 sps:$4 sm:$0xff]   ;;  %v7961_v36 = vld [vmem:[%s10638_s1 + $0x1468] ss:$16 sps:$4 sm:$0xff]  }
 0x253   :  { %5292 = vmatpush1.bf16.msra.mxu0 %v7865_v37  ;;  %5851 = vmatpush1.bf16.msra.mxu1 %v7868_v38  ;;  %v7966_v37 = vld [vmem:[%s10638_s1 + $0x1484] ss:$16 sps:$4 sm:$0xff]   ;;  %v7969_v38 = vld [vmem:[%s10638_s1 + $0x148c] ss:$16 sps:$4 sm:$0xff]  }
 0x254   :  { %5293 = vmatprep.subr.bf16.mxu0 %v7873_v39  ;;  %5852 = vmatprep.subr.bf16.mxu1 %v7876_v40  ;;  %v7964_v39 = vld [vmem:[%s10638_s1 + $0x1480] ss:$16 sps:$4 sm:$0xff]   ;;  %v7967_v40 = vld [vmem:[%s10638_s1 + $0x1488] ss:$16 sps:$4 sm:$0xff]  }
 0x257   :  { %5294 = vmatpush1.bf16.msra.mxu0 %v7871_v41  ;;  %5853 = vmatpush1.bf16.msra.mxu1 %v7874_v42  ;;  %v7972_v41 = vld [vmem:[%s10638_s1 + $0x14a4] ss:$16 sps:$4 sm:$0xff]   ;;  %v7975_v42 = vld [vmem:[%s10638_s1 + $0x14ac] ss:$16 sps:$4 sm:$0xff]  }
 0x258   :  { %5295 = vmatprep.subr.bf16.mxu0 %v7879_v43  ;;  %5854 = vmatprep.subr.bf16.mxu1 %v7882_v44  ;;  %v7970_v43 = vld [vmem:[%s10638_s1 + $0x14a0] ss:$16 sps:$4 sm:$0xff]   ;;  %v7973_v44 = vld [vmem:[%s10638_s1 + $0x14a8] ss:$16 sps:$4 sm:$0xff]  }
 0x25b   :  { %5296 = vmatpush1.bf16.msra.mxu0 %v7877_v45  ;;  %5855 = vmatpush1.bf16.msra.mxu1 %v7880_v46  ;;  %v7978_v45 = vld [vmem:[%s10638_s1 + $0x14c4] ss:$16 sps:$4 sm:$0xff]   ;;  %v7981_v46 = vld [vmem:[%s10638_s1 + $0x14cc] ss:$16 sps:$4 sm:$0xff]  }
 0x25c   :  { %5297 = vmatprep.subr.bf16.mxu0 %v7885_v47  ;;  %5856 = vmatprep.subr.bf16.mxu1 %v7888_v48  ;;  %v7976_v47 = vld [vmem:[%s10638_s1 + $0x14c0] ss:$16 sps:$4 sm:$0xff]   ;;  %v7979_v48 = vld [vmem:[%s10638_s1 + $0x14c8] ss:$16 sps:$4 sm:$0xff]  }
 0x25f   :  { %5298 = vmatpush1.bf16.msra.mxu0 %v7883_v49  ;;  %5857 = vmatpush1.bf16.msra.mxu1 %v7886_v50  ;;  %v7984_v49 = vld [vmem:[%s10638_s1 + $0x14e4] ss:$16 sps:$4 sm:$0xff]   ;;  %v7987_v50 = vld [vmem:[%s10638_s1 + $0x14ec] ss:$16 sps:$4 sm:$0xff]  }
 0x260   :  { %5299 = vmatprep.subr.bf16.mxu0 %v7891_v51  ;;  %5858 = vmatprep.subr.bf16.mxu1 %v7894_v52  ;;  %v7982_v51 = vld [vmem:[%s10638_s1 + $0x14e0] ss:$16 sps:$4 sm:$0xff]   ;;  %v7985_v52 = vld [vmem:[%s10638_s1 + $0x14e8] ss:$16 sps:$4 sm:$0xff]  }
 0x263   :  { %5300 = vmatpush1.bf16.msra.mxu0 %v7889_v53  ;;  %5859 = vmatpush1.bf16.msra.mxu1 %v7892_v54  ;;  %v7990_v53 = vld [vmem:[%s10638_s1 + $0x1504] ss:$16 sps:$4 sm:$0xff]   ;;  %v7993_v54 = vld [vmem:[%s10638_s1 + $0x150c] ss:$16 sps:$4 sm:$0xff]  }
 0x264   :  { %5301 = vmatprep.subr.bf16.mxu0 %v7897_v55  ;;  %5860 = vmatprep.subr.bf16.mxu1 %v7900_v56  ;;  %v7988_v55 = vld [vmem:[%s10638_s1 + $0x1500] ss:$16 sps:$4 sm:$0xff]   ;;  %v7991_v56 = vld [vmem:[%s10638_s1 + $0x1508] ss:$16 sps:$4 sm:$0xff]  }
 0x267   :  { %5302 = vmatpush1.bf16.msra.mxu0 %v7895_v57  ;;  %5861 = vmatpush1.bf16.msra.mxu1 %v7898_v58  ;;  %v7996_v57 = vld [vmem:[%s10638_s1 + $0x1524] ss:$16 sps:$4 sm:$0xff]   ;;  %v7999_v58 = vld [vmem:[%s10638_s1 + $0x152c] ss:$16 sps:$4 sm:$0xff]  }
 0x268   :  { %5303 = vmatprep.subr.bf16.mxu0 %v7903_v59  ;;  %5862 = vmatprep.subr.bf16.mxu1 %v7906_v60  ;;  %v7994_v59 = vld [vmem:[%s10638_s1 + $0x1520] ss:$16 sps:$4 sm:$0xff]   ;;  %v7997_v60 = vld [vmem:[%s10638_s1 + $0x1528] ss:$16 sps:$4 sm:$0xff]  }
 0x26b   :  { %5304 = vmatpush1.bf16.msra.mxu0 %v7901_v61  ;;  %5863 = vmatpush1.bf16.msra.mxu1 %v7904_v62  ;;  %v8002_v61 = vld [vmem:[%s10638_s1 + $0x1544] ss:$16 sps:$4 sm:$0xff]   ;;  %v8005_v62 = vld [vmem:[%s10638_s1 + $0x154c] ss:$16 sps:$4 sm:$0xff]  }
 0x26c   :  { %5305 = vmatprep.subr.bf16.mxu0 %v7909_v63  ;;  %5864 = vmatprep.subr.bf16.mxu1 %v7912_v0  ;;  %v8000_v63 = vld [vmem:[%s10638_s1 + $0x1540] ss:$16 sps:$4 sm:$0xff]   ;;  %v8003_v0 = vld [vmem:[%s10638_s1 + $0x1548] ss:$16 sps:$4 sm:$0xff]  }
 0x26f   :  { %5306 = vmatpush1.bf16.msra.mxu0 %v7907_v1  ;;  %5865 = vmatpush1.bf16.msra.mxu1 %v7910_v2  ;;  %v8008_v1 = vld [vmem:[%s10638_s1 + $0x1564] ss:$16 sps:$4 sm:$0xff]   ;;  %v8011_v2 = vld [vmem:[%s10638_s1 + $0x156c] ss:$16 sps:$4 sm:$0xff]  }
 0x270   :  { %5307 = vmatprep.subr.bf16.mxu0 %v7915_v3  ;;  %5866 = vmatprep.subr.bf16.mxu1 %v7918_v4  ;;  %v8006_v3 = vld [vmem:[%s10638_s1 + $0x1560] ss:$16 sps:$4 sm:$0xff]   ;;  %v8009_v4 = vld [vmem:[%s10638_s1 + $0x1568] ss:$16 sps:$4 sm:$0xff]  }
 0x273   :  { %5308 = vmatpush1.bf16.msra.mxu0 %v7913_v5  ;;  %5867 = vmatpush1.bf16.msra.mxu1 %v7916_v6  ;;  %v8014_v5 = vld [vmem:[%s10638_s1 + $0x1584] ss:$16 sps:$4 sm:$0xff]   ;;  %v8017_v6 = vld [vmem:[%s10638_s1 + $0x158c] ss:$16 sps:$4 sm:$0xff]  }
 0x274   :  { %5309 = vmatprep.subr.bf16.mxu0 %v7921_v7  ;;  %5868 = vmatprep.subr.bf16.mxu1 %v7924_v8  ;;  %v8012_v7 = vld [vmem:[%s10638_s1 + $0x1580] ss:$16 sps:$4 sm:$0xff]   ;;  %v8015_v8 = vld [vmem:[%s10638_s1 + $0x1588] ss:$16 sps:$4 sm:$0xff]  }
 0x277   :  { %5310 = vmatpush1.bf16.msra.mxu0 %v7919_v9  ;;  %5869 = vmatpush1.bf16.msra.mxu1 %v7922_v10  ;;  %v8020_v9 = vld [vmem:[%s10638_s1 + $0x15a4] ss:$16 sps:$4 sm:$0xff]   ;;  %v8023_v10 = vld [vmem:[%s10638_s1 + $0x15ac] ss:$16 sps:$4 sm:$0xff]  }
 0x278   :  { %5311 = vmatprep.subr.bf16.mxu0 %v7927_v11  ;;  %5870 = vmatprep.subr.bf16.mxu1 %v7930_v12  ;;  %v8018_v11 = vld [vmem:[%s10638_s1 + $0x15a0] ss:$16 sps:$4 sm:$0xff]   ;;  %v8021_v12 = vld [vmem:[%s10638_s1 + $0x15a8] ss:$16 sps:$4 sm:$0xff]  }
 0x27b   :  { %5312 = vmatpush1.bf16.msra.mxu0 %v7925_v13  ;;  %5871 = vmatpush1.bf16.msra.mxu1 %v7928_v14  ;;  %v8026_v13 = vld [vmem:[%s10638_s1 + $0x15c4] ss:$16 sps:$4 sm:$0xff]   ;;  %v8029_v14 = vld [vmem:[%s10638_s1 + $0x15cc] ss:$16 sps:$4 sm:$0xff]  }
 0x27c   :  { %5313 = vmatprep.subr.bf16.mxu0 %v7933_v15  ;;  %5872 = vmatprep.subr.bf16.mxu1 %v7936_v16  ;;  %v8024_v15 = vld [vmem:[%s10638_s1 + $0x15c0] ss:$16 sps:$4 sm:$0xff]   ;;  %v8027_v16 = vld [vmem:[%s10638_s1 + $0x15c8] ss:$16 sps:$4 sm:$0xff]  }
 0x27f   :  { %5314 = vmatpush1.bf16.msra.mxu0 %v7931_v17  ;;  %5873 = vmatpush1.bf16.msra.mxu1 %v7934_v18  ;;  %v8032_v17 = vld [vmem:[%s10638_s1 + $0x15e4] ss:$16 sps:$4 sm:$0xff]   ;;  %v8035_v18 = vld [vmem:[%s10638_s1 + $0x15ec] ss:$16 sps:$4 sm:$0xff]  }
 0x280   :  { %5326 = vmatprep.subr.bf16.mxu0 %v7942_v19  ;;  %5885 = vmatprep.subr.bf16.mxu1 %v7945_v20  ;;  %v8030_v19 = vld [vmem:[%s10638_s1 + $0x15e0] ss:$16 sps:$4 sm:$0xff]   ;;  %v8033_v20 = vld [vmem:[%s10638_s1 + $0x15e8] ss:$16 sps:$4 sm:$0xff]  }
 0x282   :  { %5316 = vmatmul.mubr.bf16.vlgmr.msra.gmra.mrb[0].mxu0 %v7937_v21  ;;  %5875 = vmatmul.mubr.bf16.vlgmr.msra.gmra.mrb[0].mxu1 %v7937_v21  ;;  %v8041_v21 = vld [vmem:[%s10638_s1 + $0x1604] ss:$16 sps:$4 sm:$0xff]  }
 0x283   :  { %5327 = vmatpush1.bf16.msra.mxu0 %v7940_v22  ;;  %5886 = vmatpush1.bf16.msra.mxu1 %v7943_v23  ;;  %v8044_v22 = vld [vmem:[%s10638_s1 + $0x160c] ss:$16 sps:$4 sm:$0xff]   ;;  %v8036_v23 = vld [vmem:[%s10639_s0 + $0x50] ss:$100 sps:$4 sm:$0xff]  }
 0x284   :  { %5328 = vmatprep.subr.bf16.mxu0 %v7948_v24  ;;  %5887 = vmatprep.subr.bf16.mxu1 %v7951_v25  ;;  %v8039_v24 = vld [vmem:[%s10638_s1 + $0x1600] ss:$16 sps:$4 sm:$0xff]   ;;  %v8042_v25 = vld [vmem:[%s10638_s1 + $0x1608] ss:$16 sps:$4 sm:$0xff]  }
 0x285   :  { %5358 = vmatprep.mubr.bf16.mxu0 %v8038_v26  ;;  %5917 = vmatprep.mubr.bf16.mxu1 %v8038_v26  ;;  %v8047_v26 = vld [vmem:[%s10638_s1 + $0x1624] ss:$16 sps:$4 sm:$0xff]  }
 0x287   :  { %5329 = vmatpush1.bf16.msra.mxu0 %v7946_v27  ;;  %5888 = vmatpush1.bf16.msra.mxu1 %v7949_v28  ;;  %v8050_v27 = vld [vmem:[%s10638_s1 + $0x162c] ss:$16 sps:$4 sm:$0xff]  }
 0x288   :  { %5330 = vmatprep.subr.bf16.mxu0 %v7954_v29  ;;  %5889 = vmatprep.subr.bf16.mxu1 %v7957_v30  ;;  %v8137_v28 = vld [vmem:[%s10639_s0 + $0x5c] ss:$100 sps:$4 sm:$0xff]   ;;  %v8048_v30 = vld [vmem:[%s10638_s1 + $0x1628] ss:$16 sps:$4 sm:$0xff]  }
 0x289   :  { %v8045_v29 = vld [vmem:[%s10638_s1 + $0x1620] ss:$16 sps:$4 sm:$0xff]  }
 0x28b   :  { %5331 = vmatpush1.bf16.msra.mxu0 %v7952_v31  ;;  %5890 = vmatpush1.bf16.msra.mxu1 %v7955_v32  ;;  %v8053_v31 = vld [vmem:[%s10638_s1 + $0x1644] ss:$16 sps:$4 sm:$0xff]   ;;  %v8056_v32 = vld [vmem:[%s10638_s1 + $0x164c] ss:$16 sps:$4 sm:$0xff]  }
 0x28c   :  { %5332 = vmatprep.subr.bf16.mxu0 %v7960_v33  ;;  %5891 = vmatprep.subr.bf16.mxu1 %v7963_v34  ;;  %v8051_v33 = vld [vmem:[%s10638_s1 + $0x1640] ss:$16 sps:$4 sm:$0xff]   ;;  %v8054_v34 = vld [vmem:[%s10638_s1 + $0x1648] ss:$16 sps:$4 sm:$0xff]  }
 0x28f   :  { %5333 = vmatpush1.bf16.msra.mxu0 %v7958_v35  ;;  %5892 = vmatpush1.bf16.msra.mxu1 %v7961_v36  ;;  %v8059_v35 = vld [vmem:[%s10638_s1 + $0x1664] ss:$16 sps:$4 sm:$0xff]   ;;  %v8062_v36 = vld [vmem:[%s10638_s1 + $0x166c] ss:$16 sps:$4 sm:$0xff]  }
 0x290   :  { %5334 = vmatprep.subr.bf16.mxu0 %v7966_v37  ;;  %5893 = vmatprep.subr.bf16.mxu1 %v7969_v38  ;;  %v8057_v37 = vld [vmem:[%s10638_s1 + $0x1660] ss:$16 sps:$4 sm:$0xff]   ;;  %v8060_v38 = vld [vmem:[%s10638_s1 + $0x1668] ss:$16 sps:$4 sm:$0xff]  }
 0x293   :  { %5335 = vmatpush1.bf16.msra.mxu0 %v7964_v39  ;;  %5894 = vmatpush1.bf16.msra.mxu1 %v7967_v40  ;;  %v8065_v39 = vld [vmem:[%s10638_s1 + $0x1684] ss:$16 sps:$4 sm:$0xff]   ;;  %v8068_v40 = vld [vmem:[%s10638_s1 + $0x168c] ss:$16 sps:$4 sm:$0xff]  }
 0x294   :  { %5336 = vmatprep.subr.bf16.mxu0 %v7972_v41  ;;  %5895 = vmatprep.subr.bf16.mxu1 %v7975_v42  ;;  %v8063_v41 = vld [vmem:[%s10638_s1 + $0x1680] ss:$16 sps:$4 sm:$0xff]   ;;  %v8066_v42 = vld [vmem:[%s10638_s1 + $0x1688] ss:$16 sps:$4 sm:$0xff]  }
 0x297   :  { %5337 = vmatpush1.bf16.msra.mxu0 %v7970_v43  ;;  %5896 = vmatpush1.bf16.msra.mxu1 %v7973_v44  ;;  %v8071_v43 = vld [vmem:[%s10638_s1 + $0x16a4] ss:$16 sps:$4 sm:$0xff]   ;;  %v8074_v44 = vld [vmem:[%s10638_s1 + $0x16ac] ss:$16 sps:$4 sm:$0xff]  }
 0x298   :  { %5338 = vmatprep.subr.bf16.mxu0 %v7978_v45  ;;  %5897 = vmatprep.subr.bf16.mxu1 %v7981_v46  ;;  %v8069_v45 = vld [vmem:[%s10638_s1 + $0x16a0] ss:$16 sps:$4 sm:$0xff]   ;;  %v8072_v46 = vld [vmem:[%s10638_s1 + $0x16a8] ss:$16 sps:$4 sm:$0xff]  }
 0x29b   :  { %5339 = vmatpush1.bf16.msra.mxu0 %v7976_v47  ;;  %5898 = vmatpush1.bf16.msra.mxu1 %v7979_v48  ;;  %v8077_v47 = vld [vmem:[%s10638_s1 + $0x16c4] ss:$16 sps:$4 sm:$0xff]   ;;  %v8080_v48 = vld [vmem:[%s10638_s1 + $0x16cc] ss:$16 sps:$4 sm:$0xff]  }
 0x29c   :  { %5340 = vmatprep.subr.bf16.mxu0 %v7984_v49  ;;  %5899 = vmatprep.subr.bf16.mxu1 %v7987_v50  ;;  %v8075_v49 = vld [vmem:[%s10638_s1 + $0x16c0] ss:$16 sps:$4 sm:$0xff]   ;;  %v8078_v50 = vld [vmem:[%s10638_s1 + $0x16c8] ss:$16 sps:$4 sm:$0xff]  }
 0x29f   :  { %5341 = vmatpush1.bf16.msra.mxu0 %v7982_v51  ;;  %5900 = vmatpush1.bf16.msra.mxu1 %v7985_v52  ;;  %v8083_v51 = vld [vmem:[%s10638_s1 + $0x16e4] ss:$16 sps:$4 sm:$0xff]   ;;  %v8086_v52 = vld [vmem:[%s10638_s1 + $0x16ec] ss:$16 sps:$4 sm:$0xff]  }
 0x2a0   :  { %5342 = vmatprep.subr.bf16.mxu0 %v7990_v53  ;;  %5901 = vmatprep.subr.bf16.mxu1 %v7993_v54  ;;  %v8081_v53 = vld [vmem:[%s10638_s1 + $0x16e0] ss:$16 sps:$4 sm:$0xff]   ;;  %v8084_v54 = vld [vmem:[%s10638_s1 + $0x16e8] ss:$16 sps:$4 sm:$0xff]  }
 0x2a3   :  { %5343 = vmatpush1.bf16.msra.mxu0 %v7988_v55  ;;  %5902 = vmatpush1.bf16.msra.mxu1 %v7991_v56  ;;  %v8089_v55 = vld [vmem:[%s10638_s1 + $0x1704] ss:$16 sps:$4 sm:$0xff]   ;;  %v8092_v56 = vld [vmem:[%s10638_s1 + $0x170c] ss:$16 sps:$4 sm:$0xff]  }
 0x2a4   :  { %5344 = vmatprep.subr.bf16.mxu0 %v7996_v57  ;;  %5903 = vmatprep.subr.bf16.mxu1 %v7999_v58  ;;  %v8087_v57 = vld [vmem:[%s10638_s1 + $0x1700] ss:$16 sps:$4 sm:$0xff]   ;;  %v8090_v58 = vld [vmem:[%s10638_s1 + $0x1708] ss:$16 sps:$4 sm:$0xff]  }
 0x2a7   :  { %5345 = vmatpush1.bf16.msra.mxu0 %v7994_v59  ;;  %5904 = vmatpush1.bf16.msra.mxu1 %v7997_v60  ;;  %v8095_v59 = vld [vmem:[%s10638_s1 + $0x1724] ss:$16 sps:$4 sm:$0xff]   ;;  %v8098_v60 = vld [vmem:[%s10638_s1 + $0x172c] ss:$16 sps:$4 sm:$0xff]  }
 0x2a8   :  { %5346 = vmatprep.subr.bf16.mxu0 %v8002_v61  ;;  %5905 = vmatprep.subr.bf16.mxu1 %v8005_v62  ;;  %v8093_v61 = vld [vmem:[%s10638_s1 + $0x1720] ss:$16 sps:$4 sm:$0xff]   ;;  %v8096_v62 = vld [vmem:[%s10638_s1 + $0x1728] ss:$16 sps:$4 sm:$0xff]  }
 0x2ab   :  { %5347 = vmatpush1.bf16.msra.mxu0 %v8000_v63  ;;  %5906 = vmatpush1.bf16.msra.mxu1 %v8003_v0  ;;  %v8101_v63 = vld [vmem:[%s10638_s1 + $0x1744] ss:$16 sps:$4 sm:$0xff]   ;;  %v8104_v0 = vld [vmem:[%s10638_s1 + $0x174c] ss:$16 sps:$4 sm:$0xff]  }
 0x2ac   :  { %5348 = vmatprep.subr.bf16.mxu0 %v8008_v1  ;;  %5907 = vmatprep.subr.bf16.mxu1 %v8011_v2  ;;  %v8099_v1 = vld [vmem:[%s10638_s1 + $0x1740] ss:$16 sps:$4 sm:$0xff]   ;;  %v8102_v2 = vld [vmem:[%s10638_s1 + $0x1748] ss:$16 sps:$4 sm:$0xff]  }
 0x2af   :  { %5349 = vmatpush1.bf16.msra.mxu0 %v8006_v3  ;;  %5908 = vmatpush1.bf16.msra.mxu1 %v8009_v4  ;;  %v8107_v3 = vld [vmem:[%s10638_s1 + $0x1764] ss:$16 sps:$4 sm:$0xff]   ;;  %v8110_v4 = vld [vmem:[%s10638_s1 + $0x176c] ss:$16 sps:$4 sm:$0xff]  }
 0x2b0   :  { %5350 = vmatprep.subr.bf16.mxu0 %v8014_v5  ;;  %5909 = vmatprep.subr.bf16.mxu1 %v8017_v6  ;;  %v8105_v5 = vld [vmem:[%s10638_s1 + $0x1760] ss:$16 sps:$4 sm:$0xff]   ;;  %v8108_v6 = vld [vmem:[%s10638_s1 + $0x1768] ss:$16 sps:$4 sm:$0xff]  }
 0x2b3   :  { %5351 = vmatpush1.bf16.msra.mxu0 %v8012_v7  ;;  %5910 = vmatpush1.bf16.msra.mxu1 %v8015_v8  ;;  %v8113_v7 = vld [vmem:[%s10638_s1 + $0x1784] ss:$16 sps:$4 sm:$0xff]   ;;  %v8116_v8 = vld [vmem:[%s10638_s1 + $0x178c] ss:$16 sps:$4 sm:$0xff]  }
 0x2b4   :  { %5352 = vmatprep.subr.bf16.mxu0 %v8020_v9  ;;  %5911 = vmatprep.subr.bf16.mxu1 %v8023_v10  ;;  %v8111_v9 = vld [vmem:[%s10638_s1 + $0x1780] ss:$16 sps:$4 sm:$0xff]   ;;  %v8114_v10 = vld [vmem:[%s10638_s1 + $0x1788] ss:$16 sps:$4 sm:$0xff]  }
 0x2b7   :  { %5353 = vmatpush1.bf16.msra.mxu0 %v8018_v11  ;;  %5912 = vmatpush1.bf16.msra.mxu1 %v8021_v12  ;;  %v8119_v11 = vld [vmem:[%s10638_s1 + $0x17a4] ss:$16 sps:$4 sm:$0xff]   ;;  %v8122_v12 = vld [vmem:[%s10638_s1 + $0x17ac] ss:$16 sps:$4 sm:$0xff]  }
 0x2b8   :  { %5354 = vmatprep.subr.bf16.mxu0 %v8026_v13  ;;  %5913 = vmatprep.subr.bf16.mxu1 %v8029_v14  ;;  %v8117_v13 = vld [vmem:[%s10638_s1 + $0x17a0] ss:$16 sps:$4 sm:$0xff]   ;;  %v8120_v14 = vld [vmem:[%s10638_s1 + $0x17a8] ss:$16 sps:$4 sm:$0xff]  }
 0x2bb   :  { %5355 = vmatpush1.bf16.msra.mxu0 %v8024_v15  ;;  %5914 = vmatpush1.bf16.msra.mxu1 %v8027_v16  ;;  %v8125_v15 = vld [vmem:[%s10638_s1 + $0x17c4] ss:$16 sps:$4 sm:$0xff]   ;;  %v8128_v16 = vld [vmem:[%s10638_s1 + $0x17cc] ss:$16 sps:$4 sm:$0xff]  }
 0x2bc   :  { %5356 = vmatprep.subr.bf16.mxu0 %v8032_v17  ;;  %5915 = vmatprep.subr.bf16.mxu1 %v8035_v18  ;;  %v8123_v17 = vld [vmem:[%s10638_s1 + $0x17c0] ss:$16 sps:$4 sm:$0xff]   ;;  %v8126_v18 = vld [vmem:[%s10638_s1 + $0x17c8] ss:$16 sps:$4 sm:$0xff]  }
 0x2bf   :  { %5357 = vmatpush1.bf16.msra.mxu0 %v8030_v19  ;;  %5916 = vmatpush1.bf16.msra.mxu1 %v8033_v20  ;;  %v8131_v19 = vld [vmem:[%s10638_s1 + $0x17e4] ss:$16 sps:$4 sm:$0xff]   ;;  %v8134_v20 = vld [vmem:[%s10638_s1 + $0x17ec] ss:$16 sps:$4 sm:$0xff]  }
 0x2c0   :  { %5369 = vmatprep.subr.bf16.mxu0 %v8041_v21  ;;  %5928 = vmatprep.subr.bf16.mxu1 %v8044_v22  ;;  %v8129_v21 = vld [vmem:[%s10638_s1 + $0x17e0] ss:$16 sps:$4 sm:$0xff]   ;;  %v8132_v22 = vld [vmem:[%s10638_s1 + $0x17e8] ss:$16 sps:$4 sm:$0xff]  }
 0x2c2   :  { %5359 = vmatmul.mubr.bf16.vlgmr.msra.gmra.mrb[0].mxu0 %v8036_v23  ;;  %5918 = vmatmul.mubr.bf16.vlgmr.msra.gmra.mrb[0].mxu1 %v8036_v23  ;;  %v8140_v23 = vld [vmem:[%s10638_s1 + $0x1804] ss:$16 sps:$4 sm:$0xff]  }
 0x2c3   :  { %5370 = vmatpush1.bf16.msra.mxu0 %v8039_v24  ;;  %5929 = vmatpush1.bf16.msra.mxu1 %v8042_v25  ;;  %v8143_v24 = vld [vmem:[%s10638_s1 + $0x180c] ss:$16 sps:$4 sm:$0xff]  }
 0x2c4   :  { %5371 = vmatprep.subr.bf16.mxu0 %v8047_v26  ;;  %5930 = vmatprep.subr.bf16.mxu1 %v8050_v27  ;;  %v8135_v25 = vld [vmem:[%s10639_s0 + $0x58] ss:$100 sps:$4 sm:$0xff]   ;;  %v8138_v26 = vld [vmem:[%s10638_s1 + $0x1800] ss:$16 sps:$4 sm:$0xff]  }
 0x2c5   :  { %5401 = vmatprep.mubr.bf16.mxu0 %v8137_v28  ;;  %5960 = vmatprep.mubr.bf16.mxu1 %v8137_v28  ;;  %v8141_v27 = vld [vmem:[%s10638_s1 + $0x1808] ss:$16 sps:$4 sm:$0xff]   ;;  %v8146_v28 = vld [vmem:[%s10638_s1 + $0x1824] ss:$16 sps:$4 sm:$0xff]  }
 0x2c7   :  { %5372 = vmatpush1.bf16.msra.mxu0 %v8045_v29  ;;  %5931 = vmatpush1.bf16.msra.mxu1 %v8048_v30  ;;  %v8149_v29 = vld [vmem:[%s10638_s1 + $0x182c] ss:$16 sps:$4 sm:$0xff]   ;;  %v8144_v30 = vld [vmem:[%s10638_s1 + $0x1820] ss:$16 sps:$4 sm:$0xff]  }
 0x2c8   :  { %5373 = vmatprep.subr.bf16.mxu0 %v8053_v31  ;;  %5932 = vmatprep.subr.bf16.mxu1 %v8056_v32  ;;  %v8147_v31 = vld [vmem:[%s10638_s1 + $0x1828] ss:$16 sps:$4 sm:$0xff]   ;;  %v8152_v32 = vld [vmem:[%s10638_s1 + $0x1844] ss:$16 sps:$4 sm:$0xff]  }
 0x2cb   :  { %5374 = vmatpush1.bf16.msra.mxu0 %v8051_v33  ;;  %5933 = vmatpush1.bf16.msra.mxu1 %v8054_v34  ;;  %v8155_v33 = vld [vmem:[%s10638_s1 + $0x184c] ss:$16 sps:$4 sm:$0xff]   ;;  %v8163_v34 = vmov 0  }
 0x2cc   :  { %5375 = vmatprep.subr.bf16.mxu0 %v8059_v35  ;;  %5934 = vmatprep.subr.bf16.mxu1 %v8062_v36  ;;  %v8150_v35 = vld [vmem:[%s10638_s1 + $0x1840] ss:$16 sps:$4 sm:$0xff]   ;;  %v8153_v36 = vld [vmem:[%s10638_s1 + $0x1848] ss:$16 sps:$4 sm:$0xff]  }
 0x2cf   :  { %5376 = vmatpush1.bf16.msra.mxu0 %v8057_v37  ;;  %5935 = vmatpush1.bf16.msra.mxu1 %v8060_v38  ;;  %v8158_v37 = vld [vmem:[%s10638_s1 + $0x1864] ss:$16 sps:$4 sm:$0xff]   ;;  %v8161_v38 = vld [vmem:[%s10638_s1 + $0x186c] ss:$16 sps:$4 sm:$0xff]  }
 0x2d0   :  { %5377 = vmatprep.subr.bf16.mxu0 %v8065_v39  ;;  %5936 = vmatprep.subr.bf16.mxu1 %v8068_v40  ;;  %v8156_v39 = vld [vmem:[%s10638_s1 + $0x1860] ss:$16 sps:$4 sm:$0xff]   ;;  %v8159_v40 = vld [vmem:[%s10638_s1 + $0x1868] ss:$16 sps:$4 sm:$0xff]  }
 0x2d3   :  { %5378 = vmatpush1.bf16.msra.mxu0 %v8063_v41  ;;  %5937 = vmatpush1.bf16.msra.mxu1 %v8066_v42  ;;  %v8162_v41 = vld [vmem:[%s10639_s0 + $0x60] ss:$100 sps:$4 sm:$0xff]   ;;  %v827_v42 = vlaneseq }
 0x2d4   :  { %5379 = vmatprep.subr.bf16.mxu0 %v8071_v43  ;;  %5938 = vmatprep.subr.bf16.mxu1 %v8074_v44 }
 0x2d5   :  { %v828_v43 = vshrl.u32 %v827_v42, 7 }
 0x2d7   :  { %5380 = vmatpush1.bf16.msra.mxu0 %v8069_v45  ;;  %5939 = vmatpush1.bf16.msra.mxu1 %v8072_v46  ;;  %v829_v44 = vsub.s32 0, %v828_v43  ;;  %v837_v45 = vsub.s32 2, %v828_v43  ;;  %v825_v46 = vld [vmem:[%s10640_s2] sm:$0xf] }
 0x2d8   :  { %5381 = vmatprep.subr.bf16.mxu0 %v8077_v47  ;;  %5940 = vmatprep.subr.bf16.mxu1 %v8080_v48  ;;  %v833_v47 = vsub.s32 1, %v828_v43  ;;  %v841_v48 = vsub.s32 3, %v828_v43 }
 0x2db   :  { %5382 = vmatpush1.bf16.msra.mxu0 %v8075_v49  ;;  %5941 = vmatpush1.bf16.msra.mxu1 %v8078_v50  ;;  %v830_v49 = vrot.slane %v825_v46, %v829_v44  ;;  %v838_v50 = vrot.slane %v825_v46, %v837_v45 }
 0x2dc   :  { %5383 = vmatprep.subr.bf16.mxu0 %v8083_v51  ;;  %5942 = vmatprep.subr.bf16.mxu1 %v8086_v52  ;;  %v834_v51 = vrot.slane %v825_v46, %v833_v47  ;;  %v842_v52 = vrot.slane %v825_v46, %v841_v48 }
 0x2df   :  { %5384 = vmatpush1.bf16.msra.mxu0 %v8081_v53  ;;  %5943 = vmatpush1.bf16.msra.mxu1 %v8084_v54 }
 0x2e0   :  { %5385 = vmatprep.subr.bf16.mxu0 %v8089_v55  ;;  %5944 = vmatprep.subr.bf16.mxu1 %v8092_v56 }
 0x2e3   :  { %5386 = vmatpush1.bf16.msra.mxu0 %v8087_v57  ;;  %5945 = vmatpush1.bf16.msra.mxu1 %v8090_v58 }
 0x2e4   :  { %5387 = vmatprep.subr.bf16.mxu0 %v8095_v59  ;;  %5946 = vmatprep.subr.bf16.mxu1 %v8098_v60 }
 0x2e7   :  { %5388 = vmatpush1.bf16.msra.mxu0 %v8093_v61  ;;  %5947 = vmatpush1.bf16.msra.mxu1 %v8096_v62 }
 0x2e8   :  { %5389 = vmatprep.subr.bf16.mxu0 %v8101_v63  ;;  %5948 = vmatprep.subr.bf16.mxu1 %v8104_v0 }
 0x2eb   :  { %5390 = vmatpush1.bf16.msra.mxu0 %v8099_v1  ;;  %5949 = vmatpush1.bf16.msra.mxu1 %v8102_v2 }
 0x2ec   :  { %5391 = vmatprep.subr.bf16.mxu0 %v8107_v3  ;;  %5950 = vmatprep.subr.bf16.mxu1 %v8110_v4 }
 0x2ef   :  { %5392 = vmatpush1.bf16.msra.mxu0 %v8105_v5  ;;  %5951 = vmatpush1.bf16.msra.mxu1 %v8108_v6 }
 0x2f0   :  { %5393 = vmatprep.subr.bf16.mxu0 %v8113_v7  ;;  %5952 = vmatprep.subr.bf16.mxu1 %v8116_v8 }
 0x2f3   :  { %5394 = vmatpush1.bf16.msra.mxu0 %v8111_v9  ;;  %5953 = vmatpush1.bf16.msra.mxu1 %v8114_v10 }
 0x2f4   :  { %5395 = vmatprep.subr.bf16.mxu0 %v8119_v11  ;;  %5954 = vmatprep.subr.bf16.mxu1 %v8122_v12 }
 0x2f7   :  { %5396 = vmatpush1.bf16.msra.mxu0 %v8117_v13  ;;  %5955 = vmatpush1.bf16.msra.mxu1 %v8120_v14 }
 0x2f8   :  { %5397 = vmatprep.subr.bf16.mxu0 %v8125_v15  ;;  %5956 = vmatprep.subr.bf16.mxu1 %v8128_v16 }
 0x2fb   :  { %5398 = vmatpush1.bf16.msra.mxu0 %v8123_v17  ;;  %5957 = vmatpush1.bf16.msra.mxu1 %v8126_v18 }
 0x2fc   :  { %5399 = vmatprep.subr.bf16.mxu0 %v8131_v19  ;;  %5958 = vmatprep.subr.bf16.mxu1 %v8134_v20 }
 0x2ff   :  { %5400 = vmatpush1.bf16.msra.mxu0 %v8129_v21  ;;  %5959 = vmatpush1.bf16.msra.mxu1 %v8132_v22 }
 0x300   :  { %5412 = vmatprep.subr.bf16.mxu0 %v8140_v23  ;;  %5971 = vmatprep.subr.bf16.mxu1 %v8143_v24 }
 0x302   :  { %5402 = vmatmul.mubr.bf16.vlgmr.msra.gmra.mrb[0].mxu0 %v8135_v25  ;;  %5961 = vmatmul.mubr.bf16.vlgmr.msra.gmra.mrb[0].mxu1 %v8135_v25 }
 0x303   :  { %5413 = vmatpush1.bf16.msra.mxu0 %v8138_v26  ;;  %5972 = vmatpush1.bf16.msra.mxu1 %v8141_v27 }
 0x304   :  { %5414 = vmatprep.subr.bf16.mxu0 %v8146_v28  ;;  %5973 = vmatprep.subr.bf16.mxu1 %v8149_v29 }
 0x305   :  { %5444 = vmatprep.mubr.bf16.mxu0 %v8163_v34  ;;  %6003 = vmatprep.mubr.bf16.mxu1 %v8163_v34 }
 0x307   :  { %5415 = vmatpush1.bf16.msra.mxu0 %v8144_v30  ;;  %5974 = vmatpush1.bf16.msra.mxu1 %v8147_v31 }
 0x308   :  { %5416 = vmatprep.subr.bf16.mxu0 %v8152_v32  ;;  %5975 = vmatprep.subr.bf16.mxu1 %v8155_v33 }
 0x30b   :  { %5417 = vmatpush1.bf16.msra.mxu0 %v8150_v35  ;;  %5976 = vmatpush1.bf16.msra.mxu1 %v8153_v36 }
 0x30c   :  { %5418 = vmatprep.subr.bf16.mxu0 %v8158_v37  ;;  %5977 = vmatprep.subr.bf16.mxu1 %v8161_v38 }
 0x30f   :  { %5419 = vmatpush1.bf16.msra.mxu0 %v8156_v39  ;;  %5978 = vmatpush1.bf16.msra.mxu1 %v8159_v40 }
 0x312   :  { %6843 = vmatmul.mubr.msk.bf16.vlgmr.msra.gmra.mrb[0].mxu0 %vm4892_vm0, %v8162_v41  ;;  %6844 = vmatmul.mubr.msk.bf16.vlgmr.msra.gmra.mrb[0].mxu1 %vm4892_vm0, %v8162_v41 }
 0x3e5   :  { %v5446_v53 = vpop.f32.mrb[0].mxu0  ;;  %v6005_v54 = vpop.f32.mrb[0].mxu1 }
 0x3e6   :  { %v6845_v55 = vadd.f32 %v5446_v53, %v830_v49  ;;  %v6849_v56 = vadd.f32 %v6005_v54, %v838_v50  ;;  %v5448_v57 = vpop.f32.mrb[1].mxu0  ;;  %v6007_v58 = vpop.f32.mrb[1].mxu1 }
 0x3e7   :  { %v6846_v59 = vadd.f32 %v5448_v57, %v834_v51  ;;  %v6850_v60 = vadd.f32 %v6007_v58, %v842_v52  ;;  %v5450_v61 = vpop.f32.mrb[2].mxu0  ;;  %v6009_v62 = vpop.f32.mrb[2].mxu1 }
 0x3e8   :  { %v6014_v63 = vmax.f32 %v6845_v55, 0.0  ;;  %v6016_v0 = vmax.f32 %v6849_v56, 0.0  ;;  %v6847_v1 = vadd.f32 %v5450_v61, %v830_v49  ;;  %v6851_v2 = vadd.f32 %v6009_v62, %v838_v50  ;;  %v5452_v3 = vpop.f32.mrb[3].mxu0  ;;  %v6011_v4 = vpop.f32.mrb[3].mxu1 }
 0x3e9   :  { %v6015_v5 = vmax.f32 %v6846_v59, 0.0  ;;  %v6017_v6 = vmax.f32 %v6850_v60, 0.0  ;;  %v6848_v7 = vadd.f32 %v5452_v3, %v834_v51  ;;  %v6852_v8 = vadd.f32 %v6011_v4, %v842_v52 }
 0x3ea   :  { %6022 = vst [vmem:[%s10641_s3] sm:$0xff] %v6014_v63  ;;  %6024 = vst [vmem:[%s10641_s3 + $0x10] sm:$0xff] %v6016_v0  ;;  %v6018_v9 = vmax.f32 %v6847_v1, 0.0  ;;  %v6020_v10 = vmax.f32 %v6851_v2, 0.0 }
 0x3eb   :  { %6023 = vst [vmem:[%s10641_s3 + $0x8] sm:$0xff] %v6015_v5  ;;  %6025 = vst [vmem:[%s10641_s3 + $0x18] sm:$0xff] %v6017_v6  ;;  %v6019_v11 = vmax.f32 %v6848_v7, 0.0  ;;  %v6021_v12 = vmax.f32 %v6852_v8, 0.0 }
 0x3ec   :  { %6026 = vst [vmem:[%s10641_s3 + $0x20] sm:$0xff] %v6018_v9  ;;  %6028 = vst [vmem:[%s10641_s3 + $0x30] sm:$0xff] %v6020_v10 }
 0x3ed   :  { %6027 = vst [vmem:[%s10641_s3 + $0x28] sm:$0xff] %v6019_v11  ;;  %6029 = vst [vmem:[%s10641_s3 + $0x38] sm:$0xff] %v6021_v12 }

</bundles_post_ra>
